<compile_context>
chip_gen: v7x
topology: tpu7x:2x2x1
jax: 0.10.0
libtpu: 0.0.40
codegen_flags: <defaults>
</compile_context>

<pallas_src>
import math
from functools import partial

import jax
import jax.numpy as jnp
from jax import lax
from jax.experimental import pallas as pl
from jax.experimental.pallas import tpu as pltpu

_LN_EPS = 1e-5


# ---------------------------------------------------------------------------
# in-kernel math helpers (f32, built only from ops with Mosaic lowerings)
# ---------------------------------------------------------------------------
def _layernorm(x, gamma, beta):
    """x: (M, C) f32; gamma/beta: (1, C) f32."""
    mean = jnp.mean(x, axis=-1, keepdims=True)
    xc = x - mean
    var = jnp.mean(xc * xc, axis=-1, keepdims=True)
    return xc * lax.rsqrt(var + _LN_EPS) * gamma + beta


def _erf(x):
    # Abramowitz & Stegun 7.1.26 polynomial erf (|err| < 1.5e-7); avoids
    # relying on an erf primitive lowering inside the kernel.
    a1, a2, a3, a4, a5 = (0.254829592, -0.284496736, 1.421413741,
                          -1.453152027, 1.061405429)
    p = 0.3275911
    sign = jnp.where(x >= 0.0, 1.0, -1.0)
    z = jnp.abs(x)
    t = 1.0 / (1.0 + p * z)
    poly = t * (a1 + t * (a2 + t * (a3 + t * (a4 + t * a5))))
    return sign * (1.0 - poly * jnp.exp(-z * z))


def _gelu(x):
    """Exact (erf-based) GELU, matching torch.nn.GELU's default."""
    return 0.5 * x * (1.0 + _erf(x * (1.0 / math.sqrt(2.0))))


# ---------------------------------------------------------------------------
# kernel 1: out = x + attn(LN1(x)) + attn1(LN11(x))      (one batch tile/step)
# ---------------------------------------------------------------------------
def _attn_parallel_kernel(x_ref,
                          g1_ref, be1_ref, g11_ref, be11_ref,
                          wqkv_a_ref, wproj_a_ref, bproj_a_ref,
                          wqkv_b_ref, wproj_b_ref, bproj_b_ref,
                          o_ref,
                          ctx_ref,
                          *, num_heads, scale):
    bt, n, c = x_ref.shape
    m = bt * n
    dh = c // num_heads

    x = x_ref[...].reshape(m, c).astype(jnp.float32)

    def attention_branch(g_ref, be_ref, wqkv_ref, wproj_ref, bproj_ref):
        # LayerNorm in f32, bf16 into the MXU with f32 accumulation.
        ln = _layernorm(x, g_ref[...], be_ref[...]).astype(jnp.bfloat16)
        qkv = jnp.dot(ln, wqkv_ref[...],
                      preferred_element_type=jnp.float32)            # (m, 3c)
        q = (qkv[:, 0:c] * scale).astype(jnp.bfloat16)                # scale once
        k = qkv[:, c:2 * c].astype(jnp.bfloat16)
        v = qkv[:, 2 * c:3 * c].astype(jnp.bfloat16)

        # Attention mixes tokens only within a batch element: static loops
        # over the batch tile and heads, writing context directly into a
        # VMEM scratch (no concatenate, no explicit K transpose).
        for bi in range(bt):
            r0, r1 = bi * n, (bi + 1) * n
            for h in range(num_heads):
                c0, c1 = h * dh, (h + 1) * dh
                qh = q[r0:r1, c0:c1]
                kh = k[r0:r1, c0:c1]
                vh = v[r0:r1, c0:c1]
                # q @ k^T without materializing a transpose of k.
                s = lax.dot_general(qh, kh, (((1,), (1,)), ((), ())),
                                    preferred_element_type=jnp.float32)
                s = s - jnp.max(s, axis=-1, keepdims=True)
                p = jnp.exp(s)
                p = p * pl.reciprocal(jnp.sum(p, axis=-1, keepdims=True),
                                      approx=True)
                ctx = jnp.dot(p.astype(jnp.bfloat16), vh,
                              preferred_element_type=jnp.float32)
                ctx_ref[r0:r1, c0:c1] = ctx.astype(ctx_ref.dtype)

        proj = jnp.dot(ctx_ref[...], wproj_ref[...],
                       preferred_element_type=jnp.float32)
        return proj + bproj_ref[...]

    out = (x
           + attention_branch(g1_ref, be1_ref, wqkv_a_ref, wproj_a_ref,
                              bproj_a_ref)
           + attention_branch(g11_ref, be11_ref, wqkv_b_ref, wproj_b_ref,
                              bproj_b_ref))
    o_ref[...] = out.reshape(bt, n, c).astype(o_ref.dtype)


# ---------------------------------------------------------------------------
# kernel 2: out = x + mlp(LN2(x)) + mlp1(LN21(x))
# ---------------------------------------------------------------------------
def _mlp_parallel_kernel(x_ref,
                         g2_ref, be2_ref, g21_ref, be21_ref,
                         w1a_ref, bf1a_ref, w2a_ref, bf2a_ref,
                         w1b_ref, bf1b_ref, w2b_ref, bf2b_ref,
                         o_ref):
    bt, n, c = x_ref.shape
    m = bt * n
    x = x_ref[...].reshape(m, c).astype(jnp.float32)

    def mlp_branch(g_ref, be_ref, w1_ref, bf1_ref, w2_ref, bf2_ref):
        ln = _layernorm(x, g_ref[...], be_ref[...]).astype(jnp.bfloat16)
        h = jnp.dot(ln, w1_ref[...],
                    preferred_element_type=jnp.float32) + bf1_ref[...]
        a = _gelu(h).astype(jnp.bfloat16)
        return jnp.dot(a, w2_ref[...],
                       preferred_element_type=jnp.float32) + bf2_ref[...]

    out = (x
           + mlp_branch(g2_ref, be2_ref, w1a_ref, bf1a_ref, w2a_ref, bf2a_ref)
           + mlp_branch(g21_ref, be21_ref, w1b_ref, bf1b_ref, w2b_ref,
                        bf2b_ref))
    o_ref[...] = out.reshape(bt, n, c).astype(o_ref.dtype)


# ---------------------------------------------------------------------------
# wrappers
# ---------------------------------------------------------------------------
def _pick_batch_tile(B, N, C, target_rows=256, max_block_bytes=4 << 20):
    """Smallest divisor of B that feeds >= target_rows rows per grid step,
    while keeping the x block below max_block_bytes."""
    best = 1
    for cand in range(1, B + 1):
        if B % cand:
            continue
        if cand * N * C * 4 > max_block_bytes:
            break
        best = cand
        if cand * N >= target_rows:
            break
    return best


_COMPILER_PARAMS = pltpu.CompilerParams(
    dimension_semantics=("parallel",),
    vmem_limit_bytes=32 * 1024 * 1024,
)

_row = lambda v: v.reshape(1, -1).astype(jnp.float32)


def attn_parallel_pallas(x, g1, be1, g11, be11,
                         wqkv_a, wproj_a, bproj_a,
                         wqkv_b, wproj_b, bproj_b, *, num_heads):
    B, N, C = x.shape
    scale = (C // num_heads) ** (-0.5)
    bt = _pick_batch_tile(B, N, C)
    bf16 = jnp.bfloat16

    kernel = partial(_attn_parallel_kernel, num_heads=num_heads, scale=scale)
    x_spec = pl.BlockSpec((bt, N, C), lambda i: (i, 0, 0))
    vec_spec = pl.BlockSpec((1, C), lambda i: (0, 0))
    wqkv_spec = pl.BlockSpec((C, 3 * C), lambda i: (0, 0))
    wproj_spec = pl.BlockSpec((C, C), lambda i: (0, 0))

    return pl.pallas_call(
        kernel,
        out_shape=jax.ShapeDtypeStruct((B, N, C), x.dtype),
        grid_spec=pltpu.PrefetchScalarGridSpec(
            num_scalar_prefetch=0,
            grid=(B // bt,),
            in_specs=[x_spec,
                      vec_spec, vec_spec, vec_spec, vec_spec,
                      wqkv_spec, wproj_spec, vec_spec,
                      wqkv_spec, wproj_spec, vec_spec],
            out_specs=x_spec,
            scratch_shapes=[pltpu.VMEM((bt * N, C), bf16)],
        ),
        compiler_params=_COMPILER_PARAMS,
    )(x, _row(g1), _row(be1), _row(g11), _row(be11),
      wqkv_a.astype(bf16), wproj_a.astype(bf16), _row(bproj_a),
      wqkv_b.astype(bf16), wproj_b.astype(bf16), _row(bproj_b))


def mlp_parallel_pallas(x, g2, be2, g21, be21,
                        w1_a, b1_a, w2_a, b2_a,
                        w1_b, b1_b, w2_b, b2_b):
    B, N, C = x.shape
    H = w1_a.shape[1]
    bt = _pick_batch_tile(B, N, C)
    bf16 = jnp.bfloat16

    x_spec = pl.BlockSpec((bt, N, C), lambda i: (i, 0, 0))
    cvec_spec = pl.BlockSpec((1, C), lambda i: (0, 0))
    hvec_spec = pl.BlockSpec((1, H), lambda i: (0, 0))
    w1_spec = pl.BlockSpec((C, H), lambda i: (0, 0))
    w2_spec = pl.BlockSpec((H, C), lambda i: (0, 0))

    return pl.pallas_call(
        _mlp_parallel_kernel,
        out_shape=jax.ShapeDtypeStruct((B, N, C), x.dtype),
        grid_spec=pltpu.PrefetchScalarGridSpec(
            num_scalar_prefetch=0,
            grid=(B // bt,),
            in_specs=[x_spec,
                      cvec_spec, cvec_spec, cvec_spec, cvec_spec,
                      w1_spec, hvec_spec, w2_spec, cvec_spec,
                      w1_spec, hvec_spec, w2_spec, cvec_spec],
            out_specs=x_spec,
        ),
        compiler_params=_COMPILER_PARAMS,
    )(x, _row(g2), _row(be2), _row(g21), _row(be21),
      w1_a.astype(bf16), _row(b1_a), w2_a.astype(bf16), _row(b2_a),
      w1_b.astype(bf16), _row(b1_b), w2_b.astype(bf16), _row(b2_b))


def block_paralx2_pallas(x, p, *, num_heads):
    x = attn_parallel_pallas(
        x, p["g1"], p["b1"], p["g11"], p["b11"],
        p["wqkv_a"], p["wproj_a"], p["bproj_a"],
        p["wqkv_b"], p["wproj_b"], p["bproj_b"],
        num_heads=num_heads)
    x = mlp_parallel_pallas(
        x, p["g2"], p["b2"], p["g21"], p["b21"],
        p["w1_a"], p["b1_a"], p["w2_a"], p["b2_a"],
        p["w1_b"], p["b1_b"], p["w2_b"], p["b2_b"])
    return x


# ---------------------------------------------------------------------------
# pure-JAX reference mirroring the PyTorch forward exactly (f32 end-to-end)
# ---------------------------------------------------------------------------
def block_paralx2_ref(x, p, *, num_heads):
    def layernorm(x, g, b):
        mean = x.mean(-1, keepdims=True)
        var = ((x - mean) ** 2).mean(-1, keepdims=True)
        return (x - mean) / jnp.sqrt(var + _LN_EPS) * g + b

    def attention(x, wqkv, wproj, bproj):
        B, N, C = x.shape
        Dh = C // num_heads
        scale = Dh ** (-0.5)
        qkv = (x @ wqkv).reshape(B, N, 3, num_heads, Dh).transpose(2, 0, 3, 1, 4)
        q, k, v = qkv[0] * scale, qkv[1], qkv[2]
        attn = jax.nn.softmax(q @ jnp.swapaxes(k, -1, -2), axis=-1)
        out = (attn @ v).transpose(0, 2, 1, 3).reshape(B, N, C)
        return out @ wproj + bproj

    def mlp(x, w1, b1, w2, b2):
        h = x @ w1 + b1
        h = jax.nn.gelu(h, approximate=False)   # exact erf GELU (torch default)
        return h @ w2 + b2

    x = (x
         + attention(layernorm(x, p["g1"], p["b1"]),
                     p["wqkv_a"], p["wproj_a"], p["bproj_a"])
         + attention(layernorm(x, p["g11"], p["b11"]),
                     p["wqkv_b"], p["wproj_b"], p["bproj_b"]))
    x = (x
         + mlp(layernorm(x, p["g2"], p["b2"]),
               p["w1_a"], p["b1_a"], p["w2_a"], p["b2_a"])
         + mlp(layernorm(x, p["g21"], p["b21"]),
               p["w1_b"], p["b1_b"], p["w2_b"], p["b2_b"]))
    return x


if __name__ == "__main__":
    B, N, C = 2, 16, 128          # lane-dense C
    num_heads = 4                 # head_dim = 32
    mlp_hidden = 4 * C            # mlp_ratio = 4.0

    key = jax.random.PRNGKey(0)
    ki = iter(jax.random.split(key, 24))

    def nrm(shape, s=1.0):
        return s * jax.random.normal(next(ki), shape, dtype=jnp.float32)

    x = nrm((B, N, C))
    params = {
        # LayerNorm affine params
        "g1": 1.0 + 0.1 * nrm((C,)),  "b1": 0.05 * nrm((C,)),
        "g11": 1.0 + 0.1 * nrm((C,)), "b11": 0.05 * nrm((C,)),
        "g2": 1.0 + 0.1 * nrm((C,)),  "b2": 0.05 * nrm((C,)),
        "g21": 1.0 + 0.1 * nrm((C,)), "b21": 0.05 * nrm((C,)),
        # attention branches (Linear weights stored as (in, out); qkv_bias=False)
        "wqkv_a": 0.05 * nrm((C, 3 * C)),
        "wproj_a": 0.05 * nrm((C, C)),
        "bproj_a": 0.02 * nrm((C,)),
        "wqkv_b": 0.05 * nrm((C, 3 * C)),
        "wproj_b": 0.05 * nrm((C, C)),
        "bproj_b": 0.02 * nrm((C,)),
        # mlp branches
        "w1_a": 0.05 * nrm((C, mlp_hidden)), "b1_a": 0.02 * nrm((mlp_hidden,)),
        "w2_a": 0.05 * nrm((mlp_hidden, C)), "b2_a": 0.02 * nrm((C,)),
        "w1_b": 0.05 * nrm((C, mlp_hidden)), "b1_b": 0.02 * nrm((mlp_hidden,)),
        "w2_b": 0.05 * nrm((mlp_hidden, C)), "b2_b": 0.02 * nrm((C,)),
    }

    out = block_paralx2_pallas(x, params, num_heads=num_heads)
    out = jax.block_until_ready(out)

    ref = block_paralx2_ref(x, params, num_heads=num_heads)
    assert out.shape == (B, N, C)
    max_err = float(jnp.max(jnp.abs(out - ref)))
    # bf16 MXU inputs + approx reciprocal => loosened tolerance vs f32 reference
    assert jnp.allclose(out, ref, atol=3e-2, rtol=3e-2), \
        f"mismatch vs reference (max abs err {max_err})"

    print("KERNEL_OK")
</pallas_src>

<mosaic_0001>
module attributes {stable_mosaic.version = 11 : i64} {
  func.func @_attn_parallel_kernel(%arg0: i32, %arg1: memref<2x16x128xf32, #tpu.memory_space<vmem>>, %arg2: memref<1x128xf32, #tpu.memory_space<vmem>>, %arg3: memref<1x128xf32, #tpu.memory_space<vmem>>, %arg4: memref<1x128xf32, #tpu.memory_space<vmem>>, %arg5: memref<1x128xf32, #tpu.memory_space<vmem>>, %arg6: memref<128x384xbf16, #tpu.memory_space<vmem>>, %arg7: memref<128x128xbf16, #tpu.memory_space<vmem>>, %arg8: memref<1x128xf32, #tpu.memory_space<vmem>>, %arg9: memref<128x384xbf16, #tpu.memory_space<vmem>>, %arg10: memref<128x128xbf16, #tpu.memory_space<vmem>>, %arg11: memref<1x128xf32, #tpu.memory_space<vmem>>, %arg12: memref<2x16x128xf32, #tpu.memory_space<vmem>>, %arg13: memref<32x128xbf16, #tpu.memory_space<vmem>>) attributes {dimension_semantics = [#tpu.dimension_semantics<parallel>], iteration_bounds = array<i64: 1>, scalar_prefetch = 0 : i64, scratch_operands = 1 : i64, tpu.core_type = #tpu.core_type<tc>, window_params = [{transform_indices = @transform_0, window_bounds = array<i64: 2, 16, 128>}, {pipeline_mode = #tpu.pipeline_mode<synchronous>, transform_indices = @transform_1, window_bounds = array<i64: 1, 128>}, {pipeline_mode = #tpu.pipeline_mode<synchronous>, transform_indices = @transform_2, window_bounds = array<i64: 1, 128>}, {pipeline_mode = #tpu.pipeline_mode<synchronous>, transform_indices = @transform_3, window_bounds = array<i64: 1, 128>}, {pipeline_mode = #tpu.pipeline_mode<synchronous>, transform_indices = @transform_4, window_bounds = array<i64: 1, 128>}, {pipeline_mode = #tpu.pipeline_mode<synchronous>, transform_indices = @transform_5, window_bounds = array<i64: 128, 384>}, {pipeline_mode = #tpu.pipeline_mode<synchronous>, transform_indices = @transform_6, window_bounds = array<i64: 128, 128>}, {pipeline_mode = #tpu.pipeline_mode<synchronous>, transform_indices = @transform_7, window_bounds = array<i64: 1, 128>}, {pipeline_mode = #tpu.pipeline_mode<synchronous>, transform_indices = @transform_8, window_bounds = array<i64: 128, 384>}, {pipeline_mode = #tpu.pipeline_mode<synchronous>, transform_indices = @transform_9, window_bounds = array<i64: 128, 128>}, {pipeline_mode = #tpu.pipeline_mode<synchronous>, transform_indices = @transform_10, window_bounds = array<i64: 1, 128>}, {transform_indices = @transform_11, window_bounds = array<i64: 2, 16, 128>}]} {
    %c0 = arith.constant 0 : index
    %c0_0 = arith.constant 0 : index
    %c0_1 = arith.constant 0 : index
    %0 = vector.load %arg1[%c0, %c0_0, %c0_1] : memref<2x16x128xf32, #tpu.memory_space<vmem>>, vector<2x16x128xf32>
    %1 = vector.shape_cast %0 : vector<2x16x128xf32> to vector<32x128xf32>
    %c0_2 = arith.constant 0 : index
    %c0_3 = arith.constant 0 : index
    %2 = vector.load %arg2[%c0_2, %c0_3] : memref<1x128xf32, #tpu.memory_space<vmem>>, vector<1x128xf32>
    %c0_4 = arith.constant 0 : index
    %c0_5 = arith.constant 0 : index
    %3 = vector.load %arg3[%c0_4, %c0_5] : memref<1x128xf32, #tpu.memory_space<vmem>>, vector<1x128xf32>
    %cst = arith.constant dense<0.000000e+00> : vector<32xf32>
    %4 = vector.multi_reduction <add>, %1, %cst [1] : vector<32x128xf32> to vector<32xf32>
    %5 = vector.shape_cast %4 : vector<32xf32> to vector<32x1xf32>
    %cst_6 = arith.constant 1.280000e+02 : f32
    %6 = vector.broadcast %cst_6 : f32 to vector<32x1xf32>
    %7 = arith.divf %5, %6 : vector<32x1xf32>
    %8 = vector.broadcast %7 : vector<32x1xf32> to vector<32x128xf32>
    %9 = arith.subf %1, %8 : vector<32x128xf32>
    %10 = arith.mulf %9, %9 : vector<32x128xf32>
    %cst_7 = arith.constant dense<0.000000e+00> : vector<32xf32>
    %11 = vector.multi_reduction <add>, %10, %cst_7 [1] : vector<32x128xf32> to vector<32xf32>
    %12 = vector.shape_cast %11 : vector<32xf32> to vector<32x1xf32>
    %cst_8 = arith.constant 1.280000e+02 : f32
    %13 = vector.broadcast %cst_8 : f32 to vector<32x1xf32>
    %14 = arith.divf %12, %13 : vector<32x1xf32>
    %cst_9 = arith.constant 9.99999974E-6 : f32
    %15 = vector.broadcast %cst_9 : f32 to vector<32x1xf32>
    %16 = arith.addf %14, %15 : vector<32x1xf32>
    %17 = math.rsqrt %16 : vector<32x1xf32>
    %18 = vector.broadcast %17 : vector<32x1xf32> to vector<32x128xf32>
    %19 = arith.mulf %9, %18 : vector<32x128xf32>
    %20 = vector.broadcast %2 : vector<1x128xf32> to vector<32x128xf32>
    %21 = arith.mulf %19, %20 : vector<32x128xf32>
    %22 = vector.broadcast %3 : vector<1x128xf32> to vector<32x128xf32>
    %23 = arith.addf %21, %22 : vector<32x128xf32>
    %24 = arith.truncf %23 : vector<32x128xf32> to vector<32x128xbf16>
    %c0_10 = arith.constant 0 : index
    %c0_11 = arith.constant 0 : index
    %25 = vector.load %arg6[%c0_10, %c0_11] : memref<128x384xbf16, #tpu.memory_space<vmem>>, vector<128x384xbf16>
    %cst_12 = arith.constant dense<0.000000e+00> : vector<32x384xf32>
    %26 = tpu.matmul %24, %25, %cst_12 {dimension_numbers = #tpu.dot_dimension_numbers<[1], [0], [0], [1], [0, 0, 1, 1], [], []>} : vector<32x128xbf16>, vector<128x384xbf16>, vector<32x384xf32> -> vector<32x384xf32>
    %27 = vector.extract_strided_slice %26 {offsets = [0, 0], sizes = [32, 128], strides = [1, 1]} : vector<32x384xf32> to vector<32x128xf32>
    %cst_13 = arith.constant 0.176776692 : f32
    %28 = vector.broadcast %cst_13 : f32 to vector<32x128xf32>
    %29 = arith.mulf %27, %28 : vector<32x128xf32>
    %30 = arith.truncf %29 : vector<32x128xf32> to vector<32x128xbf16>
    %31 = vector.extract_strided_slice %26 {offsets = [0, 128], sizes = [32, 128], strides = [1, 1]} : vector<32x384xf32> to vector<32x128xf32>
    %32 = arith.truncf %31 : vector<32x128xf32> to vector<32x128xbf16>
    %33 = vector.extract_strided_slice %26 {offsets = [0, 256], sizes = [32, 128], strides = [1, 1]} : vector<32x384xf32> to vector<32x128xf32>
    %34 = arith.truncf %33 : vector<32x128xf32> to vector<32x128xbf16>
    %35 = vector.extract_strided_slice %30 {offsets = [0, 0], sizes = [16, 32], strides = [1, 1]} : vector<32x128xbf16> to vector<16x32xbf16>
    %36 = vector.extract_strided_slice %32 {offsets = [0, 0], sizes = [16, 32], strides = [1, 1]} : vector<32x128xbf16> to vector<16x32xbf16>
    %37 = vector.extract_strided_slice %34 {offsets = [0, 0], sizes = [16, 32], strides = [1, 1]} : vector<32x128xbf16> to vector<16x32xbf16>
    %cst_14 = arith.constant dense<0.000000e+00> : vector<16x16xf32>
    %38 = tpu.matmul %35, %36, %cst_14 {dimension_numbers = #tpu.dot_dimension_numbers<[1], [1], [0], [0], [0, 0, 1, 0], [], []>} : vector<16x32xbf16>, vector<16x32xbf16>, vector<16x16xf32> -> vector<16x16xf32>
    %cst_15 = arith.constant dense<0xFF800000> : vector<16xf32>
    %39 = vector.multi_reduction <maximumf>, %38, %cst_15 [1] : vector<16x16xf32> to vector<16xf32>
    %40 = vector.shape_cast %39 : vector<16xf32> to vector<16x1xf32>
    %41 = vector.broadcast %40 : vector<16x1xf32> to vector<16x16xf32>
    %42 = arith.subf %38, %41 : vector<16x16xf32>
    %43 = math.exp %42 : vector<16x16xf32>
    %cst_16 = arith.constant dense<0.000000e+00> : vector<16xf32>
    %44 = vector.multi_reduction <add>, %43, %cst_16 [1] : vector<16x16xf32> to vector<16xf32>
    %45 = vector.shape_cast %44 : vector<16xf32> to vector<16x1xf32>
    %46 = tpu.reciprocal %45 {approx = true} : vector<16x1xf32> -> vector<16x1xf32>
    %47 = vector.broadcast %46 : vector<16x1xf32> to vector<16x16xf32>
    %48 = arith.mulf %43, %47 : vector<16x16xf32>
    %49 = arith.truncf %48 : vector<16x16xf32> to vector<16x16xbf16>
    %cst_17 = arith.constant dense<0.000000e+00> : vector<16x32xf32>
    %50 = tpu.matmul %49, %37, %cst_17 {dimension_numbers = #tpu.dot_dimension_numbers<[1], [0], [0], [1], [0, 0, 1, 1], [], []>} : vector<16x16xbf16>, vector<16x32xbf16>, vector<16x32xf32> -> vector<16x32xf32>
    %51 = arith.truncf %50 : vector<16x32xf32> to vector<16x32xbf16>
    %c0_18 = arith.constant 0 : index
    %c0_19 = arith.constant 0 : index
    %52 = vector.load %arg13[%c0_18, %c0_19] : memref<32x128xbf16, #tpu.memory_space<vmem>>, vector<16x32xbf16>
    tpu.vector_store %arg13[%c0_18, %c0_19], %51 {strides = array<i32>} : memref<32x128xbf16, #tpu.memory_space<vmem>>, vector<16x32xbf16>,
    %53 = vector.extract_strided_slice %30 {offsets = [0, 32], sizes = [16, 32], strides = [1, 1]} : vector<32x128xbf16> to vector<16x32xbf16>
    %54 = vector.extract_strided_slice %32 {offsets = [0, 32], sizes = [16, 32], strides = [1, 1]} : vector<32x128xbf16> to vector<16x32xbf16>
    %55 = vector.extract_strided_slice %34 {offsets = [0, 32], sizes = [16, 32], strides = [1, 1]} : vector<32x128xbf16> to vector<16x32xbf16>
    %cst_20 = arith.constant dense<0.000000e+00> : vector<16x16xf32>
    %56 = tpu.matmul %53, %54, %cst_20 {dimension_numbers = #tpu.dot_dimension_numbers<[1], [1], [0], [0], [0, 0, 1, 0], [], []>} : vector<16x32xbf16>, vector<16x32xbf16>, vector<16x16xf32> -> vector<16x16xf32>
    %cst_21 = arith.constant dense<0xFF800000> : vector<16xf32>
    %57 = vector.multi_reduction <maximumf>, %56, %cst_21 [1] : vector<16x16xf32> to vector<16xf32>
    %58 = vector.shape_cast %57 : vector<16xf32> to vector<16x1xf32>
    %59 = vector.broadcast %58 : vector<16x1xf32> to vector<16x16xf32>
    %60 = arith.subf %56, %59 : vector<16x16xf32>
    %61 = math.exp %60 : vector<16x16xf32>
    %cst_22 = arith.constant dense<0.000000e+00> : vector<16xf32>
    %62 = vector.multi_reduction <add>, %61, %cst_22 [1] : vector<16x16xf32> to vector<16xf32>
    %63 = vector.shape_cast %62 : vector<16xf32> to vector<16x1xf32>
    %64 = tpu.reciprocal %63 {approx = true} : vector<16x1xf32> -> vector<16x1xf32>
    %65 = vector.broadcast %64 : vector<16x1xf32> to vector<16x16xf32>
    %66 = arith.mulf %61, %65 : vector<16x16xf32>
    %67 = arith.truncf %66 : vector<16x16xf32> to vector<16x16xbf16>
    %cst_23 = arith.constant dense<0.000000e+00> : vector<16x32xf32>
    %68 = tpu.matmul %67, %55, %cst_23 {dimension_numbers = #tpu.dot_dimension_numbers<[1], [0], [0], [1], [0, 0, 1, 1], [], []>} : vector<16x16xbf16>, vector<16x32xbf16>, vector<16x32xf32> -> vector<16x32xf32>
    %69 = arith.truncf %68 : vector<16x32xf32> to vector<16x32xbf16>
    %c0_24 = arith.constant 0 : index
    %c32 = arith.constant 32 : index
    %70 = vector.load %arg13[%c0_24, %c32] : memref<32x128xbf16, #tpu.memory_space<vmem>>, vector<16x32xbf16>
    tpu.vector_store %arg13[%c0_24, %c32], %69 {strides = array<i32>} : memref<32x128xbf16, #tpu.memory_space<vmem>>, vector<16x32xbf16>,
    %71 = vector.extract_strided_slice %30 {offsets = [0, 64], sizes = [16, 32], strides = [1, 1]} : vector<32x128xbf16> to vector<16x32xbf16>
    %72 = vector.extract_strided_slice %32 {offsets = [0, 64], sizes = [16, 32], strides = [1, 1]} : vector<32x128xbf16> to vector<16x32xbf16>
    %73 = vector.extract_strided_slice %34 {offsets = [0, 64], sizes = [16, 32], strides = [1, 1]} : vector<32x128xbf16> to vector<16x32xbf16>
    %cst_25 = arith.constant dense<0.000000e+00> : vector<16x16xf32>
    %74 = tpu.matmul %71, %72, %cst_25 {dimension_numbers = #tpu.dot_dimension_numbers<[1], [1], [0], [0], [0, 0, 1, 0], [], []>} : vector<16x32xbf16>, vector<16x32xbf16>, vector<16x16xf32> -> vector<16x16xf32>
    %cst_26 = arith.constant dense<0xFF800000> : vector<16xf32>
    %75 = vector.multi_reduction <maximumf>, %74, %cst_26 [1] : vector<16x16xf32> to vector<16xf32>
    %76 = vector.shape_cast %75 : vector<16xf32> to vector<16x1xf32>
    %77 = vector.broadcast %76 : vector<16x1xf32> to vector<16x16xf32>
    %78 = arith.subf %74, %77 : vector<16x16xf32>
    %79 = math.exp %78 : vector<16x16xf32>
    %cst_27 = arith.constant dense<0.000000e+00> : vector<16xf32>
    %80 = vector.multi_reduction <add>, %79, %cst_27 [1] : vector<16x16xf32> to vector<16xf32>
    %81 = vector.shape_cast %80 : vector<16xf32> to vector<16x1xf32>
    %82 = tpu.reciprocal %81 {approx = true} : vector<16x1xf32> -> vector<16x1xf32>
    %83 = vector.broadcast %82 : vector<16x1xf32> to vector<16x16xf32>
    %84 = arith.mulf %79, %83 : vector<16x16xf32>
    %85 = arith.truncf %84 : vector<16x16xf32> to vector<16x16xbf16>
    %cst_28 = arith.constant dense<0.000000e+00> : vector<16x32xf32>
    %86 = tpu.matmul %85, %73, %cst_28 {dimension_numbers = #tpu.dot_dimension_numbers<[1], [0], [0], [1], [0, 0, 1, 1], [], []>} : vector<16x16xbf16>, vector<16x32xbf16>, vector<16x32xf32> -> vector<16x32xf32>
    %87 = arith.truncf %86 : vector<16x32xf32> to vector<16x32xbf16>
    %c0_29 = arith.constant 0 : index
    %c64 = arith.constant 64 : index
    %88 = vector.load %arg13[%c0_29, %c64] : memref<32x128xbf16, #tpu.memory_space<vmem>>, vector<16x32xbf16>
    tpu.vector_store %arg13[%c0_29, %c64], %87 {strides = array<i32>} : memref<32x128xbf16, #tpu.memory_space<vmem>>, vector<16x32xbf16>,
    %89 = vector.extract_strided_slice %30 {offsets = [0, 96], sizes = [16, 32], strides = [1, 1]} : vector<32x128xbf16> to vector<16x32xbf16>
    %90 = vector.extract_strided_slice %32 {offsets = [0, 96], sizes = [16, 32], strides = [1, 1]} : vector<32x128xbf16> to vector<16x32xbf16>
    %91 = vector.extract_strided_slice %34 {offsets = [0, 96], sizes = [16, 32], strides = [1, 1]} : vector<32x128xbf16> to vector<16x32xbf16>
    %cst_30 = arith.constant dense<0.000000e+00> : vector<16x16xf32>
    %92 = tpu.matmul %89, %90, %cst_30 {dimension_numbers = #tpu.dot_dimension_numbers<[1], [1], [0], [0], [0, 0, 1, 0], [], []>} : vector<16x32xbf16>, vector<16x32xbf16>, vector<16x16xf32> -> vector<16x16xf32>
    %cst_31 = arith.constant dense<0xFF800000> : vector<16xf32>
    %93 = vector.multi_reduction <maximumf>, %92, %cst_31 [1] : vector<16x16xf32> to vector<16xf32>
    %94 = vector.shape_cast %93 : vector<16xf32> to vector<16x1xf32>
    %95 = vector.broadcast %94 : vector<16x1xf32> to vector<16x16xf32>
    %96 = arith.subf %92, %95 : vector<16x16xf32>
    %97 = math.exp %96 : vector<16x16xf32>
    %cst_32 = arith.constant dense<0.000000e+00> : vector<16xf32>
    %98 = vector.multi_reduction <add>, %97, %cst_32 [1] : vector<16x16xf32> to vector<16xf32>
    %99 = vector.shape_cast %98 : vector<16xf32> to vector<16x1xf32>
    %100 = tpu.reciprocal %99 {approx = true} : vector<16x1xf32> -> vector<16x1xf32>
    %101 = vector.broadcast %100 : vector<16x1xf32> to vector<16x16xf32>
    %102 = arith.mulf %97, %101 : vector<16x16xf32>
    %103 = arith.truncf %102 : vector<16x16xf32> to vector<16x16xbf16>
    %cst_33 = arith.constant dense<0.000000e+00> : vector<16x32xf32>
    %104 = tpu.matmul %103, %91, %cst_33 {dimension_numbers = #tpu.dot_dimension_numbers<[1], [0], [0], [1], [0, 0, 1, 1], [], []>} : vector<16x16xbf16>, vector<16x32xbf16>, vector<16x32xf32> -> vector<16x32xf32>
    %105 = arith.truncf %104 : vector<16x32xf32> to vector<16x32xbf16>
    %c0_34 = arith.constant 0 : index
    %c96 = arith.constant 96 : index
    %106 = vector.load %arg13[%c0_34, %c96] : memref<32x128xbf16, #tpu.memory_space<vmem>>, vector<16x32xbf16>
    tpu.vector_store %arg13[%c0_34, %c96], %105 {strides = array<i32>} : memref<32x128xbf16, #tpu.memory_space<vmem>>, vector<16x32xbf16>,
    %107 = vector.extract_strided_slice %30 {offsets = [16, 0], sizes = [16, 32], strides = [1, 1]} : vector<32x128xbf16> to vector<16x32xbf16>
    %108 = vector.extract_strided_slice %32 {offsets = [16, 0], sizes = [16, 32], strides = [1, 1]} : vector<32x128xbf16> to vector<16x32xbf16>
    %109 = vector.extract_strided_slice %34 {offsets = [16, 0], sizes = [16, 32], strides = [1, 1]} : vector<32x128xbf16> to vector<16x32xbf16>
    %cst_35 = arith.constant dense<0.000000e+00> : vector<16x16xf32>
    %110 = tpu.matmul %107, %108, %cst_35 {dimension_numbers = #tpu.dot_dimension_numbers<[1], [1], [0], [0], [0, 0, 1, 0], [], []>} : vector<16x32xbf16>, vector<16x32xbf16>, vector<16x16xf32> -> vector<16x16xf32>
    %cst_36 = arith.constant dense<0xFF800000> : vector<16xf32>
    %111 = vector.multi_reduction <maximumf>, %110, %cst_36 [1] : vector<16x16xf32> to vector<16xf32>
    %112 = vector.shape_cast %111 : vector<16xf32> to vector<16x1xf32>
    %113 = vector.broadcast %112 : vector<16x1xf32> to vector<16x16xf32>
    %114 = arith.subf %110, %113 : vector<16x16xf32>
    %115 = math.exp %114 : vector<16x16xf32>
    %cst_37 = arith.constant dense<0.000000e+00> : vector<16xf32>
    %116 = vector.multi_reduction <add>, %115, %cst_37 [1] : vector<16x16xf32> to vector<16xf32>
    %117 = vector.shape_cast %116 : vector<16xf32> to vector<16x1xf32>
    %118 = tpu.reciprocal %117 {approx = true} : vector<16x1xf32> -> vector<16x1xf32>
    %119 = vector.broadcast %118 : vector<16x1xf32> to vector<16x16xf32>
    %120 = arith.mulf %115, %119 : vector<16x16xf32>
    %121 = arith.truncf %120 : vector<16x16xf32> to vector<16x16xbf16>
    %cst_38 = arith.constant dense<0.000000e+00> : vector<16x32xf32>
    %122 = tpu.matmul %121, %109, %cst_38 {dimension_numbers = #tpu.dot_dimension_numbers<[1], [0], [0], [1], [0, 0, 1, 1], [], []>} : vector<16x16xbf16>, vector<16x32xbf16>, vector<16x32xf32> -> vector<16x32xf32>
    %123 = arith.truncf %122 : vector<16x32xf32> to vector<16x32xbf16>
    %c16 = arith.constant 16 : index
    %c0_39 = arith.constant 0 : index
    %124 = vector.load %arg13[%c16, %c0_39] : memref<32x128xbf16, #tpu.memory_space<vmem>>, vector<16x32xbf16>
    tpu.vector_store %arg13[%c16, %c0_39], %123 {strides = array<i32>} : memref<32x128xbf16, #tpu.memory_space<vmem>>, vector<16x32xbf16>,
    %125 = vector.extract_strided_slice %30 {offsets = [16, 32], sizes = [16, 32], strides = [1, 1]} : vector<32x128xbf16> to vector<16x32xbf16>
    %126 = vector.extract_strided_slice %32 {offsets = [16, 32], sizes = [16, 32], strides = [1, 1]} : vector<32x128xbf16> to vector<16x32xbf16>
    %127 = vector.extract_strided_slice %34 {offsets = [16, 32], sizes = [16, 32], strides = [1, 1]} : vector<32x128xbf16> to vector<16x32xbf16>
    %cst_40 = arith.constant dense<0.000000e+00> : vector<16x16xf32>
    %128 = tpu.matmul %125, %126, %cst_40 {dimension_numbers = #tpu.dot_dimension_numbers<[1], [1], [0], [0], [0, 0, 1, 0], [], []>} : vector<16x32xbf16>, vector<16x32xbf16>, vector<16x16xf32> -> vector<16x16xf32>
    %cst_41 = arith.constant dense<0xFF800000> : vector<16xf32>
    %129 = vector.multi_reduction <maximumf>, %128, %cst_41 [1] : vector<16x16xf32> to vector<16xf32>
    %130 = vector.shape_cast %129 : vector<16xf32> to vector<16x1xf32>
    %131 = vector.broadcast %130 : vector<16x1xf32> to vector<16x16xf32>
    %132 = arith.subf %128, %131 : vector<16x16xf32>
    %133 = math.exp %132 : vector<16x16xf32>
    %cst_42 = arith.constant dense<0.000000e+00> : vector<16xf32>
    %134 = vector.multi_reduction <add>, %133, %cst_42 [1] : vector<16x16xf32> to vector<16xf32>
    %135 = vector.shape_cast %134 : vector<16xf32> to vector<16x1xf32>
    %136 = tpu.reciprocal %135 {approx = true} : vector<16x1xf32> -> vector<16x1xf32>
    %137 = vector.broadcast %136 : vector<16x1xf32> to vector<16x16xf32>
    %138 = arith.mulf %133, %137 : vector<16x16xf32>
    %139 = arith.truncf %138 : vector<16x16xf32> to vector<16x16xbf16>
    %cst_43 = arith.constant dense<0.000000e+00> : vector<16x32xf32>
    %140 = tpu.matmul %139, %127, %cst_43 {dimension_numbers = #tpu.dot_dimension_numbers<[1], [0], [0], [1], [0, 0, 1, 1], [], []>} : vector<16x16xbf16>, vector<16x32xbf16>, vector<16x32xf32> -> vector<16x32xf32>
    %141 = arith.truncf %140 : vector<16x32xf32> to vector<16x32xbf16>
    %c16_44 = arith.constant 16 : index
    %c32_45 = arith.constant 32 : index
    %142 = vector.load %arg13[%c16_44, %c32_45] : memref<32x128xbf16, #tpu.memory_space<vmem>>, vector<16x32xbf16>
    tpu.vector_store %arg13[%c16_44, %c32_45], %141 {strides = array<i32>} : memref<32x128xbf16, #tpu.memory_space<vmem>>, vector<16x32xbf16>,
    %143 = vector.extract_strided_slice %30 {offsets = [16, 64], sizes = [16, 32], strides = [1, 1]} : vector<32x128xbf16> to vector<16x32xbf16>
    %144 = vector.extract_strided_slice %32 {offsets = [16, 64], sizes = [16, 32], strides = [1, 1]} : vector<32x128xbf16> to vector<16x32xbf16>
    %145 = vector.extract_strided_slice %34 {offsets = [16, 64], sizes = [16, 32], strides = [1, 1]} : vector<32x128xbf16> to vector<16x32xbf16>
    %cst_46 = arith.constant dense<0.000000e+00> : vector<16x16xf32>
    %146 = tpu.matmul %143, %144, %cst_46 {dimension_numbers = #tpu.dot_dimension_numbers<[1], [1], [0], [0], [0, 0, 1, 0], [], []>} : vector<16x32xbf16>, vector<16x32xbf16>, vector<16x16xf32> -> vector<16x16xf32>
    %cst_47 = arith.constant dense<0xFF800000> : vector<16xf32>
    %147 = vector.multi_reduction <maximumf>, %146, %cst_47 [1] : vector<16x16xf32> to vector<16xf32>
    %148 = vector.shape_cast %147 : vector<16xf32> to vector<16x1xf32>
    %149 = vector.broadcast %148 : vector<16x1xf32> to vector<16x16xf32>
    %150 = arith.subf %146, %149 : vector<16x16xf32>
    %151 = math.exp %150 : vector<16x16xf32>
    %cst_48 = arith.constant dense<0.000000e+00> : vector<16xf32>
    %152 = vector.multi_reduction <add>, %151, %cst_48 [1] : vector<16x16xf32> to vector<16xf32>
    %153 = vector.shape_cast %152 : vector<16xf32> to vector<16x1xf32>
    %154 = tpu.reciprocal %153 {approx = true} : vector<16x1xf32> -> vector<16x1xf32>
    %155 = vector.broadcast %154 : vector<16x1xf32> to vector<16x16xf32>
    %156 = arith.mulf %151, %155 : vector<16x16xf32>
    %157 = arith.truncf %156 : vector<16x16xf32> to vector<16x16xbf16>
    %cst_49 = arith.constant dense<0.000000e+00> : vector<16x32xf32>
    %158 = tpu.matmul %157, %145, %cst_49 {dimension_numbers = #tpu.dot_dimension_numbers<[1], [0], [0], [1], [0, 0, 1, 1], [], []>} : vector<16x16xbf16>, vector<16x32xbf16>, vector<16x32xf32> -> vector<16x32xf32>
    %159 = arith.truncf %158 : vector<16x32xf32> to vector<16x32xbf16>
    %c16_50 = arith.constant 16 : index
    %c64_51 = arith.constant 64 : index
    %160 = vector.load %arg13[%c16_50, %c64_51] : memref<32x128xbf16, #tpu.memory_space<vmem>>, vector<16x32xbf16>
    tpu.vector_store %arg13[%c16_50, %c64_51], %159 {strides = array<i32>} : memref<32x128xbf16, #tpu.memory_space<vmem>>, vector<16x32xbf16>,
    %161 = vector.extract_strided_slice %30 {offsets = [16, 96], sizes = [16, 32], strides = [1, 1]} : vector<32x128xbf16> to vector<16x32xbf16>
    %162 = vector.extract_strided_slice %32 {offsets = [16, 96], sizes = [16, 32], strides = [1, 1]} : vector<32x128xbf16> to vector<16x32xbf16>
    %163 = vector.extract_strided_slice %34 {offsets = [16, 96], sizes = [16, 32], strides = [1, 1]} : vector<32x128xbf16> to vector<16x32xbf16>
    %cst_52 = arith.constant dense<0.000000e+00> : vector<16x16xf32>
    %164 = tpu.matmul %161, %162, %cst_52 {dimension_numbers = #tpu.dot_dimension_numbers<[1], [1], [0], [0], [0, 0, 1, 0], [], []>} : vector<16x32xbf16>, vector<16x32xbf16>, vector<16x16xf32> -> vector<16x16xf32>
    %cst_53 = arith.constant dense<0xFF800000> : vector<16xf32>
    %165 = vector.multi_reduction <maximumf>, %164, %cst_53 [1] : vector<16x16xf32> to vector<16xf32>
    %166 = vector.shape_cast %165 : vector<16xf32> to vector<16x1xf32>
    %167 = vector.broadcast %166 : vector<16x1xf32> to vector<16x16xf32>
    %168 = arith.subf %164, %167 : vector<16x16xf32>
    %169 = math.exp %168 : vector<16x16xf32>
    %cst_54 = arith.constant dense<0.000000e+00> : vector<16xf32>
    %170 = vector.multi_reduction <add>, %169, %cst_54 [1] : vector<16x16xf32> to vector<16xf32>
    %171 = vector.shape_cast %170 : vector<16xf32> to vector<16x1xf32>
    %172 = tpu.reciprocal %171 {approx = true} : vector<16x1xf32> -> vector<16x1xf32>
    %173 = vector.broadcast %172 : vector<16x1xf32> to vector<16x16xf32>
    %174 = arith.mulf %169, %173 : vector<16x16xf32>
    %175 = arith.truncf %174 : vector<16x16xf32> to vector<16x16xbf16>
    %cst_55 = arith.constant dense<0.000000e+00> : vector<16x32xf32>
    %176 = tpu.matmul %175, %163, %cst_55 {dimension_numbers = #tpu.dot_dimension_numbers<[1], [0], [0], [1], [0, 0, 1, 1], [], []>} : vector<16x16xbf16>, vector<16x32xbf16>, vector<16x32xf32> -> vector<16x32xf32>
    %177 = arith.truncf %176 : vector<16x32xf32> to vector<16x32xbf16>
    %c16_56 = arith.constant 16 : index
    %c96_57 = arith.constant 96 : index
    %178 = vector.load %arg13[%c16_56, %c96_57] : memref<32x128xbf16, #tpu.memory_space<vmem>>, vector<16x32xbf16>
    tpu.vector_store %arg13[%c16_56, %c96_57], %177 {strides = array<i32>} : memref<32x128xbf16, #tpu.memory_space<vmem>>, vector<16x32xbf16>,
    %c0_58 = arith.constant 0 : index
    %c0_59 = arith.constant 0 : index
    %179 = vector.load %arg13[%c0_58, %c0_59] : memref<32x128xbf16, #tpu.memory_space<vmem>>, vector<32x128xbf16>
    %c0_60 = arith.constant 0 : index
    %c0_61 = arith.constant 0 : index
    %180 = vector.load %arg7[%c0_60, %c0_61] : memref<128x128xbf16, #tpu.memory_space<vmem>>, vector<128x128xbf16>
    %cst_62 = arith.constant dense<0.000000e+00> : vector<32x128xf32>
    %181 = tpu.matmul %179, %180, %cst_62 {dimension_numbers = #tpu.dot_dimension_numbers<[1], [0], [0], [1], [0, 0, 1, 1], [], []>} : vector<32x128xbf16>, vector<128x128xbf16>, vector<32x128xf32> -> vector<32x128xf32>
    %c0_63 = arith.constant 0 : index
    %c0_64 = arith.constant 0 : index
    %182 = vector.load %arg8[%c0_63, %c0_64] : memref<1x128xf32, #tpu.memory_space<vmem>>, vector<1x128xf32>
    %183 = vector.broadcast %182 : vector<1x128xf32> to vector<32x128xf32>
    %184 = arith.addf %181, %183 : vector<32x128xf32>
    %185 = arith.addf %1, %184 : vector<32x128xf32>
    %c0_65 = arith.constant 0 : index
    %c0_66 = arith.constant 0 : index
    %186 = vector.load %arg4[%c0_65, %c0_66] : memref<1x128xf32, #tpu.memory_space<vmem>>, vector<1x128xf32>
    %c0_67 = arith.constant 0 : index
    %c0_68 = arith.constant 0 : index
    %187 = vector.load %arg5[%c0_67, %c0_68] : memref<1x128xf32, #tpu.memory_space<vmem>>, vector<1x128xf32>
    %cst_69 = arith.constant dense<0.000000e+00> : vector<32xf32>
    %188 = vector.multi_reduction <add>, %1, %cst_69 [1] : vector<32x128xf32> to vector<32xf32>
    %189 = vector.shape_cast %188 : vector<32xf32> to vector<32x1xf32>
    %cst_70 = arith.constant 1.280000e+02 : f32
    %190 = vector.broadcast %cst_70 : f32 to vector<32x1xf32>
    %191 = arith.divf %189, %190 : vector<32x1xf32>
    %192 = vector.broadcast %191 : vector<32x1xf32> to vector<32x128xf32>
    %193 = arith.subf %1, %192 : vector<32x128xf32>
    %194 = arith.mulf %193, %193 : vector<32x128xf32>
    %cst_71 = arith.constant dense<0.000000e+00> : vector<32xf32>
    %195 = vector.multi_reduction <add>, %194, %cst_71 [1] : vector<32x128xf32> to vector<32xf32>
    %196 = vector.shape_cast %195 : vector<32xf32> to vector<32x1xf32>
    %cst_72 = arith.constant 1.280000e+02 : f32
    %197 = vector.broadcast %cst_72 : f32 to vector<32x1xf32>
    %198 = arith.divf %196, %197 : vector<32x1xf32>
    %cst_73 = arith.constant 9.99999974E-6 : f32
    %199 = vector.broadcast %cst_73 : f32 to vector<32x1xf32>
    %200 = arith.addf %198, %199 : vector<32x1xf32>
    %201 = math.rsqrt %200 : vector<32x1xf32>
    %202 = vector.broadcast %201 : vector<32x1xf32> to vector<32x128xf32>
    %203 = arith.mulf %193, %202 : vector<32x128xf32>
    %204 = vector.broadcast %186 : vector<1x128xf32> to vector<32x128xf32>
    %205 = arith.mulf %203, %204 : vector<32x128xf32>
    %206 = vector.broadcast %187 : vector<1x128xf32> to vector<32x128xf32>
    %207 = arith.addf %205, %206 : vector<32x128xf32>
    %208 = arith.truncf %207 : vector<32x128xf32> to vector<32x128xbf16>
    %c0_74 = arith.constant 0 : index
    %c0_75 = arith.constant 0 : index
    %209 = vector.load %arg9[%c0_74, %c0_75] : memref<128x384xbf16, #tpu.memory_space<vmem>>, vector<128x384xbf16>
    %cst_76 = arith.constant dense<0.000000e+00> : vector<32x384xf32>
    %210 = tpu.matmul %208, %209, %cst_76 {dimension_numbers = #tpu.dot_dimension_numbers<[1], [0], [0], [1], [0, 0, 1, 1], [], []>} : vector<32x128xbf16>, vector<128x384xbf16>, vector<32x384xf32> -> vector<32x384xf32>
    %211 = vector.extract_strided_slice %210 {offsets = [0, 0], sizes = [32, 128], strides = [1, 1]} : vector<32x384xf32> to vector<32x128xf32>
    %cst_77 = arith.constant 0.176776692 : f32
    %212 = vector.broadcast %cst_77 : f32 to vector<32x128xf32>
    %213 = arith.mulf %211, %212 : vector<32x128xf32>
    %214 = arith.truncf %213 : vector<32x128xf32> to vector<32x128xbf16>
    %215 = vector.extract_strided_slice %210 {offsets = [0, 128], sizes = [32, 128], strides = [1, 1]} : vector<32x384xf32> to vector<32x128xf32>
    %216 = arith.truncf %215 : vector<32x128xf32> to vector<32x128xbf16>
    %217 = vector.extract_strided_slice %210 {offsets = [0, 256], sizes = [32, 128], strides = [1, 1]} : vector<32x384xf32> to vector<32x128xf32>
    %218 = arith.truncf %217 : vector<32x128xf32> to vector<32x128xbf16>
    %219 = vector.extract_strided_slice %214 {offsets = [0, 0], sizes = [16, 32], strides = [1, 1]} : vector<32x128xbf16> to vector<16x32xbf16>
    %220 = vector.extract_strided_slice %216 {offsets = [0, 0], sizes = [16, 32], strides = [1, 1]} : vector<32x128xbf16> to vector<16x32xbf16>
    %221 = vector.extract_strided_slice %218 {offsets = [0, 0], sizes = [16, 32], strides = [1, 1]} : vector<32x128xbf16> to vector<16x32xbf16>
    %cst_78 = arith.constant dense<0.000000e+00> : vector<16x16xf32>
    %222 = tpu.matmul %219, %220, %cst_78 {dimension_numbers = #tpu.dot_dimension_numbers<[1], [1], [0], [0], [0, 0, 1, 0], [], []>} : vector<16x32xbf16>, vector<16x32xbf16>, vector<16x16xf32> -> vector<16x16xf32>
    %cst_79 = arith.constant dense<0xFF800000> : vector<16xf32>
    %223 = vector.multi_reduction <maximumf>, %222, %cst_79 [1] : vector<16x16xf32> to vector<16xf32>
    %224 = vector.shape_cast %223 : vector<16xf32> to vector<16x1xf32>
    %225 = vector.broadcast %224 : vector<16x1xf32> to vector<16x16xf32>
    %226 = arith.subf %222, %225 : vector<16x16xf32>
    %227 = math.exp %226 : vector<16x16xf32>
    %cst_80 = arith.constant dense<0.000000e+00> : vector<16xf32>
    %228 = vector.multi_reduction <add>, %227, %cst_80 [1] : vector<16x16xf32> to vector<16xf32>
    %229 = vector.shape_cast %228 : vector<16xf32> to vector<16x1xf32>
    %230 = tpu.reciprocal %229 {approx = true} : vector<16x1xf32> -> vector<16x1xf32>
    %231 = vector.broadcast %230 : vector<16x1xf32> to vector<16x16xf32>
    %232 = arith.mulf %227, %231 : vector<16x16xf32>
    %233 = arith.truncf %232 : vector<16x16xf32> to vector<16x16xbf16>
    %cst_81 = arith.constant dense<0.000000e+00> : vector<16x32xf32>
    %234 = tpu.matmul %233, %221, %cst_81 {dimension_numbers = #tpu.dot_dimension_numbers<[1], [0], [0], [1], [0, 0, 1, 1], [], []>} : vector<16x16xbf16>, vector<16x32xbf16>, vector<16x32xf32> -> vector<16x32xf32>
    %235 = arith.truncf %234 : vector<16x32xf32> to vector<16x32xbf16>
    %c0_82 = arith.constant 0 : index
    %c0_83 = arith.constant 0 : index
    %236 = vector.load %arg13[%c0_82, %c0_83] : memref<32x128xbf16, #tpu.memory_space<vmem>>, vector<16x32xbf16>
    tpu.vector_store %arg13[%c0_82, %c0_83], %235 {strides = array<i32>} : memref<32x128xbf16, #tpu.memory_space<vmem>>, vector<16x32xbf16>,
    %237 = vector.extract_strided_slice %214 {offsets = [0, 32], sizes = [16, 32], strides = [1, 1]} : vector<32x128xbf16> to vector<16x32xbf16>
    %238 = vector.extract_strided_slice %216 {offsets = [0, 32], sizes = [16, 32], strides = [1, 1]} : vector<32x128xbf16> to vector<16x32xbf16>
    %239 = vector.extract_strided_slice %218 {offsets = [0, 32], sizes = [16, 32], strides = [1, 1]} : vector<32x128xbf16> to vector<16x32xbf16>
    %cst_84 = arith.constant dense<0.000000e+00> : vector<16x16xf32>
    %240 = tpu.matmul %237, %238, %cst_84 {dimension_numbers = #tpu.dot_dimension_numbers<[1], [1], [0], [0], [0, 0, 1, 0], [], []>} : vector<16x32xbf16>, vector<16x32xbf16>, vector<16x16xf32> -> vector<16x16xf32>
    %cst_85 = arith.constant dense<0xFF800000> : vector<16xf32>
    %241 = vector.multi_reduction <maximumf>, %240, %cst_85 [1] : vector<16x16xf32> to vector<16xf32>
    %242 = vector.shape_cast %241 : vector<16xf32> to vector<16x1xf32>
    %243 = vector.broadcast %242 : vector<16x1xf32> to vector<16x16xf32>
    %244 = arith.subf %240, %243 : vector<16x16xf32>
    %245 = math.exp %244 : vector<16x16xf32>
    %cst_86 = arith.constant dense<0.000000e+00> : vector<16xf32>
    %246 = vector.multi_reduction <add>, %245, %cst_86 [1] : vector<16x16xf32> to vector<16xf32>
    %247 = vector.shape_cast %246 : vector<16xf32> to vector<16x1xf32>
    %248 = tpu.reciprocal %247 {approx = true} : vector<16x1xf32> -> vector<16x1xf32>
    %249 = vector.broadcast %248 : vector<16x1xf32> to vector<16x16xf32>
    %250 = arith.mulf %245, %249 : vector<16x16xf32>
    %251 = arith.truncf %250 : vector<16x16xf32> to vector<16x16xbf16>
    %cst_87 = arith.constant dense<0.000000e+00> : vector<16x32xf32>
    %252 = tpu.matmul %251, %239, %cst_87 {dimension_numbers = #tpu.dot_dimension_numbers<[1], [0], [0], [1], [0, 0, 1, 1], [], []>} : vector<16x16xbf16>, vector<16x32xbf16>, vector<16x32xf32> -> vector<16x32xf32>
    %253 = arith.truncf %252 : vector<16x32xf32> to vector<16x32xbf16>
    %c0_88 = arith.constant 0 : index
    %c32_89 = arith.constant 32 : index
    %254 = vector.load %arg13[%c0_88, %c32_89] : memref<32x128xbf16, #tpu.memory_space<vmem>>, vector<16x32xbf16>
    tpu.vector_store %arg13[%c0_88, %c32_89], %253 {strides = array<i32>} : memref<32x128xbf16, #tpu.memory_space<vmem>>, vector<16x32xbf16>,
    %255 = vector.extract_strided_slice %214 {offsets = [0, 64], sizes = [16, 32], strides = [1, 1]} : vector<32x128xbf16> to vector<16x32xbf16>
    %256 = vector.extract_strided_slice %216 {offsets = [0, 64], sizes = [16, 32], strides = [1, 1]} : vector<32x128xbf16> to vector<16x32xbf16>
    %257 = vector.extract_strided_slice %218 {offsets = [0, 64], sizes = [16, 32], strides = [1, 1]} : vector<32x128xbf16> to vector<16x32xbf16>
    %cst_90 = arith.constant dense<0.000000e+00> : vector<16x16xf32>
    %258 = tpu.matmul %255, %256, %cst_90 {dimension_numbers = #tpu.dot_dimension_numbers<[1], [1], [0], [0], [0, 0, 1, 0], [], []>} : vector<16x32xbf16>, vector<16x32xbf16>, vector<16x16xf32> -> vector<16x16xf32>
    %cst_91 = arith.constant dense<0xFF800000> : vector<16xf32>
    %259 = vector.multi_reduction <maximumf>, %258, %cst_91 [1] : vector<16x16xf32> to vector<16xf32>
    %260 = vector.shape_cast %259 : vector<16xf32> to vector<16x1xf32>
    %261 = vector.broadcast %260 : vector<16x1xf32> to vector<16x16xf32>
    %262 = arith.subf %258, %261 : vector<16x16xf32>
    %263 = math.exp %262 : vector<16x16xf32>
    %cst_92 = arith.constant dense<0.000000e+00> : vector<16xf32>
    %264 = vector.multi_reduction <add>, %263, %cst_92 [1] : vector<16x16xf32> to vector<16xf32>
    %265 = vector.shape_cast %264 : vector<16xf32> to vector<16x1xf32>
    %266 = tpu.reciprocal %265 {approx = true} : vector<16x1xf32> -> vector<16x1xf32>
    %267 = vector.broadcast %266 : vector<16x1xf32> to vector<16x16xf32>
    %268 = arith.mulf %263, %267 : vector<16x16xf32>
    %269 = arith.truncf %268 : vector<16x16xf32> to vector<16x16xbf16>
    %cst_93 = arith.constant dense<0.000000e+00> : vector<16x32xf32>
    %270 = tpu.matmul %269, %257, %cst_93 {dimension_numbers = #tpu.dot_dimension_numbers<[1], [0], [0], [1], [0, 0, 1, 1], [], []>} : vector<16x16xbf16>, vector<16x32xbf16>, vector<16x32xf32> -> vector<16x32xf32>
    %271 = arith.truncf %270 : vector<16x32xf32> to vector<16x32xbf16>
    %c0_94 = arith.constant 0 : index
    %c64_95 = arith.constant 64 : index
    %272 = vector.load %arg13[%c0_94, %c64_95] : memref<32x128xbf16, #tpu.memory_space<vmem>>, vector<16x32xbf16>
    tpu.vector_store %arg13[%c0_94, %c64_95], %271 {strides = array<i32>} : memref<32x128xbf16, #tpu.memory_space<vmem>>, vector<16x32xbf16>,
    %273 = vector.extract_strided_slice %214 {offsets = [0, 96], sizes = [16, 32], strides = [1, 1]} : vector<32x128xbf16> to vector<16x32xbf16>
    %274 = vector.extract_strided_slice %216 {offsets = [0, 96], sizes = [16, 32], strides = [1, 1]} : vector<32x128xbf16> to vector<16x32xbf16>
    %275 = vector.extract_strided_slice %218 {offsets = [0, 96], sizes = [16, 32], strides = [1, 1]} : vector<32x128xbf16> to vector<16x32xbf16>
    %cst_96 = arith.constant dense<0.000000e+00> : vector<16x16xf32>
    %276 = tpu.matmul %273, %274, %cst_96 {dimension_numbers = #tpu.dot_dimension_numbers<[1], [1], [0], [0], [0, 0, 1, 0], [], []>} : vector<16x32xbf16>, vector<16x32xbf16>, vector<16x16xf32> -> vector<16x16xf32>
    %cst_97 = arith.constant dense<0xFF800000> : vector<16xf32>
    %277 = vector.multi_reduction <maximumf>, %276, %cst_97 [1] : vector<16x16xf32> to vector<16xf32>
    %278 = vector.shape_cast %277 : vector<16xf32> to vector<16x1xf32>
    %279 = vector.broadcast %278 : vector<16x1xf32> to vector<16x16xf32>
    %280 = arith.subf %276, %279 : vector<16x16xf32>
    %281 = math.exp %280 : vector<16x16xf32>
    %cst_98 = arith.constant dense<0.000000e+00> : vector<16xf32>
    %282 = vector.multi_reduction <add>, %281, %cst_98 [1] : vector<16x16xf32> to vector<16xf32>
    %283 = vector.shape_cast %282 : vector<16xf32> to vector<16x1xf32>
    %284 = tpu.reciprocal %283 {approx = true} : vector<16x1xf32> -> vector<16x1xf32>
    %285 = vector.broadcast %284 : vector<16x1xf32> to vector<16x16xf32>
    %286 = arith.mulf %281, %285 : vector<16x16xf32>
    %287 = arith.truncf %286 : vector<16x16xf32> to vector<16x16xbf16>
    %cst_99 = arith.constant dense<0.000000e+00> : vector<16x32xf32>
    %288 = tpu.matmul %287, %275, %cst_99 {dimension_numbers = #tpu.dot_dimension_numbers<[1], [0], [0], [1], [0, 0, 1, 1], [], []>} : vector<16x16xbf16>, vector<16x32xbf16>, vector<16x32xf32> -> vector<16x32xf32>
    %289 = arith.truncf %288 : vector<16x32xf32> to vector<16x32xbf16>
    %c0_100 = arith.constant 0 : index
    %c96_101 = arith.constant 96 : index
    %290 = vector.load %arg13[%c0_100, %c96_101] : memref<32x128xbf16, #tpu.memory_space<vmem>>, vector<16x32xbf16>
    tpu.vector_store %arg13[%c0_100, %c96_101], %289 {strides = array<i32>} : memref<32x128xbf16, #tpu.memory_space<vmem>>, vector<16x32xbf16>,
    %291 = vector.extract_strided_slice %214 {offsets = [16, 0], sizes = [16, 32], strides = [1, 1]} : vector<32x128xbf16> to vector<16x32xbf16>
    %292 = vector.extract_strided_slice %216 {offsets = [16, 0], sizes = [16, 32], strides = [1, 1]} : vector<32x128xbf16> to vector<16x32xbf16>
    %293 = vector.extract_strided_slice %218 {offsets = [16, 0], sizes = [16, 32], strides = [1, 1]} : vector<32x128xbf16> to vector<16x32xbf16>
    %cst_102 = arith.constant dense<0.000000e+00> : vector<16x16xf32>
    %294 = tpu.matmul %291, %292, %cst_102 {dimension_numbers = #tpu.dot_dimension_numbers<[1], [1], [0], [0], [0, 0, 1, 0], [], []>} : vector<16x32xbf16>, vector<16x32xbf16>, vector<16x16xf32> -> vector<16x16xf32>
    %cst_103 = arith.constant dense<0xFF800000> : vector<16xf32>
    %295 = vector.multi_reduction <maximumf>, %294, %cst_103 [1] : vector<16x16xf32> to vector<16xf32>
    %296 = vector.shape_cast %295 : vector<16xf32> to vector<16x1xf32>
    %297 = vector.broadcast %296 : vector<16x1xf32> to vector<16x16xf32>
    %298 = arith.subf %294, %297 : vector<16x16xf32>
    %299 = math.exp %298 : vector<16x16xf32>
    %cst_104 = arith.constant dense<0.000000e+00> : vector<16xf32>
    %300 = vector.multi_reduction <add>, %299, %cst_104 [1] : vector<16x16xf32> to vector<16xf32>
    %301 = vector.shape_cast %300 : vector<16xf32> to vector<16x1xf32>
    %302 = tpu.reciprocal %301 {approx = true} : vector<16x1xf32> -> vector<16x1xf32>
    %303 = vector.broadcast %302 : vector<16x1xf32> to vector<16x16xf32>
    %304 = arith.mulf %299, %303 : vector<16x16xf32>
    %305 = arith.truncf %304 : vector<16x16xf32> to vector<16x16xbf16>
    %cst_105 = arith.constant dense<0.000000e+00> : vector<16x32xf32>
    %306 = tpu.matmul %305, %293, %cst_105 {dimension_numbers = #tpu.dot_dimension_numbers<[1], [0], [0], [1], [0, 0, 1, 1], [], []>} : vector<16x16xbf16>, vector<16x32xbf16>, vector<16x32xf32> -> vector<16x32xf32>
    %307 = arith.truncf %306 : vector<16x32xf32> to vector<16x32xbf16>
    %c16_106 = arith.constant 16 : index
    %c0_107 = arith.constant 0 : index
    %308 = vector.load %arg13[%c16_106, %c0_107] : memref<32x128xbf16, #tpu.memory_space<vmem>>, vector<16x32xbf16>
    tpu.vector_store %arg13[%c16_106, %c0_107], %307 {strides = array<i32>} : memref<32x128xbf16, #tpu.memory_space<vmem>>, vector<16x32xbf16>,
    %309 = vector.extract_strided_slice %214 {offsets = [16, 32], sizes = [16, 32], strides = [1, 1]} : vector<32x128xbf16> to vector<16x32xbf16>
    %310 = vector.extract_strided_slice %216 {offsets = [16, 32], sizes = [16, 32], strides = [1, 1]} : vector<32x128xbf16> to vector<16x32xbf16>
    %311 = vector.extract_strided_slice %218 {offsets = [16, 32], sizes = [16, 32], strides = [1, 1]} : vector<32x128xbf16> to vector<16x32xbf16>
    %cst_108 = arith.constant dense<0.000000e+00> : vector<16x16xf32>
    %312 = tpu.matmul %309, %310, %cst_108 {dimension_numbers = #tpu.dot_dimension_numbers<[1], [1], [0], [0], [0, 0, 1, 0], [], []>} : vector<16x32xbf16>, vector<16x32xbf16>, vector<16x16xf32> -> vector<16x16xf32>
    %cst_109 = arith.constant dense<0xFF800000> : vector<16xf32>
    %313 = vector.multi_reduction <maximumf>, %312, %cst_109 [1] : vector<16x16xf32> to vector<16xf32>
    %314 = vector.shape_cast %313 : vector<16xf32> to vector<16x1xf32>
    %315 = vector.broadcast %314 : vector<16x1xf32> to vector<16x16xf32>
    %316 = arith.subf %312, %315 : vector<16x16xf32>
    %317 = math.exp %316 : vector<16x16xf32>
    %cst_110 = arith.constant dense<0.000000e+00> : vector<16xf32>
    %318 = vector.multi_reduction <add>, %317, %cst_110 [1] : vector<16x16xf32> to vector<16xf32>
    %319 = vector.shape_cast %318 : vector<16xf32> to vector<16x1xf32>
    %320 = tpu.reciprocal %319 {approx = true} : vector<16x1xf32> -> vector<16x1xf32>
    %321 = vector.broadcast %320 : vector<16x1xf32> to vector<16x16xf32>
    %322 = arith.mulf %317, %321 : vector<16x16xf32>
    %323 = arith.truncf %322 : vector<16x16xf32> to vector<16x16xbf16>
    %cst_111 = arith.constant dense<0.000000e+00> : vector<16x32xf32>
    %324 = tpu.matmul %323, %311, %cst_111 {dimension_numbers = #tpu.dot_dimension_numbers<[1], [0], [0], [1], [0, 0, 1, 1], [], []>} : vector<16x16xbf16>, vector<16x32xbf16>, vector<16x32xf32> -> vector<16x32xf32>
    %325 = arith.truncf %324 : vector<16x32xf32> to vector<16x32xbf16>
    %c16_112 = arith.constant 16 : index
    %c32_113 = arith.constant 32 : index
    %326 = vector.load %arg13[%c16_112, %c32_113] : memref<32x128xbf16, #tpu.memory_space<vmem>>, vector<16x32xbf16>
    tpu.vector_store %arg13[%c16_112, %c32_113], %325 {strides = array<i32>} : memref<32x128xbf16, #tpu.memory_space<vmem>>, vector<16x32xbf16>,
    %327 = vector.extract_strided_slice %214 {offsets = [16, 64], sizes = [16, 32], strides = [1, 1]} : vector<32x128xbf16> to vector<16x32xbf16>
    %328 = vector.extract_strided_slice %216 {offsets = [16, 64], sizes = [16, 32], strides = [1, 1]} : vector<32x128xbf16> to vector<16x32xbf16>
    %329 = vector.extract_strided_slice %218 {offsets = [16, 64], sizes = [16, 32], strides = [1, 1]} : vector<32x128xbf16> to vector<16x32xbf16>
    %cst_114 = arith.constant dense<0.000000e+00> : vector<16x16xf32>
    %330 = tpu.matmul %327, %328, %cst_114 {dimension_numbers = #tpu.dot_dimension_numbers<[1], [1], [0], [0], [0, 0, 1, 0], [], []>} : vector<16x32xbf16>, vector<16x32xbf16>, vector<16x16xf32> -> vector<16x16xf32>
    %cst_115 = arith.constant dense<0xFF800000> : vector<16xf32>
    %331 = vector.multi_reduction <maximumf>, %330, %cst_115 [1] : vector<16x16xf32> to vector<16xf32>
    %332 = vector.shape_cast %331 : vector<16xf32> to vector<16x1xf32>
    %333 = vector.broadcast %332 : vector<16x1xf32> to vector<16x16xf32>
    %334 = arith.subf %330, %333 : vector<16x16xf32>
    %335 = math.exp %334 : vector<16x16xf32>
    %cst_116 = arith.constant dense<0.000000e+00> : vector<16xf32>
    %336 = vector.multi_reduction <add>, %335, %cst_116 [1] : vector<16x16xf32> to vector<16xf32>
    %337 = vector.shape_cast %336 : vector<16xf32> to vector<16x1xf32>
    %338 = tpu.reciprocal %337 {approx = true} : vector<16x1xf32> -> vector<16x1xf32>
    %339 = vector.broadcast %338 : vector<16x1xf32> to vector<16x16xf32>
    %340 = arith.mulf %335, %339 : vector<16x16xf32>
    %341 = arith.truncf %340 : vector<16x16xf32> to vector<16x16xbf16>
    %cst_117 = arith.constant dense<0.000000e+00> : vector<16x32xf32>
    %342 = tpu.matmul %341, %329, %cst_117 {dimension_numbers = #tpu.dot_dimension_numbers<[1], [0], [0], [1], [0, 0, 1, 1], [], []>} : vector<16x16xbf16>, vector<16x32xbf16>, vector<16x32xf32> -> vector<16x32xf32>
    %343 = arith.truncf %342 : vector<16x32xf32> to vector<16x32xbf16>
    %c16_118 = arith.constant 16 : index
    %c64_119 = arith.constant 64 : index
    %344 = vector.load %arg13[%c16_118, %c64_119] : memref<32x128xbf16, #tpu.memory_space<vmem>>, vector<16x32xbf16>
    tpu.vector_store %arg13[%c16_118, %c64_119], %343 {strides = array<i32>} : memref<32x128xbf16, #tpu.memory_space<vmem>>, vector<16x32xbf16>,
    %345 = vector.extract_strided_slice %214 {offsets = [16, 96], sizes = [16, 32], strides = [1, 1]} : vector<32x128xbf16> to vector<16x32xbf16>
    %346 = vector.extract_strided_slice %216 {offsets = [16, 96], sizes = [16, 32], strides = [1, 1]} : vector<32x128xbf16> to vector<16x32xbf16>
    %347 = vector.extract_strided_slice %218 {offsets = [16, 96], sizes = [16, 32], strides = [1, 1]} : vector<32x128xbf16> to vector<16x32xbf16>
    %cst_120 = arith.constant dense<0.000000e+00> : vector<16x16xf32>
    %348 = tpu.matmul %345, %346, %cst_120 {dimension_numbers = #tpu.dot_dimension_numbers<[1], [1], [0], [0], [0, 0, 1, 0], [], []>} : vector<16x32xbf16>, vector<16x32xbf16>, vector<16x16xf32> -> vector<16x16xf32>
    %cst_121 = arith.constant dense<0xFF800000> : vector<16xf32>
    %349 = vector.multi_reduction <maximumf>, %348, %cst_121 [1] : vector<16x16xf32> to vector<16xf32>
    %350 = vector.shape_cast %349 : vector<16xf32> to vector<16x1xf32>
    %351 = vector.broadcast %350 : vector<16x1xf32> to vector<16x16xf32>
    %352 = arith.subf %348, %351 : vector<16x16xf32>
    %353 = math.exp %352 : vector<16x16xf32>
    %cst_122 = arith.constant dense<0.000000e+00> : vector<16xf32>
    %354 = vector.multi_reduction <add>, %353, %cst_122 [1] : vector<16x16xf32> to vector<16xf32>
    %355 = vector.shape_cast %354 : vector<16xf32> to vector<16x1xf32>
    %356 = tpu.reciprocal %355 {approx = true} : vector<16x1xf32> -> vector<16x1xf32>
    %357 = vector.broadcast %356 : vector<16x1xf32> to vector<16x16xf32>
    %358 = arith.mulf %353, %357 : vector<16x16xf32>
    %359 = arith.truncf %358 : vector<16x16xf32> to vector<16x16xbf16>
    %cst_123 = arith.constant dense<0.000000e+00> : vector<16x32xf32>
    %360 = tpu.matmul %359, %347, %cst_123 {dimension_numbers = #tpu.dot_dimension_numbers<[1], [0], [0], [1], [0, 0, 1, 1], [], []>} : vector<16x16xbf16>, vector<16x32xbf16>, vector<16x32xf32> -> vector<16x32xf32>
    %361 = arith.truncf %360 : vector<16x32xf32> to vector<16x32xbf16>
    %c16_124 = arith.constant 16 : index
    %c96_125 = arith.constant 96 : index
    %362 = vector.load %arg13[%c16_124, %c96_125] : memref<32x128xbf16, #tpu.memory_space<vmem>>, vector<16x32xbf16>
    tpu.vector_store %arg13[%c16_124, %c96_125], %361 {strides = array<i32>} : memref<32x128xbf16, #tpu.memory_space<vmem>>, vector<16x32xbf16>,
    %c0_126 = arith.constant 0 : index
    %c0_127 = arith.constant 0 : index
    %363 = vector.load %arg13[%c0_126, %c0_127] : memref<32x128xbf16, #tpu.memory_space<vmem>>, vector<32x128xbf16>
    %c0_128 = arith.constant 0 : index
    %c0_129 = arith.constant 0 : index
    %364 = vector.load %arg10[%c0_128, %c0_129] : memref<128x128xbf16, #tpu.memory_space<vmem>>, vector<128x128xbf16>
    %cst_130 = arith.constant dense<0.000000e+00> : vector<32x128xf32>
    %365 = tpu.matmul %363, %364, %cst_130 {dimension_numbers = #tpu.dot_dimension_numbers<[1], [0], [0], [1], [0, 0, 1, 1], [], []>} : vector<32x128xbf16>, vector<128x128xbf16>, vector<32x128xf32> -> vector<32x128xf32>
    %c0_131 = arith.constant 0 : index
    %c0_132 = arith.constant 0 : index
    %366 = vector.load %arg11[%c0_131, %c0_132] : memref<1x128xf32, #tpu.memory_space<vmem>>, vector<1x128xf32>
    %367 = vector.broadcast %366 : vector<1x128xf32> to vector<32x128xf32>
    %368 = arith.addf %365, %367 : vector<32x128xf32>
    %369 = arith.addf %185, %368 : vector<32x128xf32>
    %370 = vector.shape_cast %369 : vector<32x128xf32> to vector<2x16x128xf32>
    %c0_133 = arith.constant 0 : index
    %c0_134 = arith.constant 0 : index
    %c0_135 = arith.constant 0 : index
    %371 = vector.load %arg12[%c0_133, %c0_134, %c0_135] : memref<2x16x128xf32, #tpu.memory_space<vmem>>, vector<2x16x128xf32>
    tpu.vector_store %arg12[%c0_133, %c0_134, %c0_135], %370 {strides = array<i32>} : memref<2x16x128xf32, #tpu.memory_space<vmem>>, vector<2x16x128xf32>,
    return
  }
  func.func @transform_0(%arg0: i32) -> (i32, i32, i32) {
    %c0_i32 = arith.constant 0 : i32
    %c0_i32_0 = arith.constant 0 : i32
    %c0_i32_1 = arith.constant 0 : i32
    return %arg0, %c0_i32, %c0_i32_0 : i32, i32, i32
  }
  func.func @transform_1(%arg0: i32) -> (i32, i32) {
    %c0_i32 = arith.constant 0 : i32
    %c0_i32_0 = arith.constant 0 : i32
    %c0_i32_1 = arith.constant 0 : i32
    return %c0_i32, %c0_i32_0 : i32, i32
  }
  func.func @transform_2(%arg0: i32) -> (i32, i32) {
    %c0_i32 = arith.constant 0 : i32
    %c0_i32_0 = arith.constant 0 : i32
    %c0_i32_1 = arith.constant 0 : i32
    return %c0_i32, %c0_i32_0 : i32, i32
  }
  func.func @transform_3(%arg0: i32) -> (i32, i32) {
    %c0_i32 = arith.constant 0 : i32
    %c0_i32_0 = arith.constant 0 : i32
    %c0_i32_1 = arith.constant 0 : i32
    return %c0_i32, %c0_i32_0 : i32, i32
  }
  func.func @transform_4(%arg0: i32) -> (i32, i32) {
    %c0_i32 = arith.constant 0 : i32
    %c0_i32_0 = arith.constant 0 : i32
    %c0_i32_1 = arith.constant 0 : i32
    return %c0_i32, %c0_i32_0 : i32, i32
  }
  func.func @transform_5(%arg0: i32) -> (i32, i32) {
    %c0_i32 = arith.constant 0 : i32
    %c0_i32_0 = arith.constant 0 : i32
    %c0_i32_1 = arith.constant 0 : i32
    return %c0_i32, %c0_i32_0 : i32, i32
  }
  func.func @transform_6(%arg0: i32) -> (i32, i32) {
    %c0_i32 = arith.constant 0 : i32
    %c0_i32_0 = arith.constant 0 : i32
    %c0_i32_1 = arith.constant 0 : i32
    return %c0_i32, %c0_i32_0 : i32, i32
  }
  func.func @transform_7(%arg0: i32) -> (i32, i32) {
    %c0_i32 = arith.constant 0 : i32
    %c0_i32_0 = arith.constant 0 : i32
    %c0_i32_1 = arith.constant 0 : i32
    return %c0_i32, %c0_i32_0 : i32, i32
  }
  func.func @transform_8(%arg0: i32) -> (i32, i32) {
    %c0_i32 = arith.constant 0 : i32
    %c0_i32_0 = arith.constant 0 : i32
    %c0_i32_1 = arith.constant 0 : i32
    return %c0_i32, %c0_i32_0 : i32, i32
  }
  func.func @transform_9(%arg0: i32) -> (i32, i32) {
    %c0_i32 = arith.constant 0 : i32
    %c0_i32_0 = arith.constant 0 : i32
    %c0_i32_1 = arith.constant 0 : i32
    return %c0_i32, %c0_i32_0 : i32, i32
  }
  func.func @transform_10(%arg0: i32) -> (i32, i32) {
    %c0_i32 = arith.constant 0 : i32
    %c0_i32_0 = arith.constant 0 : i32
    %c0_i32_1 = arith.constant 0 : i32
    return %c0_i32, %c0_i32_0 : i32, i32
  }
  func.func @transform_11(%arg0: i32) -> (i32, i32, i32) {
    %c0_i32 = arith.constant 0 : i32
    %c0_i32_0 = arith.constant 0 : i32
    %c0_i32_1 = arith.constant 0 : i32
    return %arg0, %c0_i32, %c0_i32_0 : i32, i32, i32
  }
}

</mosaic_0001>

<bundles_post_ra>
// kernel: tpu_custom_call.1
= control target key start
LH: loop header
LB: loop body
LE: loop exit
PB: predicated region body
PF: predicated region fallthrough
CT: control target
= control target key end

     0   :  { %16 = vsyncpa [#allocation4], 0  ;;  %s4643_s0 = inlined_call_operand.hbm [shape: f32[2,16,128], index: 0, kind: input, shape index: {}]   ;;  %s4644_s1 = inlined_call_operand.vmem [shape: f32[1,128], index: 1, kind: input, shape index: {}]   ;;  %s4645_s2 = inlined_call_operand.vmem [shape: f32[1,128], index: 2, kind: input, shape index: {}]   ;;  %s4646_s3 = inlined_call_operand.vmem [shape: f32[1,128], index: 3, kind: input, shape index: {}]   ;;  %s4647_s4 = inlined_call_operand.vmem [shape: f32[1,128], index: 4, kind: input, shape index: {}]   ;;  %s4648_s5 = inlined_call_operand.hbm [shape: bf16[128,384], index: 5, kind: input, shape index: {}]   ;;  %s4649_s6 = inlined_call_operand.hbm [shape: bf16[128,128], index: 6, kind: input, shape index: {}]   ;;  %s4650_s7 = inlined_call_operand.vmem [shape: f32[1,128], index: 7, kind: input, shape index: {}]   ;;  %s4651_s8 = inlined_call_operand.hbm [shape: bf16[128,384], index: 8, kind: input, shape index: {}]   ;;  %s4652_s9 = inlined_call_operand.hbm [shape: bf16[128,128], index: 9, kind: input, shape index: {}]   ;;  %s4653_s10 = inlined_call_operand.vmem [shape: f32[1,128], index: 10, kind: input, shape index: {}]   ;;  %s4654_s11 = inlined_call_operand.hbm [shape: f32[2,16,128], index: 11, kind: output, shape index: {}]  }
   0x1   :  { %17 = vsyncpa [#allocation7], 0 }
   0x2   :  { %18 = vsyncpa [#allocation10], 0 }
   0x3   :  { %19 = vsyncpa [#allocation5], 0  ;;  %s3900_s17 = smov [#allocation6]   ;;  %s3760_s21 = scalar_lea.hbm %s4648_s5, 3072 }
   0x4   :  { %s45_s18 = sshll.u32 %s3900_s17, 4  ;;  %p3761_p0 = scmp.ne.s32.totalorder %s4648_s5, %s3760_s21  ;;  %s46_s18 = int_to_ptr.vmem [resolvable:$true] %s45_s18 }
   0x5   :  { %p3764_p1 = scmp.lt.u32.totalorder %s3760_s21, %s4648_s5 }
   0x7   :  { %p3766_p2 = pnand %p3764_p1, %p3761_p0 }
   0x9   :  { %3769 = shalt.err (!%p3766_p2)
}
   0xa   :  { %s3770_s26 = scalar_lea.vmem %s46_s18, 3072  ;;  %p3775_p4 = scmp.lt.s32.totalorder %s46_s18, %s46_s18 }
   0xb   :  { %p3771_p3 = scmp.ne.s32.totalorder %s46_s18, %s3770_s26  ;;  %p3776_p5 = scmp.lt.s32.totalorder %s3770_s26, %s3770_s26 }
   0xd   :  { %p3777_p6 = por %p3776_p5, %p3775_p4 }
   0xf   :  { %p3778_p7 = pnand %p3777_p6, %p3771_p3 }
  0x11   :  { %3781 = shalt.err (!%p3778_p7)
}
  0x12   :  { %s3901_s27 = smov 192   ;;  %s3902_s28 = smov 12  }
  0x13   :  { %51 = dma.hbm_to_vmem [thread:$0]  %s4648_s5, 3072, %s46_s18, [#allocation7], %s3901_s27, %s3901_s27, %s3902_s28  }
  0x14   :  { %s3903_s12 = smov [#allocation9]   ;;  %s3904_s14 = smov [#allocation3]  }
  0x15   :  { %s71_s13 = sshll.u32 %s3903_s12, 4  ;;  %s25_s15 = sshll.u32 %s3904_s14, 4  ;;  %s72_s13 = int_to_ptr.vmem [resolvable:$true] %s71_s13  ;;  %s26_s15 = int_to_ptr.vmem [resolvable:$true] %s25_s15 }
  0x16   :  { %s3782_s19 = scalar_lea.hbm %s4651_s8, 3072 }
  0x17   :  { %p3783_p8 = scmp.ne.s32.totalorder %s4651_s8, %s3782_s19  ;;  %p3786_p9 = scmp.lt.u32.totalorder %s3782_s19, %s4651_s8 }
  0x19   :  { %p3788_p10 = pnand %p3786_p9, %p3783_p8 }
  0x1b   :  { %3791 = shalt.err (!%p3788_p10)
}
  0x1c   :  { %s3792_s5 = scalar_lea.vmem %s72_s13, 3072  ;;  %p3797_p12 = scmp.lt.s32.totalorder %s72_s13, %s72_s13 }
  0x1d   :  { %p3793_p11 = scmp.ne.s32.totalorder %s72_s13, %s3792_s5  ;;  %p3798_p13 = scmp.lt.s32.totalorder %s3792_s5, %s3792_s5 }
  0x1f   :  { %p3799_p0 = por %p3798_p13, %p3797_p12 }
  0x21   :  { %p3800_p1 = pnand %p3799_p0, %p3793_p11 }
  0x23   :  { %3803 = shalt.err (!%p3800_p1)
}
  0x24   :  { %77 = dma.hbm_to_vmem [thread:$0]  %s4651_s8, 3072, %s72_s13, [#allocation10], %s3901_s27, %s3901_s27, %s3902_s28  }
  0x25   :  { %s3804_s29 = scalar_lea.hbm %s4643_s0, 512 }
  0x26   :  { %p3805_p2 = scmp.ne.s32.totalorder %s4643_s0, %s3804_s29  ;;  %p3808_p3 = scmp.lt.u32.totalorder %s3804_s29, %s4643_s0 }
  0x28   :  { %p3810_p4 = pnand %p3808_p3, %p3805_p2 }
  0x2a   :  { %3813 = shalt.err (!%p3810_p4)
}
  0x2b   :  { %s3814_s17 = scalar_lea.vmem %s26_s15, 512  ;;  %p3819_p6 = scmp.lt.s32.totalorder %s26_s15, %s26_s15 }
  0x2c   :  { %p3815_p5 = scmp.ne.s32.totalorder %s26_s15, %s3814_s17  ;;  %p3820_p7 = scmp.lt.s32.totalorder %s3814_s17, %s3814_s17 }
  0x2e   :  { %p3821_p8 = por %p3820_p7, %p3819_p6 }
  0x30   :  { %p3822_p9 = pnand %p3821_p8, %p3815_p5 }
  0x32   :  { %3825 = shalt.err (!%p3822_p9)
}
  0x33   :  { %s3905_s8 = smov 128   ;;  %s3906_s27 = smov 8  }
  0x34   :  { %31 = dma.hbm_to_vmem [thread:$0]  %s4643_s0, 512, %s26_s15, [#allocation4], %s3905_s8, %s3905_s8, %s3906_s27  }
  0x35   :  { %s3907_s19 = smov [#allocation8]   ;;  %s3826_s23 = scalar_lea.hbm %s4649_s6, 1024 }
  0x36   :  { %s57_s20 = sshll.u32 %s3907_s19, 4  ;;  %p3827_p10 = scmp.ne.s32.totalorder %s4649_s6, %s3826_s23  ;;  %s58_s20 = int_to_ptr.vmem [resolvable:$true] %s57_s20 }
  0x37   :  { %p3830_p11 = scmp.lt.u32.totalorder %s3826_s23, %s4649_s6 }
  0x39   :  { %p3832_p12 = pnand %p3830_p11, %p3827_p10 }
  0x3b   :  { %3835 = shalt.err (!%p3832_p12)
}
  0x3c   :  { %s3836_s26 = scalar_lea.vmem %s58_s20, 1024  ;;  %p3841_p0 = scmp.lt.s32.totalorder %s58_s20, %s58_s20 }
  0x3d   :  { %p3837_p13 = scmp.ne.s32.totalorder %s58_s20, %s3836_s26  ;;  %p3842_p1 = scmp.lt.s32.totalorder %s3836_s26, %s3836_s26 }
  0x3f   :  { %p3843_p2 = por %p3842_p1, %p3841_p0 }
  0x41   :  { %p3844_p3 = pnand %p3843_p2, %p3837_p13 }
  0x43   :  { %3847 = shalt.err (!%p3844_p3)
}
  0x44   :  { %s3908_s0 = smov 64   ;;  %s3909_s15 = smov 4  }
  0x45   :  { %63 = dma.hbm_to_vmem [thread:$0]  %s4649_s6, 1024, %s58_s20, [#allocation7], %s3908_s0, %s3908_s0, %s3909_s15  }
  0x46   :  { %s3910_s12 = smov [#allocation11]   ;;  %s3848_s28 = scalar_lea.hbm %s4652_s9, 1024 }
  0x47   :  { %s83_s14 = sshll.u32 %s3910_s12, 4  ;;  %p3849_p4 = scmp.ne.s32.totalorder %s4652_s9, %s3848_s28  ;;  %s84_s14 = int_to_ptr.vmem [resolvable:$true] %s83_s14 }
  0x48   :  { %p3852_p5 = scmp.lt.u32.totalorder %s3848_s28, %s4652_s9 }
  0x4a   :  { %p3854_p6 = pnand %p3852_p5, %p3849_p4 }
  0x4c   :  { %3857 = shalt.err (!%p3854_p6)
}
  0x4d   :  { %s3858_s23 = scalar_lea.vmem %s84_s14, 1024  ;;  %p3863_p8 = scmp.lt.s32.totalorder %s84_s14, %s84_s14 }
  0x4e   :  { %p3859_p7 = scmp.ne.s32.totalorder %s84_s14, %s3858_s23  ;;  %p3864_p9 = scmp.lt.s32.totalorder %s3858_s23, %s3858_s23 }
  0x50   :  { %p3865_p10 = por %p3864_p9, %p3863_p8 }
  0x52   :  { %p3866_p11 = pnand %p3865_p10, %p3859_p7 }
  0x54   :  { %3869 = shalt.err (!%p3866_p11)
}
  0x55   :  { %89 = dma.hbm_to_vmem [thread:$0]  %s4652_s9, 1024, %s84_s14, [#allocation10], %s3908_s0, %s3908_s0, %s3909_s15  }
  0x56   :  { %3892 = dma.done.wait [#allocation4], 512  }
  0x57   :  { %3893 = vsyncadd [#allocation4], 4294966784 }
  0x58   :  { %3894 = dma.done.wait [#allocation7], 4096  }
  0x59   :  { %3895 = vsyncadd [#allocation7], 4294963200 }
  0x5a   :  { %3896 = dma.done.wait [#allocation10], 4096  }
  0x5b   :  { %3897 = vsyncadd [#allocation10], 4294963200  ;;  %v108_v0 = vld [vmem:[#allocation3] sm:$0xff]  ;;  %v109_v1 = vld [vmem:[#allocation3 + $0x8] sm:$0xff]  ;;  %v3911_v30 = vmov 0   ;;  %v3912_v61 = vmov 0.0  }
  0x5c   :  { %114 = vadd.xlane.f32.xlu0 %v108_v0  ;;  %v110_v2 = vld [vmem:[#allocation3 + $0x10] sm:$0xff]  ;;  %v3542_v4 = vld [vmem:[#allocation6] ss:$12 sps:$4 sm:$0xff]   ;;  %v3543_v5 = vld [vmem:[#allocation6 + $0x1c] ss:$12 sps:$4 sm:$0xff]   ;;  %373 = vmatprep.mubr.bf16.mxu0 %v3911_v30  ;;  %vm3913_vm0 = vmmov 0  }
  0x5d   :  { %v3540_v3 = vld [vmem:[#allocation6 + $0x4] ss:$12 sps:$4 sm:$0xff]   ;;  %v111_v14 = vld [vmem:[#allocation3 + $0x18] sm:$0xff]  ;;  %v3546_v16 = vld [vmem:[#allocation6 + $0x34] ss:$12 sps:$4 sm:$0xff]   ;;  %3255 = vmatprep.subr.bf16.mxu1 %v3912_v61  ;;  %3257 = vmatprep.mubr.msk.bf16.mxu1 %vm3913_vm0, %v3912_v61  ;;  %vm453_vm1 = vcmask 261120  }
  0x5e   :  { %341 = vmatprep.subr.bf16.mxu0 %v3540_v3  ;;  %v3545_v15 = vld [vmem:[#allocation6 + $0x18] ss:$12 sps:$4 sm:$0xff]   ;;  %v3548_v17 = vld [vmem:[#allocation6 + $0x30] ss:$12 sps:$4 sm:$0xff]   ;;  %v3551_v19 = vld [vmem:[#allocation6 + $0x48] ss:$12 sps:$4 sm:$0xff]  }
  0x5f   :  { %342 = vmatpush1.bf16.msra.mxu0 %v3542_v4  ;;  %v3549_v18 = vld [vmem:[#allocation6 + $0x4c] ss:$12 sps:$4 sm:$0xff]   ;;  %v3552_v22 = vld [vmem:[#allocation6 + $0x64] ss:$12 sps:$4 sm:$0xff]   ;;  %v3555_v26 = vld [vmem:[#allocation6 + $0x7c] ss:$12 sps:$4 sm:$0xff]  }
  0x60   :  { %116 = vadd.xlane.f32.xlu0 %v109_v1  ;;  %343 = vmatprep.subr.bf16.mxu0 %v3543_v5  ;;  %v3554_v23 = vld [vmem:[#allocation6 + $0x60] ss:$12 sps:$4 sm:$0xff]   ;;  %v3557_v27 = vld [vmem:[#allocation6 + $0x78] ss:$12 sps:$4 sm:$0xff]   ;;  %v3560_v29 = vld [vmem:[#allocation6 + $0x90] ss:$12 sps:$4 sm:$0xff]  }
  0x61   :  { %v3558_v28 = vld [vmem:[#allocation6 + $0x94] ss:$12 sps:$4 sm:$0xff]   ;;  %v3561_v31 = vld [vmem:[#allocation6 + $0xac] ss:$12 sps:$4 sm:$0xff]   ;;  %v3029_v45 = vld [vmem:[%s4644_s1] ss:$0 sm:$0xff] }
  0x62   :  { %v3563_v32 = vld [vmem:[#allocation6 + $0xa8] ss:$12 sps:$4 sm:$0xff]   ;;  %v4059_v46 = vld [vmem:[%s4646_s3] ss:$0 sm:$0xff]  ;;  %v3565_v63 = vld [vmem:[#allocation6 + $0x20] ss:$12 sps:$4 sm:$0xff]  }
  0x63   :  { %344 = vmatpush1.bf16.msra.mxu0 %v3545_v15  ;;  %v3030_v51 = vld [vmem:[%s4645_s2] ss:$0 sm:$0xff]  ;;  %v3564_v62 = vld [vmem:[#allocation6 + $0x8] ss:$12 sps:$4 sm:$0xff]   ;;  %v3569_v3 = vld [vmem:[#allocation6 + $0x80] ss:$12 sps:$4 sm:$0xff]  }
  0x64   :  { %118 = vadd.xlane.f32.xlu0 %v110_v2  ;;  %345 = vmatprep.subr.bf16.mxu0 %v3546_v16  ;;  %v4068_v52 = vld [vmem:[%s4647_s4] ss:$0 sm:$0xff]  ;;  %vm501_vm2 = vcmask 130048   ;;  %s3914_s1 = smov 96   ;;  %s3915_s2 = smov 32   ;;  %vm700_vm3 = vcmask 523520  }
  0x65   :  { %vm828_vm4 = vcmask 785920   ;;  %vm956_vm5 = vcmask 1048320   ;;  %s3916_s12 = smov [#allocation12]  }
  0x66   :  { %s3015_s14 = sshll.u32 %s3916_s12, 4  ;;  %s3016_s14 = int_to_ptr.vmem [resolvable:$true] %s3015_s14 }
  0x67   :  { %346 = vmatpush1.bf16.msra.mxu0 %v3548_v17  ;;  %p3875_p13 = scmp.lt.s32.totalorder %s3016_s14, %s3016_s14 }
  0x68   :  { %347 = vmatprep.subr.bf16.mxu0 %v3549_v18 }
  0x6b   :  { %348 = vmatpush1.bf16.msra.mxu0 %v3551_v19 }
  0x6c   :  { %349 = vmatprep.subr.bf16.mxu0 %v3552_v22 }
  0x6f   :  { %350 = vmatpush1.bf16.msra.mxu0 %v3554_v23 }
  0x70   :  { %351 = vmatprep.subr.bf16.mxu0 %v3555_v26 }
  0x73   :  { %352 = vmatpush1.bf16.msra.mxu0 %v3557_v27 }
  0x74   :  { %353 = vmatprep.subr.bf16.mxu0 %v3558_v28 }
  0x77   :  { %354 = vmatpush1.bf16.msra.mxu0 %v3560_v29 }
  0x78   :  { %355 = vmatprep.subr.bf16.mxu0 %v3561_v31 }
  0x7b   :  { %356 = vmatpush1.bf16.msra.mxu0 %v3563_v32 }
  0x7c   :  { %3235 = vmatprep.subr.bf16.mxu0 %v3564_v62 }
  0xe9   :  { %v115_v6 = vpop.xlane.xlu0 %114 }
  0xea   :  { %v123_v7 = vmul.f32 0.0078125, %v115_v6  ;;  %v3570_v6 = vld [vmem:[#allocation6 + $0x98] ss:$12 sps:$4 sm:$0xff]  }
  0xec   :  { %v127_v8 = vsub.f32 %v108_v0, %v123_v7  ;;  %v3566_v0 = vld [vmem:[#allocation6 + $0x38] ss:$12 sps:$4 sm:$0xff]  }
  0xed   :  { %v117_v9 = vpop.xlane.xlu0 %116 }
  0xee   :  { %v124_v10 = vmul.f32 0.0078125, %v117_v9  ;;  %v131_v11 = vmul.f32 %v127_v8, %v127_v8 }
  0xf0   :  { %135 = vadd.xlane.f32.xlu1 %v131_v11  ;;  %v128_v12 = vsub.f32 %v109_v1, %v124_v10  ;;  %v3567_v1 = vld [vmem:[#allocation6 + $0x50] ss:$12 sps:$4 sm:$0xff]  }
  0xf1   :  { %v119_v20 = vpop.xlane.xlu0 %118 }
  0xf2   :  { %v132_v13 = vmul.f32 %v128_v12, %v128_v12  ;;  %v125_v21 = vmul.f32 0.0078125, %v119_v20 }
  0xf4   :  { %137 = vadd.xlane.f32.xlu1 %v132_v13  ;;  %v4044_v24 = vsub.f32 %v110_v2, %v125_v21  ;;  %v3568_v2 = vld [vmem:[#allocation6 + $0x68] ss:$12 sps:$4 sm:$0xff]  }
  0xf6   :  { %v133_v25 = vmul.f32 %v4044_v24, %v4044_v24 }
  0xf8   :  { %120 = vadd.xlane.f32.xlu1 %v111_v14  ;;  %139 = vadd.xlane.f32.xlu0 %v133_v25 }
 0x17d   :  { %v136_v33 = vpop.xlane.xlu1 %135 }
 0x17e   :  { %v143_v34 = vmul.f32 0.0078125, %v136_v33 }
 0x180   :  { %v147_v35 = vadd.f32 1e-05, %v143_v34 }
 0x181   :  { %v138_v36 = vpop.xlane.xlu1 %137 }
 0x182   :  { %3620 = vrsqrt.f32 %v147_v35  ;;  %v144_v37 = vmul.f32 0.0078125, %v138_v36 }
 0x184   :  { %v148_v38 = vadd.f32 1e-05, %v144_v37 }
 0x185   :  { %v121_v39 = vpop.xlane.xlu1 %120  ;;  %v140_v4 = vpop.xlane.xlu0 %139 }
 0x186   :  { %3622 = vrsqrt.f32 %v148_v38  ;;  %v126_v40 = vmul.f32 0.0078125, %v121_v39  ;;  %v145_v5 = vmul.f32 0.0078125, %v140_v4 }
 0x188   :  { %v4049_v41 = vsub.f32 %v111_v14, %v126_v40  ;;  %v149_v7 = vadd.f32 1e-05, %v145_v5 }
 0x18a   :  { %v134_v42 = vmul.f32 %v4049_v41, %v4049_v41  ;;  %3624 = vrsqrt.f32 %v149_v7 }
 0x18c   :  { %v3621_v43 = vpop.eup %3620  ;;  %141 = vadd.xlane.f32.xlu1 %v134_v42 }
 0x18d   :  { %v155_v44 = vmul.f32 %v3621_v43, %v127_v8  ;;  %v3571_v8 = vld [vmem:[#allocation6 + $0xb0] ss:$12 sps:$4 sm:$0xff]  }
 0x18f   :  { %v165_v49 = vmul.f32 %v3029_v45, %v155_v44  ;;  %v1592_v50 = vmul.f32 %v4059_v46, %v155_v44 }
 0x190   :  { %v3623_v47 = vpop.eup %3622 }
 0x191   :  { %v156_v48 = vmul.f32 %v3623_v47, %v128_v12  ;;  %v175_v55 = vadd.f32 %v3030_v51, %v165_v49  ;;  %v1602_v57 = vadd.f32 %v4068_v52, %v1592_v50 }
 0x193   :  { %v166_v53 = vmul.f32 %v3029_v45, %v156_v48  ;;  %v1593_v54 = vmul.f32 %v4059_v46, %v156_v48 }
 0x194   :  { %v3625_v12 = vpop.eup %3624 }
 0x195   :  { %v176_v56 = vadd.f32 %v3030_v51, %v166_v53  ;;  %v1603_v58 = vadd.f32 %v4068_v52, %v1593_v54  ;;  %v4081_v13 = vmul.f32 %v3625_v12, %v4044_v24 }
 0x197   :  { %v179_v59 = vpack.c.bf16 %v176_v56, %v175_v55  ;;  %v4073_v60 = vpack.c.bf16 %v1603_v58, %v1602_v57  ;;  %v167_v14 = vmul.f32 %v3029_v45, %v4081_v13 }
 0x199   :  { %374 = vmatmul.mubr.bf16.vlgmr.msra.gmra.mrb[0].mxu0 %v179_v59  ;;  %v177_v18 = vadd.f32 %v3030_v51, %v167_v14 }
 0x19a   :  { %383 = vmatprep.mubr.bf16.mxu0 %v3911_v30  ;;  %3236 = vmatpush3.bf16.msra.mxu0 %v3564_v62 }
 0x19b   :  { %3237 = vmatprep.subr.bf16.mxu0 %v3565_v63 }
 0x19e   :  { %3238 = vmatpush3.bf16.msra.mxu0 %v3565_v63 }
 0x19f   :  { %3239 = vmatprep.subr.bf16.mxu0 %v3566_v0 }
 0x1a2   :  { %3240 = vmatpush3.bf16.msra.mxu0 %v3566_v0 }
 0x1a3   :  { %3241 = vmatprep.subr.bf16.mxu0 %v3567_v1 }
 0x1a6   :  { %3242 = vmatpush3.bf16.msra.mxu0 %v3567_v1 }
 0x1a7   :  { %3243 = vmatprep.subr.bf16.mxu0 %v3568_v2 }
 0x1aa   :  { %3244 = vmatpush3.bf16.msra.mxu0 %v3568_v2 }
 0x1ab   :  { %3245 = vmatprep.subr.bf16.mxu0 %v3569_v3 }
 0x1ae   :  { %3246 = vmatpush3.bf16.msra.mxu0 %v3569_v3 }
 0x1af   :  { %3247 = vmatprep.subr.bf16.mxu0 %v3570_v6 }
 0x1b2   :  { %3248 = vmatpush3.bf16.msra.mxu0 %v3570_v6 }
 0x1b3   :  { %3249 = vmatprep.subr.bf16.mxu0 %v3571_v8 }
 0x1b6   :  { %3250 = vmatpush3.bf16.msra.mxu0 %v3571_v8 }
 0x1b7   :  { %3273 = vmatprep.subr.bf16.mxu0 %v3912_v61 }
 0x219   :  { %v142_v9 = vpop.xlane.xlu1 %141 }
 0x21a   :  { %v146_v10 = vmul.f32 0.0078125, %v142_v9 }
 0x21c   :  { %v150_v11 = vadd.f32 1e-05, %v146_v10 }
 0x21e   :  { %3626 = vrsqrt.f32 %v150_v11 }
 0x228   :  { %v3627_v15 = vpop.eup %3626 }
 0x229   :  { %v4085_v16 = vmul.f32 %v3627_v15, %v4049_v41 }
 0x22b   :  { %v168_v17 = vmul.f32 %v3029_v45, %v4085_v16 }
 0x22d   :  { %v178_v19 = vadd.f32 %v3030_v51, %v168_v17 }
 0x22f   :  { %v180_v20 = vpack.c.bf16 %v178_v19, %v177_v18 }
 0x231   :  { %384 = vmatmul.mubr.bf16.gmra.mrb[4].mxu0 %v180_v20 }
 0x232   :  { %3251 = vmatprep.mubr.bf16.mxu0 %v179_v59 }
 0x239   :  { %3252 = vmatmul.mubr.bf16.vlgmr.msra.gmra.mrb[8].mxu0 %v180_v20 }
 0x23a   :  { %3275 = vmatprep.mubr.msk.bf16.mxu0 %vm3913_vm0, %v3912_v61 }
 0x26c   :  { %v375_v21 = vpop.f32.mrb[0].mxu0 }
 0x26d   :  { %v377_v22 = vpop.f32.mrb[1].mxu0  ;;  %v443_v24 = vmul.f32 0.17677669, %v375_v21 }
 0x26e   :  { %v379_v23 = vpop.f32.mrb[2].mxu0 }
 0x26f   :  { %v444_v25 = vmul.f32 0.17677669, %v379_v23  ;;  %v381_v26 = vpop.f32.mrb[3].mxu0 }
 0x270   :  { %v449_v27 = vpack.c.bf16 %v381_v26, %v377_v22 }
 0x271   :  { %v447_v28 = vpack.c.bf16 %v444_v25, %v443_v24 }
 0x272   :  { %v458_v29 = vsel %vm453_vm1, %v449_v27, 0 }
 0x273   :  { %3256 = vmatpush3.bf16.xpose.msra.mxu1 %v458_v29 }
 0x274   :  { %3261 = vmatprep.subr.bf16.mxu1 %v3912_v61 }
 0x27a   :  { %3258 = vmatmul.mubr.msk.bf16.vlgmr.msra.gmra.mrb[0].mxu1 %vm453_vm1, %v447_v28 }
 0x27b   :  { %3263 = vmatprep.mubr.msk.bf16.mxu1 %vm3913_vm0, %v3912_v61 }
 0x304   :  { %v385_v31 = vpop.f32.mrb[4].mxu0 }
 0x305   :  { %v445_v32 = vmul.f32 0.17677669, %v385_v31  ;;  %v387_v33 = vpop.f32.mrb[5].mxu0 }
 0x306   :  { %v389_v34 = vpop.f32.mrb[6].mxu0 }
 0x307   :  { %v446_v35 = vmul.f32 0.17677669, %v389_v34  ;;  %v391_v36 = vpop.f32.mrb[7].mxu0 }
 0x308   :  { %v4095_v37 = vpack.c.bf16 %v391_v36, %v387_v33 }
 0x309   :  { %v4097_v38 = vpack.c.bf16 %v446_v35, %v445_v32 }
 0x30a   :  { %v962_v19 = vsel %vm453_vm1, %v4095_v37, 0 }
 0x30c   :  { %v3253_v39 = vpop.f32.mrb[8].mxu0 }
 0x30d   :  { %v428_v40 = vpop.f32.mrb[9].mxu0 }
 0x30e   :  { %v3254_v41 = vpop.f32.mrb[10].mxu0 }
 0x30f   :  { %v4099_v42 = vpack.c.bf16 %v3254_v41, %v3253_v39  ;;  %v431_v43 = vpop.f32.mrb[11].mxu0 }
 0x310   :  { %v4101_v44 = vpack.c.bf16 %v431_v43, %v428_v40 }
 0x312   :  { %3262 = vmatpush3.bf16.msra.mxu1 %v4101_v44 }
 0x313   :  { %3267 = vmatprep.subr.bf16.mxu1 %v3912_v61 }
 0x34d   :  { %v494_v45 = vpop.f32.mrb[0].mxu1 }
 0x34e   :  { %v3259_v47 = vpop.f32.mrb[1].mxu1  ;;  %v502_v48 = vsel %vm501_vm2, %v494_v45, -inf }
 0x34f   :  { %v497_v49 = vpop.f32.mrb[2].mxu1  ;;  %503 = vmax.xlane.f32.xlu0 %v502_v48 }
 0x350   :  { %v3260_v50 = vpop.f32.mrb[3].mxu1  ;;  %v505_v51 = vsel %vm501_vm2, %v497_v49, -inf }
 0x351   :  { %506 = vmax.xlane.f32.xlu1 %v505_v51 }
 0x3dc   :  { %v504_v53 = vpop.xlane.xlu0 %503 }
 0x3dd   :  { %v508_v54 = vsub.f32 %v494_v45, %v504_v53 }
 0x3de   :  { %v507_v55 = vpop.xlane.xlu1 %506 }
 0x3df   :  { %v510_v56 = vmul.f32 1.442695, %v508_v54  ;;  %v509_v57 = vsub.f32 %v497_v49, %v507_v55 }
 0x3e1   :  { %3628 = vpow2.f32 %v510_v56  ;;  %v512_v58 = vmul.f32 1.442695, %v509_v57 }
 0x3e3   :  { %3630 = vpow2.f32 %v512_v58 }
 0x3eb   :  { %v3629_v59 = vpop.eup %3628 }
 0x3ec   :  { %v514_v62 = vsel %vm501_vm2, %v3629_v59, 0.0 }
 0x3ed   :  { %v3631_v63 = vpop.eup %3630  ;;  %515 = vadd.xlane.f32.xlu0 %v514_v62 }
 0x3ee   :  { %v517_v0 = vsel %vm501_vm2, %v3631_v63, 0.0 }
 0x3ef   :  { %518 = vadd.xlane.f32.xlu1 %v517_v0 }
 0x400   :  { %572 = vrot.lane.b32.xlu1 %v447_v28, %s3914_s1 }
 0x403   :  { %575 = vrot.lane.b32.xlu0 %v449_v27, %s3914_s1 }
 0x404   :  { %704 = vrot.lane.b32.xlu1 %v449_v27, %s3908_s0 }
 0x407   :  { %832 = vrot.lane.b32.xlu0 %v449_v27, %s3915_s2 }
 0x408   :  { %702 = vrot.lane.b32.xlu1 %v447_v28, %s3908_s0 }
 0x40b   :  { %1078 = vrot.lane.b32.xlu0 %v4095_v37, %s3914_s1 }
 0x40c   :  { %830 = vrot.lane.b32.xlu1 %v447_v28, %s3915_s2 }
 0x40f   :  { %1206 = vrot.lane.b32.xlu0 %v4095_v37, %s3908_s0 }
 0x410   :  { %1075 = vrot.lane.b32.xlu1 %v4097_v38, %s3914_s1 }
 0x413   :  { %1333 = vrot.lane.b32.xlu0 %v4095_v37, %s3915_s2 }
 0x414   :  { %1204 = vrot.lane.b32.xlu1 %v4097_v38, %s3908_s0 }
 0x418   :  { %1331 = vrot.lane.b32.xlu1 %v4097_v38, %s3915_s2 }
 0x47a   :  { %v516_v1 = vpop.xlane.xlu0 %515 }
 0x47b   :  { %3632 = vrcp.f32 %v516_v1 }
 0x47c   :  { %v519_v2 = vpop.xlane.xlu1 %518 }
 0x47d   :  { %3634 = vrcp.f32 %v519_v2 }
 0x47e   :  { %v576_v7 = vpop.permute.xlu0 %575 }
 0x47f   :  { %v581_v10 = vsel %vm453_vm1, %v576_v7, 0 }
 0x480   :  { %v573_v9 = vpop.permute.xlu1 %572 }
 0x482   :  { %v833_v14 = vpop.permute.xlu0 %832 }
 0x483   :  { %v838_v17 = vsel %vm453_vm1, %v833_v14, 0 }
 0x484   :  { %v705_v11 = vpop.permute.xlu1 %704 }
 0x485   :  { %v3633_v3 = vpop.eup %3632  ;;  %v710_v12 = vsel %vm453_vm1, %v705_v11, 0 }
 0x486   :  { %v522_v5 = vmul.f32 %v3633_v3, %v3629_v59  ;;  %v1079_v20 = vpop.permute.xlu0 %1078 }
 0x487   :  { %v3635_v4 = vpop.eup %3634  ;;  %v1084_v21 = vsel %vm453_vm1, %v1079_v20, 0 }
 0x488   :  { %v523_v6 = vmul.f32 %v3635_v4, %v3631_v63  ;;  %v703_v15 = vpop.permute.xlu1 %702 }
 0x48a   :  { %v524_v8 = vpack.c.bf16 %v523_v6, %v522_v5  ;;  %v1207_v22 = vpop.permute.xlu0 %1206 }
 0x48b   :  { %v1212_v24 = vsel %vm453_vm1, %v1207_v22, 0 }
 0x48c   :  { %3264 = vmatmul.mubr.msk.bf16.vlgmr.msra.gmra.mrb[4].mxu1 %vm501_vm2, %v524_v8  ;;  %v831_v18 = vpop.permute.xlu1 %830 }
 0x48d   :  { %3268 = vmatpush3.bf16.xpose.msra.mxu1 %v581_v10  ;;  %3269 = vmatprep.mubr.msk.bf16.mxu1 %vm3913_vm0, %v3912_v61 }
 0x48e   :  { %3279 = vmatprep.subr.bf16.mxu1 %v3912_v61  ;;  %v1334_v25 = vpop.permute.xlu0 %1333 }
 0x48f   :  { %v1339_v27 = vsel %vm453_vm1, %v1334_v25, 0 }
 0x490   :  { %v1076_v23 = vpop.permute.xlu1 %1075 }
 0x494   :  { %3270 = vmatmul.mubr.msk.bf16.vlgmr.msra.gmra.mrb[8].mxu1 %vm453_vm1, %v573_v9  ;;  %v1205_v26 = vpop.permute.xlu1 %1204 }
 0x495   :  { %3280 = vmatpush3.bf16.xpose.msra.mxu1 %v710_v12  ;;  %3281 = vmatprep.mubr.msk.bf16.mxu1 %vm3913_vm0, %v3912_v61 }
 0x496   :  { %3291 = vmatprep.subr.bf16.mxu1 %v3912_v61 }
 0x498   :  { %v1332_v28 = vpop.permute.xlu1 %1331 }
 0x49c   :  { %3282 = vmatmul.mubr.msk.bf16.vlgmr.msra.gmra.mrb[12].mxu1 %vm453_vm1, %v703_v15 }
 0x49d   :  { %3292 = vmatpush3.bf16.xpose.msra.mxu1 %v838_v17  ;;  %3293 = vmatprep.mubr.msk.bf16.mxu1 %vm3913_vm0, %v3912_v61 }
 0x49e   :  { %3303 = vmatprep.subr.bf16.mxu1 %v3912_v61 }
 0x4a4   :  { %3294 = vmatmul.mubr.msk.bf16.vlgmr.msra.gmra.mrb[16].mxu1 %vm453_vm1, %v831_v18 }
 0x4a5   :  { %3304 = vmatpush3.bf16.xpose.msra.mxu1 %v962_v19  ;;  %3305 = vmatprep.mubr.msk.bf16.mxu1 %vm3913_vm0, %v3912_v61 }
 0x4a6   :  { %3315 = vmatprep.subr.bf16.mxu1 %v3912_v61 }
 0x4ac   :  { %3306 = vmatmul.mubr.msk.bf16.vlgmr.msra.gmra.mrb[20].mxu1 %vm453_vm1, %v4097_v38 }
 0x4ad   :  { %3316 = vmatpush3.bf16.xpose.msra.mxu1 %v1084_v21  ;;  %3317 = vmatprep.mubr.msk.bf16.mxu1 %vm3913_vm0, %v3912_v61 }
 0x4ae   :  { %3327 = vmatprep.subr.bf16.mxu1 %v3912_v61 }
 0x4b4   :  { %3318 = vmatmul.mubr.msk.bf16.vlgmr.msra.gmra.mrb[24].mxu1 %vm453_vm1, %v1076_v23 }
 0x4b5   :  { %3328 = vmatpush3.bf16.xpose.msra.mxu1 %v1212_v24  ;;  %3329 = vmatprep.mubr.msk.bf16.mxu1 %vm3913_vm0, %v3912_v61 }
 0x4b6   :  { %3339 = vmatprep.subr.bf16.mxu1 %v3912_v61 }
 0x4bc   :  { %3330 = vmatmul.mubr.msk.bf16.vlgmr.msra.gmra.mrb[28].mxu1 %vm453_vm1, %v1205_v26 }
 0x4bd   :  { %3340 = vmatpush3.bf16.xpose.msra.mxu1 %v1339_v27  ;;  %3341 = vmatprep.mubr.msk.bf16.mxu1 %vm3913_vm0, %v3912_v61 }
 0x4c4   :  { %3342 = vmatmul.mubr.msk.bf16.vlgmr.msra.gmra.mrb[32].mxu1 %vm453_vm1, %v1332_v28 }
 0x55f   :  { %v562_v29 = vpop.f32.mrb[4].mxu1 }
 0x560   :  { %v3265_v31 = vpop.f32.mrb[5].mxu1 }
 0x561   :  { %v565_v32 = vpop.f32.mrb[6].mxu1 }
 0x562   :  { %v569_v33 = vpack.c.bf16 %v565_v32, %v562_v29  ;;  %v3266_v34 = vpop.f32.mrb[7].mxu1 }
 0x564   :  { %570 = vst.msk [vmem:[#allocation2] sm:$0xff] %vm453_vm1, %v569_v33 }
 0x567   :  { %v617_v35 = vpop.f32.mrb[8].mxu1 }
 0x568   :  { %v3271_v36 = vpop.f32.mrb[9].mxu1  ;;  %v624_v37 = vsel %vm501_vm2, %v617_v35, -inf }
 0x569   :  { %625 = vmax.xlane.f32.xlu0 %v624_v37  ;;  %v620_v38 = vpop.f32.mrb[10].mxu1 }
 0x56a   :  { %v3272_v39 = vpop.f32.mrb[11].mxu1  ;;  %v627_v40 = vsel %vm501_vm2, %v620_v38, -inf }
 0x56b   :  { %628 = vmax.xlane.f32.xlu1 %v627_v40 }
 0x56f   :  { %v746_v41 = vpop.f32.mrb[12].mxu1 }
 0x570   :  { %v3283_v43 = vpop.f32.mrb[13].mxu1  ;;  %v753_v45 = vsel %vm501_vm2, %v746_v41, -inf }
 0x571   :  { %754 = vmax.xlane.f32.xlu0 %v753_v45  ;;  %v749_v47 = vpop.f32.mrb[14].mxu1 }
 0x572   :  { %v3284_v48 = vpop.f32.mrb[15].mxu1  ;;  %v756_v49 = vsel %vm501_vm2, %v749_v47, -inf }
 0x575   :  { %757 = vmax.xlane.f32.xlu0 %v756_v49 }
 0x577   :  { %v4169_v50 = vpop.f32.mrb[16].mxu1 }
 0x578   :  { %v3295_v51 = vpop.f32.mrb[17].mxu1  ;;  %v881_v53 = vsel %vm501_vm2, %v4169_v50, -inf }
 0x579   :  { %882 = vmax.xlane.f32.xlu0 %v881_v53  ;;  %v4173_v54 = vpop.f32.mrb[18].mxu1 }
 0x57a   :  { %v3296_v55 = vpop.f32.mrb[19].mxu1  ;;  %v884_v56 = vsel %vm501_vm2, %v4173_v54, -inf }
 0x57b   :  { %885 = vmax.xlane.f32.xlu1 %v884_v56 }
 0x57f   :  { %v4177_v57 = vpop.f32.mrb[20].mxu1 }
 0x580   :  { %v3307_v58 = vpop.f32.mrb[21].mxu1  ;;  %v1005_v59 = vsel %vm501_vm2, %v4177_v57, -inf }
 0x581   :  { %1006 = vmax.xlane.f32.xlu0 %v1005_v59  ;;  %v4181_v62 = vpop.f32.mrb[22].mxu1 }
 0x582   :  { %v3308_v63 = vpop.f32.mrb[23].mxu1  ;;  %v1008_v0 = vsel %vm501_vm2, %v4181_v62, -inf }
 0x583   :  { %1009 = vmax.xlane.f32.xlu1 %v1008_v0 }
 0x587   :  { %v4185_v1 = vpop.f32.mrb[24].mxu1 }
 0x588   :  { %v3319_v2 = vpop.f32.mrb[25].mxu1  ;;  %v1127_v3 = vsel %vm501_vm2, %v4185_v1, -inf }
 0x589   :  { %1128 = vmax.xlane.f32.xlu0 %v1127_v3  ;;  %v4189_v4 = vpop.f32.mrb[26].mxu1 }
 0x58a   :  { %v3320_v5 = vpop.f32.mrb[27].mxu1  ;;  %v1130_v6 = vsel %vm501_vm2, %v4189_v4, -inf }
 0x58b   :  { %1131 = vmax.xlane.f32.xlu1 %v1130_v6 }
 0x58f   :  { %v4193_v7 = vpop.f32.mrb[28].mxu1 }
 0x590   :  { %v3331_v8 = vpop.f32.mrb[29].mxu1  ;;  %v1255_v9 = vsel %vm501_vm2, %v4193_v7, -inf }
 0x591   :  { %1256 = vmax.xlane.f32.xlu0 %v1255_v9  ;;  %v4197_v10 = vpop.f32.mrb[30].mxu1 }
 0x592   :  { %v3332_v11 = vpop.f32.mrb[31].mxu1  ;;  %v1258_v12 = vsel %vm501_vm2, %v4197_v10, -inf }
 0x593   :  { %1259 = vmax.xlane.f32.xlu1 %v1258_v12 }
 0x597   :  { %v4201_v14 = vpop.f32.mrb[32].mxu1 }
 0x598   :  { %v3343_v15 = vpop.f32.mrb[33].mxu1  ;;  %v1382_v17 = vsel %vm501_vm2, %v4201_v14, -inf }
 0x599   :  { %1383 = vmax.xlane.f32.xlu0 %v1382_v17  ;;  %v4205_v18 = vpop.f32.mrb[34].mxu1 }
 0x59a   :  { %v3344_v19 = vpop.f32.mrb[35].mxu1  ;;  %v1385_v20 = vsel %vm501_vm2, %v4205_v18, -inf }
 0x59b   :  { %1386 = vmax.xlane.f32.xlu1 %v1385_v20 }
 0x5ac   :  { %776 = vrot.lane.b32.xlu1 %v4101_v44, %s3908_s0 }
 0x5af   :  { %648 = vrot.lane.b32.xlu0 %v4101_v44, %s3914_s1 }
 0x5f6   :  { %v626_v21 = vpop.xlane.xlu0 %625 }
 0x5f7   :  { %v630_v22 = vsub.f32 %v617_v35, %v626_v21 }
 0x5f8   :  { %v629_v23 = vpop.xlane.xlu1 %628 }
 0x5f9   :  { %v632_v24 = vmul.f32 1.442695, %v630_v22  ;;  %v631_v25 = vsub.f32 %v620_v38, %v629_v23 }
 0x5fb   :  { %3636 = vpow2.f32 %v632_v24  ;;  %v634_v26 = vmul.f32 1.442695, %v631_v25 }
 0x5fd   :  { %3638 = vpow2.f32 %v634_v26 }
 0x5fe   :  { %v755_v27 = vpop.xlane.xlu0 %754 }
 0x5ff   :  { %v759_v28 = vsub.f32 %v746_v41, %v755_v27 }
 0x601   :  { %v761_v29 = vmul.f32 1.442695, %v759_v28 }
 0x602   :  { %v758_v31 = vpop.xlane.xlu0 %757 }
 0x603   :  { %3640 = vpow2.f32 %v761_v29  ;;  %v760_v32 = vsub.f32 %v749_v47, %v758_v31 }
 0x605   :  { %v4213_v33 = vpop.eup %3636  ;;  %v763_v34 = vmul.f32 1.442695, %v760_v32 }
 0x606   :  { %v883_v36 = vpop.xlane.xlu0 %882  ;;  %v636_v37 = vsel %vm501_vm2, %v4213_v33, 0.0 }
 0x607   :  { %v4217_v35 = vpop.eup %3638  ;;  %3642 = vpow2.f32 %v763_v34  ;;  %v887_v38 = vsub.f32 %v4169_v50, %v883_v36  ;;  %637 = vadd.xlane.f32.xlu0 %v636_v37 }
 0x608   :  { %v886_v39 = vpop.xlane.xlu1 %885  ;;  %v639_v40 = vsel %vm501_vm2, %v4217_v35, 0.0 }
 0x609   :  { %v889_v41 = vmul.f32 1.442695, %v887_v38  ;;  %v888_v43 = vsub.f32 %v4173_v54, %v886_v39  ;;  %640 = vadd.xlane.f32.xlu1 %v639_v40 }
 0x60b   :  { %3644 = vpow2.f32 %v889_v41  ;;  %v891_v45 = vmul.f32 1.442695, %v888_v43 }
 0x60d   :  { %v4223_v47 = vpop.eup %3640  ;;  %3646 = vpow2.f32 %v891_v45 }
 0x60e   :  { %v1007_v48 = vpop.xlane.xlu0 %1006  ;;  %v765_v49 = vsel %vm501_vm2, %v4223_v47, 0.0 }
 0x60f   :  { %v1011_v50 = vsub.f32 %v4177_v57, %v1007_v48  ;;  %766 = vadd.xlane.f32.xlu0 %v765_v49 }
 0x610   :  { %v1010_v51 = vpop.xlane.xlu1 %1009 }
 0x611   :  { %v4228_v53 = vpop.eup %3642  ;;  %v1013_v55 = vmul.f32 1.442695, %v1011_v50  ;;  %v1012_v56 = vsub.f32 %v4181_v62, %v1010_v51 }
 0x612   :  { %v768_v54 = vsel %vm501_vm2, %v4228_v53, 0.0 }
 0x613   :  { %3648 = vpow2.f32 %v1013_v55  ;;  %v1015_v58 = vmul.f32 1.442695, %v1012_v56  ;;  %769 = vadd.xlane.f32.xlu1 %v768_v54 }
 0x615   :  { %v4233_v59 = vpop.eup %3644  ;;  %3650 = vpow2.f32 %v1015_v58 }
 0x616   :  { %v1129_v63 = vpop.xlane.xlu0 %1128  ;;  %v893_v57 = vsel %vm501_vm2, %v4233_v59, 0.0 }
 0x617   :  { %v4237_v0 = vpop.eup %3646  ;;  %v1133_v2 = vsub.f32 %v4185_v1, %v1129_v63  ;;  %894 = vadd.xlane.f32.xlu0 %v893_v57 }
 0x618   :  { %v1132_v3 = vpop.xlane.xlu1 %1131  ;;  %v896_v62 = vsel %vm501_vm2, %v4237_v0, 0.0 }
 0x619   :  { %v1135_v5 = vmul.f32 1.442695, %v1133_v2  ;;  %v1134_v6 = vsub.f32 %v4189_v4, %v1132_v3  ;;  %897 = vadd.xlane.f32.xlu1 %v896_v62 }
 0x61b   :  { %3652 = vpow2.f32 %v1135_v5  ;;  %v1137_v8 = vmul.f32 1.442695, %v1134_v6 }
 0x61d   :  { %v4243_v9 = vpop.eup %3648  ;;  %3654 = vpow2.f32 %v1137_v8 }
 0x61e   :  { %v1017_v11 = vsel %vm501_vm2, %v4243_v9, 0.0  ;;  %v1257_v4 = vpop.xlane.xlu0 %1256 }
 0x61f   :  { %v4247_v12 = vpop.eup %3650  ;;  %1018 = vadd.xlane.f32.xlu0 %v1017_v11  ;;  %v1261_v37 = vsub.f32 %v4193_v7, %v1257_v4 }
 0x620   :  { %v1260_v1 = vpop.xlane.xlu1 %1259  ;;  %v1020_v15 = vsel %vm501_vm2, %v4247_v12, 0.0 }
 0x621   :  { %v1262_v17 = vsub.f32 %v4197_v10, %v1260_v1  ;;  %1021 = vadd.xlane.f32.xlu1 %v1020_v15  ;;  %v1263_v38 = vmul.f32 1.442695, %v1261_v37 }
 0x623   :  { %v1265_v19 = vmul.f32 1.442695, %v1262_v17 }
 0x625   :  { %v4252_v20 = vpop.eup %3652  ;;  %3656 = vpow2.f32 %v1265_v19 }
 0x626   :  { %v1384_v21 = vpop.xlane.xlu0 %1383  ;;  %v1139_v22 = vsel %vm501_vm2, %v4252_v20, 0.0 }
 0x627   :  { %v4256_v23 = vpop.eup %3654  ;;  %v1388_v24 = vsub.f32 %v4201_v14, %v1384_v21  ;;  %1140 = vadd.xlane.f32.xlu1 %v1139_v22 }
 0x628   :  { %v1387_v25 = vpop.xlane.xlu1 %1386  ;;  %v1142_v28 = vsel %vm501_vm2, %v4256_v23, 0.0 }
 0x629   :  { %v1390_v26 = vmul.f32 1.442695, %v1388_v24  ;;  %v1389_v27 = vsub.f32 %v4205_v18, %v1387_v25 }
 0x62a   :  { %v649_v10 = vpop.permute.xlu0 %648 }
 0x62b   :  { %3658 = vpow2.f32 %v1390_v26  ;;  %v1392_v29 = vmul.f32 1.442695, %v1389_v27  ;;  %1143 = vadd.xlane.f32.xlu1 %v1142_v28  ;;  %3274 = vmatpush3.bf16.msra.mxu0 %v649_v10 }
 0x62c   :  { %3285 = vmatprep.subr.bf16.mxu0 %v3912_v61  ;;  %v777_v40 = vpop.permute.xlu1 %776 }
 0x62d   :  { %3660 = vpow2.f32 %v1392_v29 }
 0x62e   :  { %3662 = vpow2.f32 %v1263_v38 }
 0x62f   :  { %v4263_v31 = vpop.eup %3656 }
 0x630   :  { %v1270_v14 = vsel %vm501_vm2, %v4263_v31, 0.0 }
 0x631   :  { %1271 = vadd.xlane.f32.xlu1 %v1270_v14 }
 0x635   :  { %v4267_v32 = vpop.eup %3658  ;;  %904 = vrot.lane.b32.xlu0 %v4101_v44, %s3915_s2 }
 0x636   :  { %v1394_v18 = vsel %vm501_vm2, %v4267_v32, 0.0 }
 0x637   :  { %v4273_v34 = vpop.eup %3660  ;;  %1395 = vadd.xlane.f32.xlu1 %v1394_v18  ;;  %v3574_v18 = vld [vmem:[#allocation9 + $0x4] ss:$12 sps:$4 sm:$0xff]  }
 0x638   :  { %v1397_v36 = vsel %vm501_vm2, %v4273_v34, 0.0  ;;  %v4280_v39 = vpop.eup %3662 }
 0x639   :  { %v1267_v44 = vsel %vm501_vm2, %v4280_v39, 0.0 }
 0x63b   :  { %1398 = vadd.xlane.f32.xlu1 %v1397_v36 }
 0x64c   :  { %1151 = vrot.lane.b32.xlu1 %v4099_v42, %s3914_s1 }
 0x654   :  { %1268 = vadd.xlane.f32.xlu0 %v1267_v44 }
 0x66a   :  { %1278 = vrot.lane.b32.xlu0 %v4099_v42, %s3908_s0 }
 0x66e   :  { %1405 = vrot.lane.b32.xlu0 %v4099_v42, %s3915_s2 }
 0x694   :  { %v638_v41 = vpop.xlane.xlu0 %637 }
 0x695   :  { %3664 = vrcp.f32 %v638_v41  ;;  %v3572_v41 = vld [vmem:[#allocation9] ss:$12 sps:$4 sm:$0xff]  }
 0x696   :  { %v641_v7 = vpop.xlane.xlu1 %640 }
 0x697   :  { %3666 = vrcp.f32 %v641_v7  ;;  %v3577_v7 = vld [vmem:[#allocation9 + $0x1c] ss:$12 sps:$4 sm:$0xff]  }
 0x69c   :  { %v767_v43 = vpop.xlane.xlu0 %766 }
 0x69d   :  { %3668 = vrcp.f32 %v767_v43  ;;  %v3580_v43 = vld [vmem:[#allocation9 + $0x34] ss:$12 sps:$4 sm:$0xff]  }
 0x69f   :  { %v3665_v45 = vpop.eup %3664 }
 0x6a0   :  { %v770_v48 = vpop.xlane.xlu1 %769  ;;  %v644_v50 = vmul.f32 %v3665_v45, %v4213_v33  ;;  %v3578_v45 = vld [vmem:[#allocation9 + $0x30] ss:$12 sps:$4 sm:$0xff]  }
 0x6a1   :  { %v3667_v49 = vpop.eup %3666  ;;  %3670 = vrcp.f32 %v770_v48  ;;  %v3583_v48 = vld [vmem:[#allocation9 + $0x4c] ss:$12 sps:$4 sm:$0xff]  }
 0x6a2   :  { %v645_v51 = vmul.f32 %v3667_v49, %v4217_v35  ;;  %v3586_v49 = vld [vmem:[#allocation9 + $0x64] ss:$12 sps:$4 sm:$0xff]  }
 0x6a4   :  { %v895_v55 = vpop.xlane.xlu0 %894  ;;  %v646_v56 = vpack.c.bf16 %v645_v51, %v644_v50  ;;  %v3589_v50 = vld [vmem:[#allocation9 + $0x7c] ss:$12 sps:$4 sm:$0xff]   ;;  %v3587_v51 = vld [vmem:[#allocation9 + $0x78] ss:$12 sps:$4 sm:$0xff]  }
 0x6a5   :  { %3672 = vrcp.f32 %v895_v55  ;;  %v3592_v55 = vld [vmem:[#allocation9 + $0x94] ss:$12 sps:$4 sm:$0xff]  }
 0x6a6   :  { %v898_v54 = vpop.xlane.xlu1 %897  ;;  %3276 = vmatmul.mubr.msk.bf16.vlgmr.msra.gmra.mrb[12].mxu0 %vm501_vm2, %v646_v56  ;;  %v3590_v56 = vld [vmem:[#allocation9 + $0x90] ss:$12 sps:$4 sm:$0xff]  }
 0x6a7   :  { %3674 = vrcp.f32 %v898_v54  ;;  %3286 = vmatpush3.bf16.msra.mxu0 %v777_v40  ;;  %3287 = vmatprep.mubr.msk.bf16.mxu0 %vm3913_vm0, %v3912_v61  ;;  %v3669_v58 = vpop.eup %3668  ;;  %v3595_v54 = vld [vmem:[#allocation9 + $0xac] ss:$12 sps:$4 sm:$0xff]  }
 0x6a8   :  { %3297 = vmatprep.subr.bf16.mxu0 %v3912_v61  ;;  %v773_v57 = vmul.f32 %v3669_v58, %v4223_v47  ;;  %v3593_v58 = vld [vmem:[#allocation9 + $0xa8] ss:$12 sps:$4 sm:$0xff]  }
 0x6ab   :  { %v3671_v63 = vpop.eup %3670 }
 0x6ac   :  { %v774_v33 = vmul.f32 %v3671_v63, %v4228_v53  ;;  %v1019_v35 = vpop.xlane.xlu0 %1018  ;;  %v1594_v63 = vmul.f32 %v4059_v46, %v4081_v13 }
 0x6ad   :  { %3676 = vrcp.f32 %v1019_v35 }
 0x6ae   :  { %v1022_v2 = vpop.xlane.xlu1 %1021  ;;  %v775_v3 = vpack.c.bf16 %v774_v33, %v773_v57  ;;  %v1595_v57 = vmul.f32 %v4059_v46, %v4085_v16  ;;  %v1604_v33 = vadd.f32 %v4068_v52, %v1594_v63 }
 0x6af   :  { %3678 = vrcp.f32 %v1022_v2  ;;  %v3673_v62 = vpop.eup %3672 }
 0x6b0   :  { %3288 = vmatmul.mubr.msk.bf16.vlgmr.msra.gmra.mrb[16].mxu0 %vm501_vm2, %v775_v3  ;;  %v905_v5 = vpop.permute.xlu0 %904  ;;  %v901_v47 = vmul.f32 %v3673_v62, %v4233_v59  ;;  %v1605_v35 = vadd.f32 %v4068_v52, %v1595_v57 }
 0x6b1   :  { %v3675_v6 = vpop.eup %3674  ;;  %3298 = vmatpush3.bf16.msra.mxu0 %v905_v5  ;;  %3299 = vmatprep.mubr.msk.bf16.mxu0 %vm3913_vm0, %v3912_v61 }
 0x6b2   :  { %v902_v8 = vmul.f32 %v3675_v6, %v4237_v0  ;;  %3309 = vmatprep.subr.bf16.mxu0 %v3912_v61  ;;  %v4337_v2 = vpack.c.bf16 %v1605_v35, %v1604_v33 }
 0x6b4   :  { %v1141_v53 = vpop.xlane.xlu1 %1140  ;;  %v903_v11 = vpack.c.bf16 %v902_v8, %v901_v47 }
 0x6b7   :  { %v3677_v1 = vpop.eup %3676 }
 0x6b8   :  { %3300 = vmatmul.mubr.msk.bf16.vlgmr.msra.gmra.mrb[20].mxu0 %vm501_vm2, %v903_v11  ;;  %v1144_v4 = vpop.xlane.xlu1 %1143  ;;  %v1025_v0 = vmul.f32 %v3677_v1, %v4243_v9 }
 0x6b9   :  { %v3679_v15 = vpop.eup %3678  ;;  %3310 = vmatpush3.bf16.msra.mxu0 %v4099_v42  ;;  %3311 = vmatprep.mubr.msk.bf16.mxu0 %vm3913_vm0, %v3912_v61  ;;  %3680 = vrcp.f32 %v1144_v4 }
 0x6ba   :  { %v1026_v17 = vmul.f32 %v3679_v15, %v4247_v12  ;;  %3321 = vmatprep.subr.bf16.mxu0 %v3912_v61  ;;  %3682 = vrcp.f32 %v1141_v53 }
 0x6bc   :  { %v1027_v59 = vpack.c.bf16 %v1026_v17, %v1025_v0 }
 0x6be   :  { %v1272_v19 = vpop.xlane.xlu1 %1271 }
 0x6bf   :  { %3684 = vrcp.f32 %v1272_v19 }
 0x6c0   :  { %3312 = vmatmul.mubr.msk.bf16.vlgmr.msra.gmra.mrb[24].mxu0 %vm501_vm2, %v1027_v59 }
 0x6c1   :  { %3323 = vmatprep.mubr.msk.bf16.mxu0 %vm3913_vm0, %v3912_v61 }
 0x6c3   :  { %v3681_v21 = vpop.eup %3680 }
 0x6c4   :  { %v1396_v42 = vpop.xlane.xlu1 %1395  ;;  %v3683_v24 = vpop.eup %3682  ;;  %v1148_v12 = vmul.f32 %v3681_v21, %v4256_v23  ;;  %v3597_v21 = vld [vmem:[#allocation8 + $0x8] sm:$0xff]  }
 0x6c5   :  { %v1147_v25 = vmul.f32 %v3683_v24, %v4252_v20 }
 0x6c7   :  { %v1149_v9 = vpack.c.bf16 %v1148_v12, %v1147_v25  ;;  %v3599_v12 = vld [vmem:[#allocation8 + $0x18] sm:$0xff]  }
 0x6c8   :  { %v1399_v22 = vpop.xlane.xlu1 %1398 }
 0x6c9   :  { %v3685_v20 = vpop.eup %3684 }
 0x6ca   :  { %v1276_v28 = vmul.f32 %v3685_v20, %v4263_v31  ;;  %v3601_v20 = vld [vmem:[#allocation8 + $0x28] sm:$0xff]  }
 0x6cc   :  { %v1152_v26 = vpop.permute.xlu1 %1151 }
 0x6cd   :  { %3322 = vmatpush3.bf16.msra.mxu0 %v1152_v26 }
 0x6ce   :  { %3333 = vmatprep.subr.bf16.mxu0 %v3912_v61 }
 0x6d0   :  { %3324 = vmatmul.mubr.msk.bf16.vlgmr.msra.gmra.mrb[28].mxu0 %vm501_vm2, %v1149_v9 }
 0x6d1   :  { %3335 = vmatprep.mubr.msk.bf16.mxu0 %vm3913_vm0, %v3912_v61 }
 0x6e1   :  { %v1269_v27 = vpop.xlane.xlu0 %1268 }
 0x6e2   :  { %3686 = vrcp.f32 %v1269_v27 }
 0x6e3   :  { %3688 = vrcp.f32 %v1399_v22  ;;  %v3598_v22 = vld [vmem:[#allocation8 + $0x10] sm:$0xff]  }
 0x6e4   :  { %3690 = vrcp.f32 %v1396_v42  ;;  %v3596_v42 = vld [vmem:[#allocation8] sm:$0xff]  }
 0x6e5   :  { %v1279_v10 = vpop.permute.xlu0 %1278  ;;  %3351 = vmatprep.subr.bf16.mxu1 %v3596_v42 }
 0x6e6   :  { %3334 = vmatpush3.bf16.msra.mxu0 %v1279_v10  ;;  %3352 = vmatpush3.bf16.msra.mxu1 %v3596_v42  ;;  %v3600_v10 = vld [vmem:[#allocation8 + $0x20] sm:$0xff]  }
 0x6e7   :  { %3345 = vmatprep.subr.bf16.mxu0 %v3912_v61  ;;  %3353 = vmatprep.subr.bf16.mxu1 %v3597_v21 }
 0x6e9   :  { %v1406_v37 = vpop.permute.xlu0 %1405 }
 0x6ea   :  { %3354 = vmatpush3.bf16.msra.mxu1 %v3597_v21 }
 0x6eb   :  { %3355 = vmatprep.subr.bf16.mxu1 %v3598_v22 }
 0x6ec   :  { %v3687_v23 = vpop.eup %3686 }
 0x6ed   :  { %v1275_v29 = vmul.f32 %v3687_v23, %v4280_v39  ;;  %v3689_v36 = vpop.eup %3688  ;;  %v3575_v39 = vld [vmem:[#allocation9 + $0x18] ss:$12 sps:$4 sm:$0xff]   ;;  %v3602_v23 = vld [vmem:[#allocation8 + $0x30] sm:$0xff]  }
 0x6ee   :  { %v3691_v38 = vpop.eup %3690  ;;  %v1403_v44 = vmul.f32 %v3689_v36, %v4273_v34  ;;  %v3581_v34 = vld [vmem:[#allocation9 + $0x48] ss:$12 sps:$4 sm:$0xff]   ;;  %3356 = vmatpush3.bf16.msra.mxu1 %v3598_v22 }
 0x6ef   :  { %v1277_v14 = vpack.c.bf16 %v1276_v28, %v1275_v29  ;;  %v1402_v40 = vmul.f32 %v3691_v38, %v4267_v32  ;;  %v3584_v32 = vld [vmem:[#allocation9 + $0x60] ss:$12 sps:$4 sm:$0xff]   ;;  %3357 = vmatprep.subr.bf16.mxu1 %v3599_v12  ;;  %v3603_v29 = vld [vmem:[#allocation8 + $0x38] sm:$0xff]  }
 0x6f1   :  { %3336 = vmatmul.mubr.msk.bf16.vlgmr.msra.gmra.mrb[32].mxu0 %vm501_vm2, %v1277_v14  ;;  %v1404_v31 = vpack.c.bf16 %v1403_v44, %v1402_v40  ;;  %v3604_v14 = vld [vmem:[#allocation9 + $0x8] ss:$12 sps:$4 sm:$0xff]  }
 0x6f2   :  { %3346 = vmatpush3.bf16.msra.mxu0 %v1406_v37  ;;  %3347 = vmatprep.mubr.msk.bf16.mxu0 %vm3913_vm0, %v3912_v61 }
 0x6f3   :  { %1768 = vmatprep.subr.bf16.mxu0 %v3574_v18  ;;  %3358 = vmatpush3.bf16.msra.mxu1 %v3599_v12 }
 0x6f4   :  { %3359 = vmatprep.subr.bf16.mxu1 %v3600_v10 }
 0x6f7   :  { %3360 = vmatpush3.bf16.msra.mxu1 %v3600_v10 }
 0x6f8   :  { %3361 = vmatprep.subr.bf16.mxu1 %v3601_v20 }
 0x6f9   :  { %3348 = vmatmul.mubr.msk.bf16.vlgmr.msra.gmra.mrb[36].mxu0 %vm501_vm2, %v1404_v31 }
 0x6fa   :  { %1769 = vmatpush1.bf16.msra.mxu0 %v3572_v41  ;;  %1800 = vmatprep.mubr.bf16.mxu0 %v3911_v30 }
 0x6fb   :  { %1770 = vmatprep.subr.bf16.mxu0 %v3577_v7  ;;  %3362 = vmatpush3.bf16.msra.mxu1 %v3601_v20 }
 0x6fc   :  { %3363 = vmatprep.subr.bf16.mxu1 %v3602_v23 }
 0x6fe   :  { %1771 = vmatpush1.bf16.msra.mxu0 %v3575_v39 }
 0x6ff   :  { %1772 = vmatprep.subr.bf16.mxu0 %v3580_v43  ;;  %3364 = vmatpush3.bf16.msra.mxu1 %v3602_v23 }
 0x700   :  { %3365 = vmatprep.subr.bf16.mxu1 %v3603_v29 }
 0x702   :  { %1773 = vmatpush1.bf16.msra.mxu0 %v3578_v45 }
 0x703   :  { %1774 = vmatprep.subr.bf16.mxu0 %v3583_v48  ;;  %3366 = vmatpush3.bf16.msra.mxu1 %v3603_v29 }
 0x704   :  { %3371 = vmatprep.subr.bf16.mxu1 %v3604_v14 }
 0x706   :  { %1775 = vmatpush1.bf16.msra.mxu0 %v3581_v34 }
 0x707   :  { %1776 = vmatprep.subr.bf16.mxu0 %v3586_v49 }
 0x70a   :  { %1777 = vmatpush1.bf16.msra.mxu0 %v3584_v32 }
 0x70b   :  { %1778 = vmatprep.subr.bf16.mxu0 %v3589_v50 }
 0x70e   :  { %1779 = vmatpush1.bf16.msra.mxu0 %v3587_v51 }
 0x70f   :  { %1780 = vmatprep.subr.bf16.mxu0 %v3592_v55 }
 0x712   :  { %1781 = vmatpush1.bf16.msra.mxu0 %v3590_v56 }
 0x713   :  { %1782 = vmatprep.subr.bf16.mxu0 %v3595_v54 }
 0x716   :  { %1783 = vmatpush1.bf16.msra.mxu0 %v3593_v58 }
 0x717   :  { %3391 = vmatprep.subr.bf16.mxu0 %v3912_v61 }
 0x719   :  { %1801 = vmatmul.mubr.bf16.vlgmr.msra.gmra.mrb[40].mxu0 %v4073_v60 }
 0x71a   :  { %1810 = vmatprep.mubr.bf16.mxu0 %v3911_v30 }
 0x721   :  { %1811 = vmatmul.mubr.bf16.gmra.mrb[44].mxu0 %v4337_v2 }
 0x722   :  { %3393 = vmatprep.mubr.msk.bf16.mxu0 %vm3913_vm0, %v3912_v61 }
 0x779   :  { %v688_v13 = vpop.f32.mrb[12].mxu0 }
 0x77a   :  { %v3277_v3 = vpop.f32.mrb[13].mxu0 }
 0x77b   :  { %v691_v46 = vpop.f32.mrb[14].mxu0 }
 0x77c   :  { %v695_v16 = vpack.c.bf16 %v691_v46, %v688_v13  ;;  %v3278_v62 = vpop.f32.mrb[15].mxu0 }
 0x77e   :  { %697 = vrot.lane.b32.xlu0 %v695_v16, %s3915_s2 }
 0x783   :  { %v816_v5 = vpop.f32.mrb[16].mxu0 }
 0x784   :  { %v3289_v30 = vpop.f32.mrb[17].mxu0 }
 0x785   :  { %v819_v6 = vpop.f32.mrb[18].mxu0 }
 0x786   :  { %v823_v8 = vpack.c.bf16 %v819_v6, %v816_v5  ;;  %v3290_v47 = vpop.f32.mrb[19].mxu0  ;;  %v3605_v6 = vld [vmem:[#allocation9 + $0x20] ss:$12 sps:$4 sm:$0xff]  }
 0x787   :  { %v3606_v47 = vld [vmem:[#allocation9 + $0x38] ss:$12 sps:$4 sm:$0xff]  }
 0x788   :  { %825 = vrot.lane.b32.xlu1 %v823_v8, %s3908_s0 }
 0x78b   :  { %v944_v52 = vpop.f32.mrb[20].mxu0 }
 0x78c   :  { %v3301_v53 = vpop.f32.mrb[21].mxu0 }
 0x78d   :  { %v947_v11 = vpop.f32.mrb[22].mxu0  ;;  %v3608_v53 = vld [vmem:[#allocation9 + $0x68] ss:$12 sps:$4 sm:$0xff]  }
 0x78e   :  { %v951_v1 = vpack.c.bf16 %v947_v11, %v944_v52  ;;  %v3302_v15 = vpop.f32.mrb[23].mxu0  ;;  %v3607_v52 = vld [vmem:[#allocation9 + $0x50] ss:$12 sps:$4 sm:$0xff]   ;;  %v3609_v11 = vld [vmem:[#allocation9 + $0x80] ss:$12 sps:$4 sm:$0xff]  }
 0x78f   :  { %v3611_v15 = vld [vmem:[#allocation9 + $0xb0] ss:$12 sps:$4 sm:$0xff]  }
 0x790   :  { %953 = vrot.lane.b32.xlu1 %v951_v1, %s3914_s1  ;;  %v3610_v1 = vld [vmem:[#allocation9 + $0x98] ss:$12 sps:$4 sm:$0xff]  }
 0x793   :  { %v1065_v17 = vpop.f32.mrb[24].mxu0 }
 0x794   :  { %v3313_v4 = vpop.f32.mrb[25].mxu0 }
 0x795   :  { %v1068_v0 = vpop.f32.mrb[26].mxu0 }
 0x796   :  { %v1072_v59 = vpack.c.bf16 %v1068_v0, %v1065_v17  ;;  %v3314_v19 = vpop.f32.mrb[27].mxu0 }
 0x798   :  { %1073 = vst.msk [vmem:[#allocation2 + $0x8] sm:$0xff] %vm453_vm1, %v1072_v59 }
 0x7a3   :  { %v1191_v24 = vpop.f32.mrb[28].mxu0 }
 0x7a4   :  { %v3325_v25 = vpop.f32.mrb[29].mxu0 }
 0x7a5   :  { %v1194_v26 = vpop.f32.mrb[30].mxu0 }
 0x7a6   :  { %v1198_v9 = vpack.c.bf16 %v1194_v26, %v1191_v24  ;;  %v3326_v27 = vpop.f32.mrb[31].mxu0 }
 0x7a8   :  { %1200 = vrot.lane.b32.xlu0 %v1198_v9, %s3915_s2 }
 0x7c4   :  { %v1318_v28 = vpop.f32.mrb[32].mxu0 }
 0x7c5   :  { %v3337_v18 = vpop.f32.mrb[33].mxu0 }
 0x7c6   :  { %v1321_v36 = vpop.f32.mrb[34].mxu0 }
 0x7c7   :  { %v1325_v37 = vpack.c.bf16 %v1321_v36, %v1318_v28  ;;  %v3338_v38 = vpop.f32.mrb[35].mxu0 }
 0x7c9   :  { %1327 = vrot.lane.b32.xlu0 %v1325_v37, %s3908_s0 }
 0x7cc   :  { %v1445_v44 = vpop.f32.mrb[36].mxu0 }
 0x7cd   :  { %v3349_v40 = vpop.f32.mrb[37].mxu0 }
 0x7ce   :  { %v1448_v41 = vpop.f32.mrb[38].mxu0 }
 0x7cf   :  { %v1452_v31 = vpack.c.bf16 %v1448_v41, %v1445_v44  ;;  %v3350_v7 = vpop.f32.mrb[39].mxu0 }
 0x7d1   :  { %1454 = vrot.lane.b32.xlu1 %v1452_v31, %s3914_s1 }
 0x7ec   :  { %v1802_v39 = vpop.f32.mrb[40].mxu0 }
 0x7ed   :  { %v1804_v43 = vpop.f32.mrb[41].mxu0  ;;  %v1870_v48 = vmul.f32 0.17677669, %v1802_v39 }
 0x7ee   :  { %v1806_v45 = vpop.f32.mrb[42].mxu0 }
 0x7ef   :  { %v1871_v34 = vmul.f32 0.17677669, %v1806_v45  ;;  %v1808_v49 = vpop.f32.mrb[43].mxu0 }
 0x7f0   :  { %v4349_v32 = vpack.c.bf16 %v1808_v49, %v1804_v43  ;;  %v698_v50 = vpop.permute.xlu0 %697 }
 0x7f1   :  { %v4351_v51 = vpack.c.bf16 %v1871_v34, %v1870_v48  ;;  %701 = vst.msk [vmem:[#allocation2] sm:$0xff] %vm700_vm3, %v698_v50 }
 0x7f2   :  { %v1884_v55 = vsel %vm453_vm1, %v4349_v32, 0 }
 0x7f3   :  { %3392 = vmatpush3.bf16.xpose.msra.mxu0 %v1884_v55 }
 0x7f4   :  { %v1812_v56 = vpop.f32.mrb[44].mxu0  ;;  %3397 = vmatprep.subr.bf16.mxu0 %v3912_v61 }
 0x7f5   :  { %v1814_v54 = vpop.f32.mrb[45].mxu0  ;;  %v1872_v63 = vmul.f32 0.17677669, %v1812_v56 }
 0x7f6   :  { %v1816_v58 = vpop.f32.mrb[46].mxu0 }
 0x7f7   :  { %v1873_v57 = vmul.f32 0.17677669, %v1816_v58  ;;  %v1818_v33 = vpop.f32.mrb[47].mxu0 }
 0x7f8   :  { %v4357_v35 = vpack.c.bf16 %v1818_v33, %v1814_v54 }
 0x7f9   :  { %v4359_v13 = vpack.c.bf16 %v1873_v57, %v1872_v63 }
 0x7fa   :  { %3394 = vmatmul.mubr.msk.bf16.vlgmr.msra.gmra.mrb[48].mxu0 %vm453_vm1, %v4351_v51  ;;  %v826_v3 = vpop.permute.xlu1 %825  ;;  %v2384_v50 = vsel %vm453_vm1, %v4357_v35, 0 }
 0x7fb   :  { %829 = vst.msk [vmem:[#allocation2] sm:$0xff] %vm828_vm4, %v826_v3  ;;  %3399 = vmatprep.mubr.msk.bf16.mxu0 %vm3913_vm0, %v3912_v61 }
 0x802   :  { %v954_v46 = vpop.permute.xlu1 %953 }
 0x803   :  { %957 = vst.msk [vmem:[#allocation2] sm:$0xff] %vm956_vm5, %v954_v46 }
 0x80a   :  { %v1458_v16 = vld [vmem:[#allocation2] sm:$0xff] }
 0x80b   :  { %3367 = vmatprep.mubr.bf16.mxu1 %v1458_v16 }
 0x81a   :  { %v1201_v62 = vpop.permute.xlu0 %1200 }
 0x81b   :  { %1203 = vst.msk [vmem:[#allocation2 + $0x8] sm:$0xff] %vm700_vm3, %v1201_v62 }
 0x83b   :  { %v1328_v5 = vpop.permute.xlu0 %1327 }
 0x83c   :  { %1330 = vst.msk [vmem:[#allocation2 + $0x8] sm:$0xff] %vm828_vm4, %v1328_v5 }
 0x843   :  { %v1455_v30 = vpop.permute.xlu1 %1454 }
 0x844   :  { %1457 = vst.msk [vmem:[#allocation2 + $0x8] sm:$0xff] %vm956_vm5, %v1455_v30 }
 0x84b   :  { %v1459_v8 = vld [vmem:[#allocation2 + $0x8] sm:$0xff] }
 0x84c   :  { %3368 = vmatmul.mubr.bf16.vlgmr.msra.gmra.mrb[36].mxu1 %v1459_v8 }
 0x84d   :  { %3372 = vmatpush3.bf16.msra.mxu1 %v3604_v14  ;;  %3387 = vmatprep.mubr.bf16.mxu1 %v4073_v60 }
 0x84e   :  { %3373 = vmatprep.subr.bf16.mxu1 %v3605_v6 }
 0x851   :  { %3374 = vmatpush3.bf16.msra.mxu1 %v3605_v6 }
 0x852   :  { %3375 = vmatprep.subr.bf16.mxu1 %v3606_v47 }
 0x855   :  { %3376 = vmatpush3.bf16.msra.mxu1 %v3606_v47 }
 0x856   :  { %3377 = vmatprep.subr.bf16.mxu1 %v3607_v52 }
 0x859   :  { %3378 = vmatpush3.bf16.msra.mxu1 %v3607_v52 }
 0x85a   :  { %3379 = vmatprep.subr.bf16.mxu1 %v3608_v53 }
 0x85d   :  { %3380 = vmatpush3.bf16.msra.mxu1 %v3608_v53 }
 0x85e   :  { %3381 = vmatprep.subr.bf16.mxu1 %v3609_v11 }
 0x861   :  { %3382 = vmatpush3.bf16.msra.mxu1 %v3609_v11 }
 0x862   :  { %3383 = vmatprep.subr.bf16.mxu1 %v3610_v1 }
 0x865   :  { %3384 = vmatpush3.bf16.msra.mxu1 %v3610_v1 }
 0x866   :  { %3385 = vmatprep.subr.bf16.mxu1 %v3611_v15 }
 0x869   :  { %3386 = vmatpush3.bf16.msra.mxu1 %v3611_v15 }
 0x86a   :  { %3409 = vmatprep.subr.bf16.mxu1 %v3912_v61 }
 0x86c   :  { %3388 = vmatmul.mubr.bf16.vlgmr.msra.gmra.mrb[40].mxu1 %v4337_v2 }
 0x86d   :  { %3411 = vmatprep.mubr.msk.bf16.mxu1 %vm3913_vm0, %v3912_v61 }
 0x8cd   :  { %v1920_v60 = vpop.f32.mrb[48].mxu0 }
 0x8ce   :  { %v3395_v17 = vpop.f32.mrb[49].mxu0  ;;  %v1927_v4 = vsel %vm501_vm2, %v1920_v60, -inf }
 0x8cf   :  { %1928 = vmax.xlane.f32.xlu0 %v1927_v4  ;;  %v1923_v0 = vpop.f32.mrb[50].mxu0 }
 0x8d0   :  { %v3396_v59 = vpop.f32.mrb[51].mxu0  ;;  %v1930_v19 = vsel %vm501_vm2, %v1923_v0, -inf }
 0x8d1   :  { %1931 = vmax.xlane.f32.xlu1 %v1930_v19 }
 0x8e2   :  { %1997 = vrot.lane.b32.xlu1 %v4351_v51, %s3914_s1 }
 0x8e6   :  { %2128 = vrot.lane.b32.xlu1 %v4349_v32, %s3908_s0 }
 0x8ea   :  { %2126 = vrot.lane.b32.xlu1 %v4351_v51, %s3908_s0 }
 0x8ee   :  { %2253 = vrot.lane.b32.xlu1 %v4351_v51, %s3915_s2 }
 0x8f2   :  { %2497 = vrot.lane.b32.xlu1 %v4359_v13, %s3914_s1 }
 0x8f6   :  { %2626 = vrot.lane.b32.xlu1 %v4359_v13, %s3908_s0 }
 0x8fa   :  { %2753 = vrot.lane.b32.xlu1 %v4359_v13, %s3915_s2 }
 0x93f   :  { %v3389_v2 = vpop.f32.mrb[40].mxu1 }
 0x940   :  { %v1855_v42 = vpop.f32.mrb[41].mxu1 }
 0x941   :  { %v3390_v21 = vpop.f32.mrb[42].mxu1 }
 0x942   :  { %v4391_v22 = vpack.c.bf16 %v3390_v21, %v3389_v2  ;;  %v1858_v24 = vpop.f32.mrb[43].mxu1 }
 0x943   :  { %v4393_v12 = vpack.c.bf16 %v1858_v24, %v1855_v42 }
 0x945   :  { %3398 = vmatpush3.bf16.msra.mxu0 %v4393_v12 }
 0x946   :  { %3403 = vmatprep.subr.bf16.mxu0 %v3912_v61 }
 0x95c   :  { %v1929_v25 = vpop.xlane.xlu0 %1928 }
 0x95d   :  { %v1933_v26 = vsub.f32 %v1920_v60, %v1929_v25 }
 0x95e   :  { %v1932_v9 = vpop.xlane.xlu1 %1931 }
 0x95f   :  { %v1935_v27 = vmul.f32 1.442695, %v1933_v26  ;;  %v1934_v10 = vsub.f32 %v1923_v0, %v1932_v9 }
 0x961   :  { %3692 = vpow2.f32 %v1935_v27  ;;  %v1937_v20 = vmul.f32 1.442695, %v1934_v10 }
 0x962   :  { %v1998_v7 = vpop.permute.xlu1 %1997 }
 0x963   :  { %3694 = vpow2.f32 %v1937_v20 }
 0x966   :  { %v2129_v43 = vpop.permute.xlu1 %2128 }
 0x967   :  { %v2134_v45 = vsel %vm453_vm1, %v2129_v43, 0 }
 0x96a   :  { %v2127_v34 = vpop.permute.xlu1 %2126 }
 0x96b   :  { %v3693_v23 = vpop.eup %3692 }
 0x96c   :  { %v1939_v28 = vsel %vm501_vm2, %v3693_v23, 0.0 }
 0x96d   :  { %v3695_v29 = vpop.eup %3694  ;;  %1940 = vadd.xlane.f32.xlu0 %v1939_v28 }
 0x96e   :  { %v1942_v14 = vsel %vm501_vm2, %v3695_v29, 0.0 }
 0x971   :  { %1943 = vadd.xlane.f32.xlu0 %v1942_v14 }
 0x987   :  { %2000 = vrot.lane.b32.xlu0 %v4349_v32, %s3914_s1 }
 0x98b   :  { %2255 = vrot.lane.b32.xlu0 %v4349_v32, %s3915_s2  ;;  %v2254_v32 = vpop.permute.xlu1 %2253 }
 0x98f   :  { %2500 = vrot.lane.b32.xlu0 %v4357_v35, %s3914_s1  ;;  %v2498_v54 = vpop.permute.xlu1 %2497 }
 0x993   :  { %2628 = vrot.lane.b32.xlu0 %v4357_v35, %s3908_s0  ;;  %v2627_v57 = vpop.permute.xlu1 %2626 }
 0x997   :  { %2755 = vrot.lane.b32.xlu0 %v4357_v35, %s3915_s2  ;;  %v2754_v35 = vpop.permute.xlu1 %2753 }
 0x9fa   :  { %v1941_v18 = vpop.xlane.xlu0 %1940 }
 0x9fb   :  { %3696 = vrcp.f32 %v1941_v18 }
 0x9fe   :  { %v1944_v36 = vpop.xlane.xlu0 %1943 }
 0x9ff   :  { %3698 = vrcp.f32 %v1944_v36 }
 0xa02   :  { %v2001_v41 = vpop.permute.xlu0 %2000 }
 0xa03   :  { %v2006_v39 = vsel %vm453_vm1, %v2001_v41, 0 }
 0xa05   :  { %v3697_v37 = vpop.eup %3696 }
 0xa06   :  { %v1947_v44 = vmul.f32 %v3697_v37, %v3693_v23  ;;  %v2256_v48 = vpop.permute.xlu0 %2255 }
 0xa07   :  { %v2261_v49 = vsel %vm453_vm1, %v2256_v48, 0 }
 0xa09   :  { %v3699_v38 = vpop.eup %3698 }
 0xa0a   :  { %v1948_v40 = vmul.f32 %v3699_v38, %v3695_v29  ;;  %v2501_v51 = vpop.permute.xlu0 %2500 }
 0xa0b   :  { %v2506_v55 = vsel %vm453_vm1, %v2501_v51, 0 }
 0xa0c   :  { %v1949_v31 = vpack.c.bf16 %v1948_v40, %v1947_v44 }
 0xa0e   :  { %3400 = vmatmul.mubr.msk.bf16.vlgmr.msra.gmra.mrb[52].mxu0 %vm501_vm2, %v1949_v31  ;;  %v2629_v56 = vpop.permute.xlu0 %2628 }
 0xa0f   :  { %3404 = vmatpush3.bf16.xpose.msra.mxu0 %v2006_v39  ;;  %3405 = vmatprep.mubr.msk.bf16.mxu0 %vm3913_vm0, %v3912_v61  ;;  %v2634_v58 = vsel %vm453_vm1, %v2629_v56, 0 }
 0xa10   :  { %3415 = vmatprep.subr.bf16.mxu0 %v3912_v61 }
 0xa12   :  { %v2756_v63 = vpop.permute.xlu0 %2755 }
 0xa13   :  { %v2761_v33 = vsel %vm453_vm1, %v2756_v63, 0 }
 0xa16   :  { %3406 = vmatmul.mubr.msk.bf16.vlgmr.msra.gmra.mrb[56].mxu0 %vm453_vm1, %v1998_v7 }
 0xa17   :  { %3416 = vmatpush3.bf16.xpose.msra.mxu0 %v2134_v45  ;;  %3417 = vmatprep.mubr.msk.bf16.mxu0 %vm3913_vm0, %v3912_v61 }
 0xa18   :  { %3427 = vmatprep.subr.bf16.mxu0 %v3912_v61 }
 0xa1e   :  { %3418 = vmatmul.mubr.msk.bf16.vlgmr.msra.gmra.mrb[60].mxu0 %vm453_vm1, %v2127_v34 }
 0xa1f   :  { %3428 = vmatpush3.bf16.xpose.msra.mxu0 %v2261_v49  ;;  %3429 = vmatprep.mubr.msk.bf16.mxu0 %vm3913_vm0, %v3912_v61 }
 0xa20   :  { %3439 = vmatprep.subr.bf16.mxu0 %v3912_v61 }
 0xa26   :  { %3430 = vmatmul.mubr.msk.bf16.vlgmr.msra.gmra.mrb[64].mxu0 %vm453_vm1, %v2254_v32 }
 0xa27   :  { %3440 = vmatpush3.bf16.xpose.msra.mxu0 %v2384_v50  ;;  %3441 = vmatprep.mubr.msk.bf16.mxu0 %vm3913_vm0, %v3912_v61 }
 0xa28   :  { %3451 = vmatprep.subr.bf16.mxu0 %v3912_v61 }
 0xa2e   :  { %3442 = vmatmul.mubr.msk.bf16.vlgmr.msra.gmra.mrb[68].mxu0 %vm453_vm1, %v4359_v13 }
 0xa2f   :  { %3452 = vmatpush3.bf16.xpose.msra.mxu0 %v2506_v55  ;;  %3453 = vmatprep.mubr.msk.bf16.mxu0 %vm3913_vm0, %v3912_v61 }
 0xa30   :  { %3463 = vmatprep.subr.bf16.mxu0 %v3912_v61 }
 0xa36   :  { %3454 = vmatmul.mubr.msk.bf16.vlgmr.msra.gmra.mrb[72].mxu0 %vm453_vm1, %v2498_v54 }
 0xa37   :  { %3464 = vmatpush3.bf16.xpose.msra.mxu0 %v2634_v58  ;;  %3465 = vmatprep.mubr.msk.bf16.mxu0 %vm3913_vm0, %v3912_v61 }
 0xa38   :  { %3475 = vmatprep.subr.bf16.mxu0 %v3912_v61 }
 0xa3e   :  { %3466 = vmatmul.mubr.msk.bf16.vlgmr.msra.gmra.mrb[76].mxu0 %vm453_vm1, %v2627_v57 }
 0xa3f   :  { %3476 = vmatpush3.bf16.xpose.msra.mxu0 %v2761_v33  ;;  %3477 = vmatprep.mubr.msk.bf16.mxu0 %vm3913_vm0, %v3912_v61 }
 0xa46   :  { %3478 = vmatmul.mubr.msk.bf16.vlgmr.msra.gmra.mrb[80].mxu0 %vm453_vm1, %v2754_v35 }
 0xae1   :  { %v1987_v13 = vpop.f32.mrb[52].mxu0 }
 0xae2   :  { %v3401_v3 = vpop.f32.mrb[53].mxu0 }
 0xae3   :  { %v1990_v46 = vpop.f32.mrb[54].mxu0 }
 0xae4   :  { %v1994_v16 = vpack.c.bf16 %v1990_v46, %v1987_v13  ;;  %v3402_v62 = vpop.f32.mrb[55].mxu0 }
 0xae6   :  { %1995 = vst.msk [vmem:[#allocation2] sm:$0xff] %vm453_vm1, %v1994_v16 }
 0xae9   :  { %v2042_v5 = vpop.f32.mrb[56].mxu0 }
 0xaea   :  { %v3407_v30 = vpop.f32.mrb[57].mxu0  ;;  %v2049_v6 = vsel %vm501_vm2, %v2042_v5, -inf }
 0xaeb   :  { %2050 = vmax.xlane.f32.xlu0 %v2049_v6  ;;  %v2045_v8 = vpop.f32.mrb[58].mxu0 }
 0xaec   :  { %v3408_v47 = vpop.f32.mrb[59].mxu0  ;;  %v2052_v52 = vsel %vm501_vm2, %v2045_v8, -inf }
 0xaed   :  { %2053 = vmax.xlane.f32.xlu1 %v2052_v52 }
 0xaf1   :  { %v2170_v53 = vpop.f32.mrb[60].mxu0 }
 0xaf2   :  { %v3419_v11 = vpop.f32.mrb[61].mxu0  ;;  %v2177_v1 = vsel %vm501_vm2, %v2170_v53, -inf }
 0xaf3   :  { %2178 = vmax.xlane.f32.xlu0 %v2177_v1  ;;  %v2173_v15 = vpop.f32.mrb[62].mxu0 }
 0xaf4   :  { %v3420_v60 = vpop.f32.mrb[63].mxu0  ;;  %v2180_v17 = vsel %vm501_vm2, %v2173_v15, -inf }
 0xaf7   :  { %2181 = vmax.xlane.f32.xlu0 %v2180_v17 }
 0xaf9   :  { %v4451_v4 = vpop.f32.mrb[64].mxu0 }
 0xafa   :  { %v3431_v0 = vpop.f32.mrb[65].mxu0  ;;  %v2304_v59 = vsel %vm501_vm2, %v4451_v4, -inf }
 0xafb   :  { %2305 = vmax.xlane.f32.xlu0 %v2304_v59  ;;  %v4455_v19 = vpop.f32.mrb[66].mxu0 }
 0xafc   :  { %v3432_v2 = vpop.f32.mrb[67].mxu0  ;;  %v2307_v42 = vsel %vm501_vm2, %v4455_v19, -inf }
 0xafd   :  { %2308 = vmax.xlane.f32.xlu1 %v2307_v42 }
 0xb01   :  { %v4459_v21 = vpop.f32.mrb[68].mxu0 }
 0xb02   :  { %v3443_v24 = vpop.f32.mrb[69].mxu0  ;;  %v2427_v25 = vsel %vm501_vm2, %v4459_v21, -inf }
 0xb03   :  { %2428 = vmax.xlane.f32.xlu0 %v2427_v25  ;;  %v4463_v26 = vpop.f32.mrb[70].mxu0 }
 0xb04   :  { %v3444_v9 = vpop.f32.mrb[71].mxu0  ;;  %v2430_v27 = vsel %vm501_vm2, %v4463_v26, -inf }
 0xb05   :  { %2431 = vmax.xlane.f32.xlu1 %v2430_v27 }
 0xb09   :  { %v4467_v10 = vpop.f32.mrb[72].mxu0 }
 0xb0a   :  { %v3455_v20 = vpop.f32.mrb[73].mxu0  ;;  %v2549_v23 = vsel %vm501_vm2, %v4467_v10, -inf }
 0xb0b   :  { %2550 = vmax.xlane.f32.xlu0 %v2549_v23  ;;  %v4471_v28 = vpop.f32.mrb[74].mxu0 }
 0xb0c   :  { %v3456_v29 = vpop.f32.mrb[75].mxu0  ;;  %v2552_v14 = vsel %vm501_vm2, %v4471_v28, -inf }
 0xb0d   :  { %2553 = vmax.xlane.f32.xlu1 %v2552_v14 }
 0xb11   :  { %v4475_v18 = vpop.f32.mrb[76].mxu0 }
 0xb12   :  { %v3467_v36 = vpop.f32.mrb[77].mxu0  ;;  %v2677_v37 = vsel %vm501_vm2, %v4475_v18, -inf }
 0xb13   :  { %2678 = vmax.xlane.f32.xlu0 %v2677_v37  ;;  %v4479_v38 = vpop.f32.mrb[78].mxu0 }
 0xb14   :  { %v3468_v44 = vpop.f32.mrb[79].mxu0  ;;  %v2680_v40 = vsel %vm501_vm2, %v4479_v38, -inf }
 0xb15   :  { %2681 = vmax.xlane.f32.xlu1 %v2680_v40 }
 0xb19   :  { %v4483_v41 = vpop.f32.mrb[80].mxu0 }
 0xb1a   :  { %v3479_v31 = vpop.f32.mrb[81].mxu0  ;;  %v2804_v7 = vsel %vm501_vm2, %v4483_v41, -inf }
 0xb1b   :  { %2805 = vmax.xlane.f32.xlu0 %v2804_v7  ;;  %v4487_v39 = vpop.f32.mrb[82].mxu0 }
 0xb1c   :  { %v3480_v43 = vpop.f32.mrb[83].mxu0  ;;  %v2807_v45 = vsel %vm501_vm2, %v4487_v39, -inf }
 0xb1d   :  { %2808 = vmax.xlane.f32.xlu1 %v2807_v45 }
 0xb2e   :  { %2200 = vrot.lane.b32.xlu1 %v4393_v12, %s3908_s0 }
 0xb31   :  { %2073 = vrot.lane.b32.xlu0 %v4393_v12, %s3914_s1 }
 0xb78   :  { %v2051_v48 = vpop.xlane.xlu0 %2050 }
 0xb79   :  { %v2055_v34 = vsub.f32 %v2042_v5, %v2051_v48 }
 0xb7a   :  { %v2054_v49 = vpop.xlane.xlu1 %2053 }
 0xb7b   :  { %v2057_v32 = vmul.f32 1.442695, %v2055_v34  ;;  %v2056_v50 = vsub.f32 %v2045_v8, %v2054_v49 }
 0xb7d   :  { %3700 = vpow2.f32 %v2057_v32  ;;  %v2059_v51 = vmul.f32 1.442695, %v2056_v50 }
 0xb7f   :  { %3702 = vpow2.f32 %v2059_v51 }
 0xb80   :  { %v2179_v55 = vpop.xlane.xlu0 %2178 }
 0xb81   :  { %v2183_v56 = vsub.f32 %v2170_v53, %v2179_v55 }
 0xb83   :  { %v2185_v54 = vmul.f32 1.442695, %v2183_v56 }
 0xb84   :  { %v2182_v58 = vpop.xlane.xlu0 %2181 }
 0xb85   :  { %3704 = vpow2.f32 %v2185_v54  ;;  %v2184_v63 = vsub.f32 %v2173_v15, %v2182_v58 }
 0xb87   :  { %v4495_v57 = vpop.eup %3700  ;;  %v2187_v33 = vmul.f32 1.442695, %v2184_v63 }
 0xb88   :  { %v2306_v35 = vpop.xlane.xlu0 %2305  ;;  %v2061_v13 = vsel %vm501_vm2, %v4495_v57, 0.0 }
 0xb89   :  { %v4499_v3 = vpop.eup %3702  ;;  %3706 = vpow2.f32 %v2187_v33  ;;  %v2310_v46 = vsub.f32 %v4451_v4, %v2306_v35  ;;  %2062 = vadd.xlane.f32.xlu0 %v2061_v13 }
 0xb8a   :  { %v2309_v16 = vpop.xlane.xlu1 %2308  ;;  %v2064_v62 = vsel %vm501_vm2, %v4499_v3, 0.0 }
 0xb8b   :  { %v2312_v5 = vmul.f32 1.442695, %v2310_v46  ;;  %v2311_v30 = vsub.f32 %v4455_v19, %v2309_v16  ;;  %2065 = vadd.xlane.f32.xlu1 %v2064_v62 }
 0xb8d   :  { %3708 = vpow2.f32 %v2312_v5  ;;  %v2314_v6 = vmul.f32 1.442695, %v2311_v30 }
 0xb8f   :  { %v4505_v8 = vpop.eup %3704  ;;  %3710 = vpow2.f32 %v2314_v6 }
 0xb90   :  { %v2429_v47 = vpop.xlane.xlu0 %2428  ;;  %v2189_v52 = vsel %vm501_vm2, %v4505_v8, 0.0 }
 0xb91   :  { %v2433_v53 = vsub.f32 %v4459_v21, %v2429_v47  ;;  %2190 = vadd.xlane.f32.xlu0 %v2189_v52 }
 0xb92   :  { %v2432_v11 = vpop.xlane.xlu1 %2431 }
 0xb93   :  { %v4510_v1 = vpop.eup %3706  ;;  %v2435_v15 = vmul.f32 1.442695, %v2433_v53  ;;  %v2434_v60 = vsub.f32 %v4463_v26, %v2432_v11 }
 0xb94   :  { %v2192_v17 = vsel %vm501_vm2, %v4510_v1, 0.0 }
 0xb95   :  { %3712 = vpow2.f32 %v2435_v15  ;;  %v2437_v4 = vmul.f32 1.442695, %v2434_v60  ;;  %2193 = vadd.xlane.f32.xlu1 %v2192_v17 }
 0xb97   :  { %v4515_v0 = vpop.eup %3708  ;;  %3714 = vpow2.f32 %v2437_v4 }
 0xb98   :  { %v2551_v59 = vpop.xlane.xlu0 %2550  ;;  %v2316_v19 = vsel %vm501_vm2, %v4515_v0, 0.0 }
 0xb99   :  { %v4519_v2 = vpop.eup %3710  ;;  %v2555_v42 = vsub.f32 %v4467_v10, %v2551_v59  ;;  %2317 = vadd.xlane.f32.xlu0 %v2316_v19 }
 0xb9a   :  { %v2554_v21 = vpop.xlane.xlu1 %2553  ;;  %v2319_v24 = vsel %vm501_vm2, %v4519_v2, 0.0 }
 0xb9b   :  { %v2557_v25 = vmul.f32 1.442695, %v2555_v42  ;;  %v2556_v26 = vsub.f32 %v4471_v28, %v2554_v21  ;;  %2320 = vadd.xlane.f32.xlu1 %v2319_v24 }
 0xb9d   :  { %3716 = vpow2.f32 %v2557_v25  ;;  %v2559_v9 = vmul.f32 1.442695, %v2556_v26 }
 0xb9f   :  { %v4525_v27 = vpop.eup %3712  ;;  %3718 = vpow2.f32 %v2559_v9 }
 0xba0   :  { %v2439_v20 = vsel %vm501_vm2, %v4525_v27, 0.0  ;;  %v2679_v28 = vpop.xlane.xlu0 %2678 }
 0xba1   :  { %v4529_v23 = vpop.eup %3714  ;;  %2440 = vadd.xlane.f32.xlu0 %v2439_v20  ;;  %v2683_v56 = vsub.f32 %v4475_v18, %v2679_v28 }
 0xba2   :  { %v2682_v10 = vpop.xlane.xlu1 %2681  ;;  %v2442_v29 = vsel %vm501_vm2, %v4529_v23, 0.0 }
 0xba3   :  { %v2684_v14 = vsub.f32 %v4479_v38, %v2682_v10  ;;  %2443 = vadd.xlane.f32.xlu1 %v2442_v29  ;;  %v2685_v54 = vmul.f32 1.442695, %v2683_v56 }
 0xba5   :  { %v2687_v36 = vmul.f32 1.442695, %v2684_v14 }
 0xba7   :  { %v4534_v37 = vpop.eup %3716  ;;  %3720 = vpow2.f32 %v2687_v36 }
 0xba8   :  { %v2806_v44 = vpop.xlane.xlu0 %2805  ;;  %v2561_v40 = vsel %vm501_vm2, %v4534_v37, 0.0 }
 0xba9   :  { %v4538_v31 = vpop.eup %3718  ;;  %v2810_v7 = vsub.f32 %v4483_v41, %v2806_v44  ;;  %2562 = vadd.xlane.f32.xlu1 %v2561_v40 }
 0xbaa   :  { %v2809_v43 = vpop.xlane.xlu1 %2808  ;;  %v2564_v34 = vsel %vm501_vm2, %v4538_v31, 0.0 }
 0xbab   :  { %v2812_v45 = vmul.f32 1.442695, %v2810_v7  ;;  %v2811_v48 = vsub.f32 %v4487_v39, %v2809_v43 }
 0xbac   :  { %v2074_v38 = vpop.permute.xlu0 %2073 }
 0xbad   :  { %3722 = vpow2.f32 %v2812_v45  ;;  %v2814_v49 = vmul.f32 1.442695, %v2811_v48  ;;  %2565 = vadd.xlane.f32.xlu1 %v2564_v34  ;;  %3410 = vmatpush3.bf16.msra.mxu1 %v2074_v38 }
 0xbae   :  { %3421 = vmatprep.subr.bf16.mxu1 %v3912_v61  ;;  %v2201_v63 = vpop.permute.xlu1 %2200 }
 0xbaf   :  { %3724 = vpow2.f32 %v2814_v49 }
 0xbb0   :  { %3726 = vpow2.f32 %v2685_v54 }
 0xbb1   :  { %v4545_v32 = vpop.eup %3720 }
 0xbb2   :  { %v2692_v41 = vsel %vm501_vm2, %v4545_v32, 0.0 }
 0xbb3   :  { %2693 = vadd.xlane.f32.xlu1 %v2692_v41 }
 0xbb7   :  { %v4549_v50 = vpop.eup %3722  ;;  %2327 = vrot.lane.b32.xlu0 %v4393_v12, %s3915_s2 }
 0xbb8   :  { %v2816_v39 = vsel %vm501_vm2, %v4549_v50, 0.0 }
 0xbb9   :  { %v4555_v51 = vpop.eup %3724  ;;  %2817 = vadd.xlane.f32.xlu1 %v2816_v39 }
 0xbba   :  { %v2819_v55 = vsel %vm501_vm2, %v4555_v51, 0.0  ;;  %v4562_v58 = vpop.eup %3726 }
 0xbbb   :  { %v2689_v12 = vsel %vm501_vm2, %v4562_v58, 0.0 }
 0xbbd   :  { %2820 = vadd.xlane.f32.xlu1 %v2819_v55 }
 0xbce   :  { %2573 = vrot.lane.b32.xlu1 %v4391_v22, %s3914_s1 }
 0xbd6   :  { %2690 = vadd.xlane.f32.xlu0 %v2689_v12 }
 0xbec   :  { %2700 = vrot.lane.b32.xlu0 %v4391_v22, %s3908_s0 }
 0xbf0   :  { %2827 = vrot.lane.b32.xlu0 %v4391_v22, %s3915_s2 }
 0xc16   :  { %v2063_v33 = vpop.xlane.xlu0 %2062 }
 0xc17   :  { %3728 = vrcp.f32 %v2063_v33 }
 0xc18   :  { %v2066_v18 = vpop.xlane.xlu1 %2065 }
 0xc19   :  { %3730 = vrcp.f32 %v2066_v18 }
 0xc1e   :  { %v2191_v35 = vpop.xlane.xlu0 %2190 }
 0xc1f   :  { %3732 = vrcp.f32 %v2191_v35 }
 0xc21   :  { %v3729_v13 = vpop.eup %3728 }
 0xc22   :  { %v2194_v46 = vpop.xlane.xlu1 %2193  ;;  %v2069_v62 = vmul.f32 %v3729_v13, %v4495_v57 }
 0xc23   :  { %v3731_v16 = vpop.eup %3730  ;;  %3734 = vrcp.f32 %v2194_v46 }
 0xc24   :  { %v2070_v5 = vmul.f32 %v3731_v16, %v4499_v3 }
 0xc26   :  { %v2318_v30 = vpop.xlane.xlu0 %2317  ;;  %v2071_v6 = vpack.c.bf16 %v2070_v5, %v2069_v62 }
 0xc27   :  { %3736 = vrcp.f32 %v2318_v30 }
 0xc28   :  { %v2321_v47 = vpop.xlane.xlu1 %2320  ;;  %3412 = vmatmul.mubr.msk.bf16.vlgmr.msra.gmra.mrb[44].mxu1 %vm501_vm2, %v2071_v6  ;;  %v3612_v6 = vld [vmem:[#allocation11] sm:$0xff]  }
 0xc29   :  { %3738 = vrcp.f32 %v2321_v47  ;;  %3422 = vmatpush3.bf16.msra.mxu1 %v2201_v63  ;;  %3423 = vmatprep.mubr.msk.bf16.mxu1 %vm3913_vm0, %v3912_v61  ;;  %v3733_v52 = vpop.eup %3732  ;;  %v3613_v47 = vld [vmem:[#allocation11 + $0x8] sm:$0xff]  }
 0xc2a   :  { %3433 = vmatprep.subr.bf16.mxu1 %v3912_v61  ;;  %v2197_v11 = vmul.f32 %v3733_v52, %v4505_v8  ;;  %v3614_v52 = vld [vmem:[#allocation11 + $0x10] sm:$0xff]  }
 0xc2d   :  { %v3735_v53 = vpop.eup %3734 }
 0xc2e   :  { %v2198_v57 = vmul.f32 %v3735_v53, %v4510_v1  ;;  %v2441_v3 = vpop.xlane.xlu0 %2440 }
 0xc2f   :  { %3740 = vrcp.f32 %v2441_v3 }
 0xc30   :  { %v2444_v15 = vpop.xlane.xlu1 %2443  ;;  %v2199_v60 = vpack.c.bf16 %v2198_v57, %v2197_v11  ;;  %v3615_v11 = vld [vmem:[#allocation11 + $0x18] sm:$0xff]  }
 0xc31   :  { %3742 = vrcp.f32 %v2444_v15  ;;  %v3737_v17 = vpop.eup %3736 }
 0xc32   :  { %3424 = vmatmul.mubr.msk.bf16.vlgmr.msra.gmra.mrb[48].mxu1 %vm501_vm2, %v2199_v60  ;;  %v2328_v4 = vpop.permute.xlu0 %2327  ;;  %v2324_v8 = vmul.f32 %v3737_v17, %v4515_v0  ;;  %v3616_v17 = vld [vmem:[#allocation11 + $0x20] sm:$0xff]  }
 0xc33   :  { %v3739_v59 = vpop.eup %3738  ;;  %3434 = vmatpush3.bf16.msra.mxu1 %v2328_v4  ;;  %3435 = vmatprep.mubr.msk.bf16.mxu1 %vm3913_vm0, %v3912_v61  ;;  %v3617_v4 = vld [vmem:[#allocation11 + $0x28] sm:$0xff]  }
 0xc34   :  { %v2325_v19 = vmul.f32 %v3739_v59, %v4519_v2  ;;  %3445 = vmatprep.subr.bf16.mxu1 %v3912_v61  ;;  %v3618_v59 = vld [vmem:[#allocation11 + $0x30] sm:$0xff]  }
 0xc36   :  { %v2563_v1 = vpop.xlane.xlu1 %2562  ;;  %v2326_v42 = vpack.c.bf16 %v2325_v19, %v2324_v8  ;;  %v3619_v8 = vld [vmem:[#allocation11 + $0x38] sm:$0xff]  }
 0xc39   :  { %v3741_v21 = vpop.eup %3740 }
 0xc3a   :  { %3436 = vmatmul.mubr.msk.bf16.vlgmr.msra.gmra.mrb[52].mxu1 %vm501_vm2, %v2326_v42  ;;  %v2566_v26 = vpop.xlane.xlu1 %2565  ;;  %v2447_v2 = vmul.f32 %v3741_v21, %v4525_v27 }
 0xc3b   :  { %v3743_v24 = vpop.eup %3742  ;;  %3446 = vmatpush3.bf16.msra.mxu1 %v4391_v22  ;;  %3447 = vmatprep.mubr.msk.bf16.mxu1 %vm3913_vm0, %v3912_v61  ;;  %3744 = vrcp.f32 %v2566_v26 }
 0xc3c   :  { %v2448_v25 = vmul.f32 %v3743_v24, %v4529_v23  ;;  %3457 = vmatprep.subr.bf16.mxu1 %v3912_v61  ;;  %3746 = vrcp.f32 %v2563_v1 }
 0xc3e   :  { %v2449_v0 = vpack.c.bf16 %v2448_v25, %v2447_v2 }
 0xc40   :  { %v2694_v9 = vpop.xlane.xlu1 %2693 }
 0xc41   :  { %3748 = vrcp.f32 %v2694_v9 }
 0xc42   :  { %3448 = vmatmul.mubr.msk.bf16.vlgmr.msra.gmra.mrb[56].mxu1 %vm501_vm2, %v2449_v0 }
 0xc43   :  { %3459 = vmatprep.mubr.msk.bf16.mxu1 %vm3913_vm0, %v3912_v61 }
 0xc45   :  { %v3745_v20 = vpop.eup %3744 }
 0xc46   :  { %v2818_v22 = vpop.xlane.xlu1 %2817  ;;  %v3747_v29 = vpop.eup %3746  ;;  %v2570_v23 = vmul.f32 %v3745_v20, %v4538_v31 }
 0xc47   :  { %v2569_v14 = vmul.f32 %v3747_v29, %v4534_v37 }
 0xc49   :  { %v2571_v27 = vpack.c.bf16 %v2570_v23, %v2569_v14 }
 0xc4a   :  { %v2821_v10 = vpop.xlane.xlu1 %2820 }
 0xc4b   :  { %v3749_v37 = vpop.eup %3748 }
 0xc4c   :  { %v2698_v31 = vmul.f32 %v3749_v37, %v4545_v32 }
 0xc4e   :  { %v2574_v28 = vpop.permute.xlu1 %2573 }
 0xc4f   :  { %3458 = vmatpush3.bf16.msra.mxu1 %v2574_v28 }
 0xc50   :  { %3469 = vmatprep.subr.bf16.mxu1 %v3912_v61 }
 0xc52   :  { %3460 = vmatmul.mubr.msk.bf16.vlgmr.msra.gmra.mrb[60].mxu1 %vm501_vm2, %v2571_v27 }
 0xc53   :  { %3471 = vmatprep.mubr.msk.bf16.mxu1 %vm3913_vm0, %v3912_v61 }
 0xc63   :  { %v2691_v36 = vpop.xlane.xlu0 %2690 }
 0xc64   :  { %3750 = vrcp.f32 %v2691_v36  ;;  %v3071_v36 = vld [vmem:[%s4650_s7] ss:$0 sm:$0xff]  ;;  %s3870_s7 = scalar_lea.vmem %s3016_s14, 512 }
 0xc65   :  { %3752 = vrcp.f32 %v2821_v10  ;;  %p3871_p12 = scmp.ne.s32.totalorder %s3016_s14, %s3870_s7  ;;  %p3876_p0 = scmp.lt.s32.totalorder %s3870_s7, %s3870_s7 }
 0xc66   :  { %3754 = vrcp.f32 %v2818_v22 }
 0xc67   :  { %v2701_v44 = vpop.permute.xlu0 %2700  ;;  %p3877_p1 = por %p3876_p0, %p3875_p13 }
 0xc68   :  { %3470 = vmatpush3.bf16.msra.mxu1 %v2701_v44  ;;  %v3756_v44 = vld [vmem:[#allocation3 + $0x18] sm:$0xff] }
 0xc69   :  { %3481 = vmatprep.subr.bf16.mxu1 %v3912_v61  ;;  %v3513_v37 = vadd.f32 %v3756_v44, %v3071_v36  ;;  %p3878_p2 = pnand %p3877_p1, %p3871_p12 }
 0xc6b   :  { %v2828_v48 = vpop.permute.xlu0 %2827 }
 0xc6e   :  { %v3751_v40 = vpop.eup %3750 }
 0xc6f   :  { %v2697_v7 = vmul.f32 %v3751_v40, %v4562_v58  ;;  %v3753_v45 = vpop.eup %3752  ;;  %v3757_v40 = vld [vmem:[#allocation3 + $0x8] sm:$0xff] }
 0xc70   :  { %v3755_v38 = vpop.eup %3754  ;;  %v2825_v34 = vmul.f32 %v3753_v45, %v4555_v51 }
 0xc71   :  { %v2699_v43 = vpack.c.bf16 %v2698_v31, %v2697_v7  ;;  %v2824_v49 = vmul.f32 %v3755_v38, %v4549_v50  ;;  %v3516_v31 = vadd.f32 %v3757_v40, %v3071_v36  ;;  %v3122_v7 = vld [vmem:[%s4653_s10] ss:$0 sm:$0xff] }
 0xc73   :  { %3472 = vmatmul.mubr.msk.bf16.vlgmr.msra.gmra.mrb[64].mxu1 %vm501_vm2, %v2699_v43  ;;  %v2826_v41 = vpack.c.bf16 %v2825_v34, %v2824_v49  ;;  %v3758_v43 = vld [vmem:[#allocation3 + $0x10] sm:$0xff]  ;;  %v3514_v34 = vadd.f32 %v3513_v37, %v3122_v7 }
 0xc74   :  { %3482 = vmatpush3.bf16.msra.mxu1 %v2828_v48  ;;  %3483 = vmatprep.mubr.msk.bf16.mxu1 %vm3913_vm0, %v3912_v61  ;;  %v3507_v45 = vadd.f32 %v3758_v43, %v3071_v36  ;;  %v3759_v48 = vld [vmem:[#allocation3] sm:$0xff] }
 0xc75   :  { %3487 = vmatprep.subr.bf16.mxu1 %v3612_v6  ;;  %v3510_v38 = vadd.f32 %v3759_v48, %v3071_v36 }
 0xc7b   :  { %3484 = vmatmul.mubr.msk.bf16.vlgmr.msra.gmra.mrb[68].mxu1 %vm501_vm2, %v2826_v41  ;;  %v3517_v41 = vadd.f32 %v3516_v31, %v3122_v7 }
 0xc7c   :  { %3488 = vmatpush3.bf16.msra.mxu1 %v3612_v6 }
 0xc7d   :  { %3489 = vmatprep.subr.bf16.mxu1 %v3613_v47 }
 0xc80   :  { %3490 = vmatpush3.bf16.msra.mxu1 %v3613_v47 }
 0xc81   :  { %3491 = vmatprep.subr.bf16.mxu1 %v3614_v52 }
 0xc84   :  { %3492 = vmatpush3.bf16.msra.mxu1 %v3614_v52 }
 0xc85   :  { %3493 = vmatprep.subr.bf16.mxu1 %v3615_v11 }
 0xc88   :  { %3494 = vmatpush3.bf16.msra.mxu1 %v3615_v11 }
 0xc89   :  { %3495 = vmatprep.subr.bf16.mxu1 %v3616_v17 }
 0xc8c   :  { %3496 = vmatpush3.bf16.msra.mxu1 %v3616_v17 }
 0xc8d   :  { %3497 = vmatprep.subr.bf16.mxu1 %v3617_v4 }
 0xc90   :  { %3498 = vmatpush3.bf16.msra.mxu1 %v3617_v4 }
 0xc91   :  { %3499 = vmatprep.subr.bf16.mxu1 %v3618_v59 }
 0xc94   :  { %3500 = vmatpush3.bf16.msra.mxu1 %v3618_v59 }
 0xc95   :  { %3501 = vmatprep.subr.bf16.mxu1 %v3619_v8 }
 0xc98   :  { %3502 = vmatpush3.bf16.msra.mxu1 %v3619_v8 }
 0xcfb   :  { %v2113_v32 = vpop.f32.mrb[44].mxu1 }
 0xcfc   :  { %v3413_v39 = vpop.f32.mrb[45].mxu1 }
 0xcfd   :  { %v2116_v55 = vpop.f32.mrb[46].mxu1 }
 0xcfe   :  { %v2120_v56 = vpack.c.bf16 %v2116_v55, %v2113_v32  ;;  %v3414_v54 = vpop.f32.mrb[47].mxu1 }
 0xd00   :  { %2122 = vrot.lane.b32.xlu0 %v2120_v56, %s3915_s2 }
 0xd05   :  { %v2240_v58 = vpop.f32.mrb[48].mxu1 }
 0xd06   :  { %v3425_v12 = vpop.f32.mrb[49].mxu1 }
 0xd07   :  { %v2243_v63 = vpop.f32.mrb[50].mxu1 }
 0xd08   :  { %v2247_v33 = vpack.c.bf16 %v2243_v63, %v2240_v58  ;;  %v3426_v18 = vpop.f32.mrb[51].mxu1 }
 0xd0a   :  { %2249 = vrot.lane.b32.xlu1 %v2247_v33, %s3908_s0 }
 0xd0d   :  { %v2367_v61 = vpop.f32.mrb[52].mxu1 }
 0xd0e   :  { %v3437_v51 = vpop.f32.mrb[53].mxu1 }
 0xd0f   :  { %v2370_v50 = vpop.f32.mrb[54].mxu1 }
 0xd10   :  { %v2374_v35 = vpack.c.bf16 %v2370_v50, %v2367_v61  ;;  %v3438_v13 = vpop.f32.mrb[55].mxu1 }
 0xd12   :  { %2376 = vrot.lane.b32.xlu1 %v2374_v35, %s3914_s1 }
 0xd15   :  { %v2487_v46 = vpop.f32.mrb[56].mxu1 }
 0xd16   :  { %v3449_v16 = vpop.f32.mrb[57].mxu1 }
 0xd17   :  { %v2490_v62 = vpop.f32.mrb[58].mxu1 }
 0xd18   :  { %v2494_v5 = vpack.c.bf16 %v2490_v62, %v2487_v46  ;;  %v3450_v30 = vpop.f32.mrb[59].mxu1 }
 0xd1a   :  { %2495 = vst.msk [vmem:[#allocation2 + $0x8] sm:$0xff] %vm453_vm1, %v2494_v5 }
 0xd25   :  { %v2613_v53 = vpop.f32.mrb[60].mxu1 }
 0xd26   :  { %v3461_v57 = vpop.f32.mrb[61].mxu1 }
 0xd27   :  { %v2616_v3 = vpop.f32.mrb[62].mxu1 }
 0xd28   :  { %v2620_v15 = vpack.c.bf16 %v2616_v3, %v2613_v53  ;;  %v3462_v60 = vpop.f32.mrb[63].mxu1 }
 0xd2a   :  { %2622 = vrot.lane.b32.xlu0 %v2620_v15, %s3915_s2 }
 0xd46   :  { %v2740_v19 = vpop.f32.mrb[64].mxu1 }
 0xd47   :  { %v3473_v1 = vpop.f32.mrb[65].mxu1 }
 0xd48   :  { %v2743_v42 = vpop.f32.mrb[66].mxu1 }
 0xd49   :  { %v2747_v21 = vpack.c.bf16 %v2743_v42, %v2740_v19  ;;  %v3474_v24 = vpop.f32.mrb[67].mxu1 }
 0xd4b   :  { %2749 = vrot.lane.b32.xlu0 %v2747_v21, %s3908_s0 }
 0xd4e   :  { %v2867_v25 = vpop.f32.mrb[68].mxu1 }
 0xd4f   :  { %v3485_v26 = vpop.f32.mrb[69].mxu1 }
 0xd50   :  { %v2870_v2 = vpop.f32.mrb[70].mxu1 }
 0xd51   :  { %v2874_v0 = vpack.c.bf16 %v2870_v2, %v2867_v25  ;;  %v3486_v9 = vpop.f32.mrb[71].mxu1 }
 0xd53   :  { %2876 = vrot.lane.b32.xlu1 %v2874_v0, %s3914_s1 }
 0xd72   :  { %v2123_v22 = vpop.permute.xlu0 %2122 }
 0xd73   :  { %2125 = vst.msk [vmem:[#allocation2] sm:$0xff] %vm700_vm3, %v2123_v22 }
 0xd7c   :  { %v2250_v20 = vpop.permute.xlu1 %2249 }
 0xd7d   :  { %2252 = vst.msk [vmem:[#allocation2] sm:$0xff] %vm828_vm4, %v2250_v20 }
 0xd84   :  { %v2377_v10 = vpop.permute.xlu1 %2376 }
 0xd85   :  { %2379 = vst.msk [vmem:[#allocation2] sm:$0xff] %vm956_vm5, %v2377_v10 }
 0xd8c   :  { %v2880_v29 = vld [vmem:[#allocation2] sm:$0xff] }
 0xd8d   :  { %3503 = vmatprep.mubr.bf16.mxu1 %v2880_v29 }
 0xd9c   :  { %v2623_v23 = vpop.permute.xlu0 %2622 }
 0xd9d   :  { %2625 = vst.msk [vmem:[#allocation2 + $0x8] sm:$0xff] %vm700_vm3, %v2623_v23 }
 0xdbd   :  { %v2750_v14 = vpop.permute.xlu0 %2749 }
 0xdbe   :  { %2752 = vst.msk [vmem:[#allocation2 + $0x8] sm:$0xff] %vm828_vm4, %v2750_v14 }
 0xdc5   :  { %v2877_v28 = vpop.permute.xlu1 %2876 }
 0xdc6   :  { %2879 = vst.msk [vmem:[#allocation2 + $0x8] sm:$0xff] %vm956_vm5, %v2877_v28 }
 0xdcd   :  { %v2881_v27 = vld [vmem:[#allocation2 + $0x8] sm:$0xff] }
 0xdce   :  { %3504 = vmatmul.mubr.bf16.vlgmr.msra.gmra.mrb[36].mxu1 %v2881_v27 }
 0xea1   :  { %v3505_v49 = vpop.f32.mrb[36].mxu1 }
 0xea2   :  { %v3508_v32 = vadd.f32 %v3507_v45, %v3505_v49  ;;  %v2987_v39 = vpop.f32.mrb[37].mxu1 }
 0xea3   :  { %v3511_v55 = vadd.f32 %v3510_v38, %v2987_v39  ;;  %v3506_v56 = vpop.f32.mrb[38].mxu1 }
 0xea4   :  { %v3509_v54 = vadd.f32 %v3508_v32, %v3122_v7  ;;  %v3515_v58 = vadd.f32 %v3514_v34, %v3506_v56  ;;  %v2990_v12 = vpop.f32.mrb[39].mxu1 }
 0xea5   :  { %v3512_v63 = vadd.f32 %v3511_v55, %v3122_v7  ;;  %v3518_v33 = vadd.f32 %v3517_v41, %v2990_v12 }
 0xea6   :  { %3008 = vst [vmem:[#allocation12 + $0x10] sm:$0xff] %v3509_v54  ;;  %3009 = vst [vmem:[#allocation12 + $0x18] sm:$0xff] %v3515_v58 }
 0xea7   :  { %3006 = vst [vmem:[#allocation12] sm:$0xff] %v3512_v63  ;;  %3007 = vst [vmem:[#allocation12 + $0x8] sm:$0xff] %v3518_v33 }
 0xea8   :  { %3881 = shalt.err (!%p3878_p2)
}
 0xea9   :  { %s3882_s17 = scalar_lea.hbm %s4654_s11, 512 }
 0xeaa   :  { %p3883_p3 = scmp.ne.s32.totalorder %s4654_s11, %s3882_s17  ;;  %p3886_p4 = scmp.lt.u32.totalorder %s3882_s17, %s4654_s11 }
 0xeac   :  { %p3888_p5 = pnand %p3886_p4, %p3883_p3 }
 0xeae   :  { %3891 = shalt.err (!%p3888_p5)
}
 0xeaf   :  { %3021 = dma.vmem_to_hbm [thread:$0]  %s3016_s14, 512, %s4654_s11, [#allocation5], %s3905_s8, %s3905_s8, %s3906_s27  }
 0xeb0   :  { %3898 = dma.done.wait [#allocation5], 512  }
 0xeb1   :  { %3899 = vsyncadd [#allocation5], 4294966784 }
 0xeb2   :  { %3025 = vsyncpa [#allocation4], 1 }
 0xeb3   :  { %3026 = vsyncpa [#allocation7], 1 }
 0xeb4   :  { %3027 = vsyncpa [#allocation10], 1 }
 0xeb5   :  { %3028 = vsyncpa [#allocation5], 1 }

</bundles_post_ra>
